<compile_context>
chip_gen: v7x
topology: tpu7x:2x2x1
jax: 0.10.0
libtpu: 0.0.40
codegen_flags: <defaults>
</compile_context>

<pallas_src>
import jax
import jax.numpy as jnp
from jax.experimental import pallas as pl
from jax.experimental.pallas import tpu as pltpu

# Small, self-consistent stand-in sizes (PyTorch module uses 2048 -> 256 -> C).
N = 2
CIN = 64            # stands in for the 2048-channel backbone output
NDIM = 32           # stands in for ndim = 256
NUM_CLASSES = 8
NC_PAD = 128        # classifier output padded to a full lane tile
H = W = 16
HW = H * W
RATES = (6, 12, 18, 24)
PAD = max(RATES)

K123 = 3 * 9 * CIN                      # fused contraction for rates 6/12/18
K4 = 9 * CIN                            # contraction for rate 24
K123P = ((K123 + 127) // 128) * 128     # lane-aligned K
K4P = ((K4 + 127) // 128) * 128


def aspp_kernel(x123_ref, x4_ref, w123_ref, w4_ref, wc_ref, out_ref):
    """One batch element per grid step.

    x123_ref : (1, HW, K123P) bf16  im2col of rates 6/12/18 (tap-major, K zero-padded)
    x4_ref   : (1, HW, K4P)   bf16  im2col of rate 24
    w123_ref : (K123P, NDIM)  bf16
    w4_ref   : (K4P, NDIM)    bf16
    wc_ref   : (NDIM, NC_PAD) bf16  1x1 classifier weights (classes zero-padded)
    out_ref  : (1, 2, HW, NC_PAD) f32; [:,0]=classifier(relu(c1+c2+c3+c4)),
                                       [:,1]=classifier(relu(c4))
    """
    # Two large-K MXU matmuls replace the 36 per-tap matmuls.
    acc123 = jnp.dot(x123_ref[0], w123_ref[...],
                     preferred_element_type=jnp.float32)          # (HW, NDIM) f32
    acc4 = jnp.dot(x4_ref[0], w4_ref[...],
                   preferred_element_type=jnp.float32)            # (HW, NDIM) f32

    t = jnp.maximum(acc123 + acc4, 0.0)      # relu(c1+c2+c3+c4), f32 epilogue
    t4 = jnp.maximum(acc4, 0.0)              # relu(c4)

    # Fused classifier: stack both branches along M -> a single MXU push.
    t_stack = jnp.concatenate([t, t4], axis=0).astype(jnp.bfloat16)   # (2*HW, NDIM)
    logits = jnp.dot(t_stack, wc_ref[...],
                     preferred_element_type=jnp.float32)              # (2*HW, NC_PAD)

    # Lane-dense single writeback (last dim = 128).
    out_ref[0] = logits.reshape(2, HW, NC_PAD).astype(out_ref.dtype)


def _im2col(xp, rate):
    """xp: (N, H+2P, W+2P, CIN) -> (N, HW, 9*CIN) with taps in (ky, kx, cin) order."""
    taps = []
    for ky in range(3):
        for kx in range(3):
            r0 = PAD + (ky - 1) * rate
            c0 = PAD + (kx - 1) * rate
            taps.append(xp[:, r0:r0 + H, c0:c0 + W, :])
    return jnp.concatenate(taps, axis=-1).reshape(xp.shape[0], HW, 9 * CIN)


def _pad_last(a, target):
    pad = target - a.shape[-1]
    if pad:
        a = jnp.pad(a, [(0, 0)] * (a.ndim - 1) + [(0, pad)])
    return a


def _pad_first(a, target):
    pad = target - a.shape[0]
    if pad:
        a = jnp.pad(a, [(0, pad)] + [(0, 0)] * (a.ndim - 1))
    return a


def deeplab_aspp_forward(x_nchw, conv_weights, wc):
    """x_nchw: (N, CIN, H, W); conv_weights: 4 x (NDIM, CIN, 3, 3) (OIHW);
    wc: (NUM_CLASSES, NDIM, 1, 1). Returns two NCHW f32 logits tensors."""
    n = x_nchw.shape[0]
    x = jnp.transpose(x_nchw, (0, 2, 3, 1)).astype(jnp.bfloat16)     # NHWC, bf16
    xp = jnp.pad(x, ((0, 0), (PAD, PAD), (PAD, PAD), (0, 0)))        # spatial pad

    # Wrapper-side im2col: rates 6/12/18 fused, rate 24 separate (needed for t4).
    cols = [_im2col(xp, d) for d in RATES]
    x123 = _pad_last(jnp.concatenate(cols[:3], axis=-1), K123P)      # (N, HW, K123P)
    x4 = _pad_last(cols[3], K4P)                                     # (N, HW, K4P)

    # OIHW -> (ky, kx, Cin, Cout) -> (9*CIN, NDIM): same tap-major order as im2col.
    ws = [jnp.transpose(wi, (2, 3, 1, 0)).reshape(9 * CIN, NDIM).astype(jnp.bfloat16)
          for wi in conv_weights]
    w123 = _pad_first(jnp.concatenate(ws[:3], axis=0), K123P)        # (K123P, NDIM)
    w4 = _pad_first(ws[3], K4P)                                      # (K4P, NDIM)

    # 1x1 classifier: (NC, NDIM, 1, 1) -> (NDIM, NC) -> lane-pad to (NDIM, 128).
    wc2d = _pad_last(jnp.transpose(wc[:, :, 0, 0], (1, 0)).astype(jnp.bfloat16),
                     NC_PAD)

    out_all = pl.pallas_call(
        aspp_kernel,
        out_shape=jax.ShapeDtypeStruct((n, 2, HW, NC_PAD), jnp.float32),
        grid_spec=pltpu.PrefetchScalarGridSpec(
            num_scalar_prefetch=0,
            grid=(n,),
            in_specs=[
                pl.BlockSpec((1, HW, K123P), lambda b: (b, 0, 0)),
                pl.BlockSpec((1, HW, K4P), lambda b: (b, 0, 0)),
                # Grid-invariant weight blocks: DMA'd once, reused across batch.
                pl.BlockSpec((K123P, NDIM), lambda b: (0, 0)),
                pl.BlockSpec((K4P, NDIM), lambda b: (0, 0)),
                pl.BlockSpec((NDIM, NC_PAD), lambda b: (0, 0)),
            ],
            out_specs=pl.BlockSpec((1, 2, HW, NC_PAD), lambda b: (b, 0, 0, 0)),
        ),
        compiler_params=pltpu.CompilerParams(
            dimension_semantics=("parallel",),
            vmem_limit_bytes=32 * 1024 * 1024,
        ),
    )(x123, x4, w123, w4, wc2d)

    # Split the merged output, drop class padding, back to PyTorch NCHW.
    logits = out_all[:, 0, :, :NUM_CLASSES].reshape(n, H, W, NUM_CLASSES)
    logits4 = out_all[:, 1, :, :NUM_CLASSES].reshape(n, H, W, NUM_CLASSES)
    return (jnp.transpose(logits, (0, 3, 1, 2)),
            jnp.transpose(logits4, (0, 3, 1, 2)))


def reference_forward(x_nchw, conv_weights, wc):
    """Pure-JAX f32 reference mirroring the PyTorch forward (is_CS=False)."""
    dn = ("NCHW", "OIHW", "NCHW")
    convs = [
        jax.lax.conv_general_dilated(
            x_nchw, wi, window_strides=(1, 1),
            padding=[(d, d), (d, d)], rhs_dilation=(d, d),
            dimension_numbers=dn)
        for wi, d in zip(conv_weights, RATES)
    ]
    t = jax.nn.relu(convs[0] + convs[1] + convs[2] + convs[3])
    t4 = jax.nn.relu(convs[3])

    def classify(z):
        return jax.lax.conv_general_dilated(
            z, wc, window_strides=(1, 1), padding=[(0, 0), (0, 0)],
            dimension_numbers=dn)

    return classify(t), classify(t4)


if __name__ == "__main__":
    key = jax.random.PRNGKey(0)
    kx, k1, k2, k3, k4, kc = jax.random.split(key, 6)

    # Backbone feature map stand-in (NCHW, like PyTorch).
    x = jax.random.normal(kx, (N, CIN, H, W), jnp.float32)

    # nn.init.normal_(w, mean=0, std=0.01), bias=False everywhere.
    conv_weights = [
        0.01 * jax.random.normal(k, (NDIM, CIN, 3, 3), jnp.float32)
        for k in (k1, k2, k3, k4)
    ]
    wc = 0.01 * jax.random.normal(kc, (NUM_CLASSES, NDIM, 1, 1), jnp.float32)

    out, out4 = deeplab_aspp_forward(x, conv_weights, wc)
    out = jax.block_until_ready(out)
    out4 = jax.block_until_ready(out4)

    ref, ref4 = reference_forward(x, conv_weights, wc)
    assert out.shape == (N, NUM_CLASSES, H, W)
    assert out4.shape == (N, NUM_CLASSES, H, W)
    # bf16 inputs/weights with f32 accumulation vs f32 reference.
    assert jnp.allclose(out, ref, atol=1e-2, rtol=1e-2), \
        float(jnp.max(jnp.abs(out - ref)))
    assert jnp.allclose(out4, ref4, atol=1e-2, rtol=1e-2), \
        float(jnp.max(jnp.abs(out4 - ref4)))

    print("KERNEL_OK")
</pallas_src>

<mosaic_0001>
module attributes {stable_mosaic.version = 11 : i64} {
  func.func @aspp_kernel(%arg0: i32, %arg1: memref<1x256x1792xbf16, #tpu.memory_space<vmem>>, %arg2: memref<1x256x640xbf16, #tpu.memory_space<vmem>>, %arg3: memref<1792x32xbf16, #tpu.memory_space<vmem>>, %arg4: memref<640x32xbf16, #tpu.memory_space<vmem>>, %arg5: memref<32x128xbf16, #tpu.memory_space<vmem>>, %arg6: memref<1x2x256x128xf32, #tpu.memory_space<vmem>>) attributes {dimension_semantics = [#tpu.dimension_semantics<parallel>], iteration_bounds = array<i64: 2>, scalar_prefetch = 0 : i64, scratch_operands = 0 : i64, tpu.core_type = #tpu.core_type<tc>, window_params = [{transform_indices = @transform_0, window_bounds = array<i64: 1, 256, 1792>}, {transform_indices = @transform_1, window_bounds = array<i64: 1, 256, 640>}, {pipeline_mode = #tpu.pipeline_mode<synchronous>, transform_indices = @transform_2, window_bounds = array<i64: 1792, 32>}, {pipeline_mode = #tpu.pipeline_mode<synchronous>, transform_indices = @transform_3, window_bounds = array<i64: 640, 32>}, {pipeline_mode = #tpu.pipeline_mode<synchronous>, transform_indices = @transform_4, window_bounds = array<i64: 32, 128>}, {transform_indices = @transform_5, window_bounds = array<i64: 1, 2, 256, 128>}]} {
    %c0 = arith.constant 0 : index
    %c0_0 = arith.constant 0 : index
    %c0_1 = arith.constant 0 : index
    %0 = vector.load %arg1[%c0, %c0_0, %c0_1] : memref<1x256x1792xbf16, #tpu.memory_space<vmem>>, vector<1x256x1792xbf16>
    %1 = vector.shape_cast %0 : vector<1x256x1792xbf16> to vector<256x1792xbf16>
    %c0_2 = arith.constant 0 : index
    %c0_3 = arith.constant 0 : index
    %2 = vector.load %arg3[%c0_2, %c0_3] : memref<1792x32xbf16, #tpu.memory_space<vmem>>, vector<1792x32xbf16>
    %cst = arith.constant dense<0.000000e+00> : vector<256x32xf32>
    %3 = tpu.matmul %1, %2, %cst {dimension_numbers = #tpu.dot_dimension_numbers<[1], [0], [0], [1], [0, 0, 1, 1], [], []>} : vector<256x1792xbf16>, vector<1792x32xbf16>, vector<256x32xf32> -> vector<256x32xf32>
    %c0_4 = arith.constant 0 : index
    %c0_5 = arith.constant 0 : index
    %c0_6 = arith.constant 0 : index
    %4 = vector.load %arg2[%c0_4, %c0_5, %c0_6] : memref<1x256x640xbf16, #tpu.memory_space<vmem>>, vector<1x256x640xbf16>
    %5 = vector.shape_cast %4 : vector<1x256x640xbf16> to vector<256x640xbf16>
    %c0_7 = arith.constant 0 : index
    %c0_8 = arith.constant 0 : index
    %6 = vector.load %arg4[%c0_7, %c0_8] : memref<640x32xbf16, #tpu.memory_space<vmem>>, vector<640x32xbf16>
    %cst_9 = arith.constant dense<0.000000e+00> : vector<256x32xf32>
    %7 = tpu.matmul %5, %6, %cst_9 {dimension_numbers = #tpu.dot_dimension_numbers<[1], [0], [0], [1], [0, 0, 1, 1], [], []>} : vector<256x640xbf16>, vector<640x32xbf16>, vector<256x32xf32> -> vector<256x32xf32>
    %8 = arith.addf %3, %7 : vector<256x32xf32>
    %cst_10 = arith.constant 0.000000e+00 : f32
    %9 = vector.broadcast %cst_10 : f32 to vector<256x32xf32>
    %10 = arith.maximumf %8, %9 : vector<256x32xf32>
    %cst_11 = arith.constant 0.000000e+00 : f32
    %11 = vector.broadcast %cst_11 : f32 to vector<256x32xf32>
    %12 = arith.maximumf %7, %11 : vector<256x32xf32>
    %13 = tpu.concatenate %10, %12 in 0 : vector<256x32xf32>, vector<256x32xf32> -> vector<512x32xf32>
    %14 = arith.truncf %13 : vector<512x32xf32> to vector<512x32xbf16>
    %c0_12 = arith.constant 0 : index
    %c0_13 = arith.constant 0 : index
    %15 = vector.load %arg5[%c0_12, %c0_13] : memref<32x128xbf16, #tpu.memory_space<vmem>>, vector<32x128xbf16>
    %cst_14 = arith.constant dense<0.000000e+00> : vector<512x128xf32>
    %16 = tpu.matmul %14, %15, %cst_14 {dimension_numbers = #tpu.dot_dimension_numbers<[1], [0], [0], [1], [0, 0, 1, 1], [], []>} : vector<512x32xbf16>, vector<32x128xbf16>, vector<512x128xf32> -> vector<512x128xf32>
    %17 = vector.shape_cast %16 : vector<512x128xf32> to vector<2x256x128xf32>
    %c0_15 = arith.constant 0 : index
    %c0_16 = arith.constant 0 : index
    %c0_17 = arith.constant 0 : index
    %c0_18 = arith.constant 0 : index
    %18 = vector.load %arg6[%c0_15, %c0_16, %c0_17, %c0_18] : memref<1x2x256x128xf32, #tpu.memory_space<vmem>>, vector<1x2x256x128xf32>
    %19 = vector.shape_cast %18 : vector<1x2x256x128xf32> to vector<2x256x128xf32>
    %20 = vector.shape_cast %17 : vector<2x256x128xf32> to vector<1x2x256x128xf32>
    tpu.vector_store %arg6[%c0_15, %c0_16, %c0_17, %c0_18], %20 {strides = array<i32>} : memref<1x2x256x128xf32, #tpu.memory_space<vmem>>, vector<1x2x256x128xf32>,
    return
  }
  func.func @transform_0(%arg0: i32) -> (i32, i32, i32) {
    %c0_i32 = arith.constant 0 : i32
    %c0_i32_0 = arith.constant 0 : i32
    %c0_i32_1 = arith.constant 0 : i32
    return %arg0, %c0_i32, %c0_i32_0 : i32, i32, i32
  }
  func.func @transform_1(%arg0: i32) -> (i32, i32, i32) {
    %c0_i32 = arith.constant 0 : i32
    %c0_i32_0 = arith.constant 0 : i32
    %c0_i32_1 = arith.constant 0 : i32
    return %arg0, %c0_i32, %c0_i32_0 : i32, i32, i32
  }
  func.func @transform_2(%arg0: i32) -> (i32, i32) {
    %c0_i32 = arith.constant 0 : i32
    %c0_i32_0 = arith.constant 0 : i32
    %c0_i32_1 = arith.constant 0 : i32
    return %c0_i32, %c0_i32_0 : i32, i32
  }
  func.func @transform_3(%arg0: i32) -> (i32, i32) {
    %c0_i32 = arith.constant 0 : i32
    %c0_i32_0 = arith.constant 0 : i32
    %c0_i32_1 = arith.constant 0 : i32
    return %c0_i32, %c0_i32_0 : i32, i32
  }
  func.func @transform_4(%arg0: i32) -> (i32, i32) {
    %c0_i32 = arith.constant 0 : i32
    %c0_i32_0 = arith.constant 0 : i32
    %c0_i32_1 = arith.constant 0 : i32
    return %c0_i32, %c0_i32_0 : i32, i32
  }
  func.func @transform_5(%arg0: i32) -> (i32, i32, i32, i32) {
    %c0_i32 = arith.constant 0 : i32
    %c0_i32_0 = arith.constant 0 : i32
    %c0_i32_1 = arith.constant 0 : i32
    %c0_i32_2 = arith.constant 0 : i32
    return %arg0, %c0_i32, %c0_i32_0, %c0_i32_1 : i32, i32, i32, i32
  }
}

</mosaic_0001>

<bundles_post_ra>
// kernel: tpu_custom_call.1
= control target key start
LH: loop header
LB: loop body
LE: loop exit
PB: predicated region body
PF: predicated region fallthrough
CT: control target
= control target key end

     0   :  { %s9930_s0 = inlined_call_operand.hbm [shape: bf16[2,256,1792], index: 0, kind: input, shape index: {}]   ;;  %s9931_s1 = inlined_call_operand.hbm [shape: bf16[2,256,640], index: 1, kind: input, shape index: {}]   ;;  %s9932_s2 = inlined_call_operand.vmem [shape: bf16[1792,32], index: 2, kind: input, shape index: {}]   ;;  %s9933_s3 = inlined_call_operand.vmem [shape: bf16[640,32], index: 3, kind: input, shape index: {}]   ;;  %s9934_s4 = inlined_call_operand.hbm [shape: bf16[32,128], index: 4, kind: input, shape index: {}]   ;;  %s9935_s5 = inlined_call_operand.hbm [shape: f32[2,2,256,128], index: 5, kind: output, shape index: {}]  }
   0x1   :  { %9961 = sst [smem:[#allocation36_spill]] %s9930_s0 }
   0x2   :  { %9962 = sst [smem:[#allocation37_spill]] %s9934_s4 }
   0x3   :  { %10 = vsyncpa [#allocation3], 0 }
   0x4   :  { %12 = vsyncpa [#allocation3 + $0x1], 0 }
   0x5   :  { %13 = vsyncpa [#allocation6], 0 }
   0x6   :  { %15 = vsyncpa [#allocation6 + $0x1], 0 }
   0x7   :  { %16 = vsyncpa [#allocation4], 0 }
   0x8   :  { %18 = vsyncpa [#allocation4 + $0x1], 0  ;;  %s8248_s18 = smov 0   ;;  %s8250_s19 = smov 0  }
   0x9   :  { %s8252_s20 = smov 0   ;;  %s8254_s21 = smov 0  }
   0xa LB: > { %s8269_s22 = sadd.s32 4294967295, %s8204_s21   ;;  %s5661_s23 = sadd.s32 4294967294, %s8204_s21   ;;  %s8204_s21 = sphi %s8254_s21, %s10027_s21   ;;  %s8200_s20 = sphi %s8252_s20, %s10026_s20   ;;  %s8196_s19 = sphi %s8250_s19, %s10025_s19   ;;  %s8192_s18 = sphi %s8248_s18, %s10024_s18  }
   0xb   : > { %p44_p0 = scmp.ne.s32.totalorder %s8196_s19, %s8192_s18  ;;  %p9936_p1 = scmp.eq.s32.totalorder %s8269_s22, 0 }
   0xc   : > { %p163_p3 = scmp.eq.s32.totalorder %s5661_s23, 1  ;;  %p5662_p5 = scmp.ge.s32.totalorder %s8204_s21, 1 }
   0xd   : > { %p8278_p4 = por %p9936_p1, %p44_p0  ;;  %p170_p7 = scmp.lt.s32.totalorder %s8204_s21, 3 }
   0xe   : > { %p8283_p6 = por %p163_p3, %p44_p0  ;;  %s8206_s27 = smov [#allocation7]  }
   0xf   : > { %s9963_s24 = scalar_select %p8278_p4, 1, 0 }
  0x10   : > { %s9964_s25 = scalar_select %p8283_p6, 1, 0 }
  0x11   : > { %p8288_p8 = pnand %p5662_p5, %p170_p7  ;;  %s188_s28 = sshll.u32 %s8206_s27, 4  ;;  %s8292_s28 = int_to_ptr.vmem [resolvable:$true] %s188_s28 }
  0x12   : > { %s8304_s30 = sadd.s32 1, %s8204_s21   ;;  %s31_s6 = sadd.s32 1, %s8200_s20 }
  0x13   : > { %s9965_s26 = scalar_select %p8288_p8, 1, 0 }
  0x14   : > { %p7380_p9 = pneg %p8288_p8  ;;  %s28_s7 = ssub.s32 %s8204_s21, %s8304_s30 }
  0x15   : > { %s9967_s4 = sld [smem:[#allocation37_spill]] }
  0x16   : > { %p8299_p11 = pnand %p7380_p9, %p9936_p1 }
  0x18   : > { %p8044_p13 = pneg %p8299_p11 }
  0x1b   : > { %s8042_s10 = scalar_lea.hbm %s9967_s4, 256 }
  0x1c   : > { %p8043_p12 = scmp.ne.s32.totalorder %s9967_s4, %s8042_s10  ;;  %p8049_p5 = scmp.lt.u32.totalorder %s8042_s10, %s9967_s4 }
  0x1e   : > { %p8045_p0 = pnand %p8044_p13, %p8043_p12 }
  0x20   : > { %p8046_p3 = pneg %p8045_p0 }
  0x22   : > { %p8051_p7 = pnand %p8049_p5, %p8046_p3 }
  0x24   : > { %8054 = shalt.err (!%p8051_p7)
}
  0x25   : > { %s8055_s15 = scalar_lea.vmem %s8292_s28, 256  ;;  %p8063_p2 = scmp.lt.s32.totalorder %s8292_s28, %s8292_s28 }
  0x26   : > { %p8056_p9 = scmp.ne.s32.totalorder %s8292_s28, %s8055_s15  ;;  %p8064_p6 = scmp.lt.s32.totalorder %s8055_s15, %s8055_s15 }
  0x28   : > { %p8058_p10 = pnand %p8056_p9, %p8044_p13  ;;  %p8065_p4 = por %p8064_p6, %p8063_p2 }
  0x2a   : > { %p8059_p1 = pneg %p8058_p10 }
  0x2c   : > { %p8066_p8 = pnand %p8065_p4, %p8059_p1 }
  0x2e   : > { %8069 = shalt.err (!%p8066_p8)
}
  0x2f   : > { %s8207_s16 = smov 64   ;;  %s8208_s17 = smov 4  }
  0x30   : > { %7383 = dma.hbm_to_vmem [thread:$0]  (!%p8299_p11), %s9967_s4, 256, %s8292_s28, [#allocation6], %s8207_s16, %s8207_s16, %s8208_s17  }
  0x31   : > { %p29_p2 = scmp.eq.s32.totalorder %s28_s7, 0  ;;  %p38_p1 = scmp.ne.s32.totalorder %s8200_s20, %s8196_s19 }
  0x32   : > { %p39_p4 = scmp.eq.s32.totalorder %s8204_s21, 0  ;;  %p7396_p6 = scmp.lt.s32.totalorder %s8204_s21, 2 }
  0x33   : > { %s8335_s8 = scalar_select %p29_p2, %s8200_s20, %s31_s6  }
  0x34   : > { %p40_p8 = por %p39_p4, %p38_p1  ;;  %p9969_p10 = scmp.eq.s32.totalorder %s8269_s22, 1 }
  0x35   : > { %9968 = sst [smem:[#allocation13_spill]] %s8335_s8  ;;  %s8344_s10 = sand.u32 1, %s8200_s20  }
  0x36   : > { %p8339_p12 = por %p9969_p10, %p38_p1  ;;  %s7365_s29 = smul.u32 28672, %s8204_s21 }
  0x37   : > { %s7364_s11 = smul.u32 1792, %s8344_s10  ;;  %s9971_s0 = sld [smem:[#allocation36_spill]] }
  0x38   : > { %p8353_p11 = pnand %p7396_p6, %p40_p8  ;;  %s203_s15 = scalar_lea.sflag [#allocation3], %s8344_s10 }
  0x39   : > { %s206_s13 = scalar_lea.vmem [#allocation2], %s7364_s11 }
  0x3a   : > { %s213_s14 = sshll.u32 %s206_s13, 4  ;;  %p8072_p0 = pneg %p8353_p11  ;;  %s8357_s14 = int_to_ptr.vmem [resolvable:$true] %s213_s14 }
  0x3d   : > { %s8351_s7 = scalar_lea.hbm %s9971_s0, %s7365_s29  ;;  %s8075_s27 = scalar_lea.hbm %s9971_s0, 57344 }
  0x3e   : > { %s8070_s16 = scalar_lea.hbm %s8351_s7, 28672  ;;  %p8076_p7 = scmp.lt.u32.totalorder %s8351_s7, %s9971_s0 }
  0x3f   : > { %p8071_p13 = scmp.ne.s32.totalorder %s8351_s7, %s8070_s16  ;;  %p8077_p9 = scmp.lt.u32.totalorder %s8075_s27, %s8070_s16 }
  0x40   : > { %p8079_p1 = scmp.lt.u32.totalorder %s8070_s16, %s8351_s7 }
  0x41   : > { %p8073_p3 = pnand %p8072_p0, %p8071_p13  ;;  %p8078_p2 = por %p8077_p9, %p8076_p7 }
  0x43   : > { %p8074_p5 = pneg %p8073_p3  ;;  %p8080_p4 = por %p8079_p1, %p8078_p2 }
  0x45   : > { %p8081_p6 = pnand %p8080_p4, %p8074_p5 }
  0x47   : > { %8084 = shalt.err (!%p8081_p6)
}
  0x48   : > { %s8085_s11 = scalar_lea.vmem %s8357_s14, 28672  ;;  %s8209_s28 = smov [#allocation2]  }
  0x49   : > { %p8086_p8 = scmp.ne.s32.totalorder %s8357_s14, %s8085_s11  ;;  %s8090_s13 = sshll.u32 %s8209_s28, 4  ;;  %s8091_s13 = int_to_ptr.vmem [resolvable:$false] %s8090_s13 }
  0x4a   : > { %s8092_s17 = scalar_lea.vmem %s8091_s13, 57344  ;;  %p8093_p3 = scmp.lt.s32.totalorder %s8357_s14, %s8091_s13 }
  0x4b   : > { %p8088_p10 = pnand %p8086_p8, %p8072_p0  ;;  %p8094_p7 = scmp.lt.s32.totalorder %s8092_s17, %s8085_s11 }
  0x4d   : > { %p8089_p13 = pneg %p8088_p10  ;;  %p8095_p9 = por %p8094_p7, %p8093_p3 }
  0x4f   : > { %p8096_p2 = pnand %p8095_p9, %p8089_p13 }
  0x51   : > { %8099 = shalt.err (!%p8096_p2)
}
  0x52   : > { %s8210_s16 = smov 896   ;;  %s8211_s23 = smov 56  }
  0x53   : > { %7387 = dma.hbm_to_vmem [thread:$0]  (!%p8353_p11), %s8351_s7, 28672, %s8357_s14, %s203_s15, %s8210_s16, %s8210_s16, %s8211_s23  }
  0x54   : > { %s223_s27 = sand.u32 1, %s8204_s21   ;;  %s7366_s29 = smul.u32 640, %s8344_s10 }
  0x55   : > { %s7367_s12 = smul.u32 10240, %s8204_s21  ;;  %s8397_s4 = scalar_lea.sflag [#allocation6], %s223_s27 }
  0x56   : > { %s227_s17 = scalar_lea.vmem [#allocation5], %s7366_s29  ;;  %s8105_s14 = scalar_lea.hbm %s9931_s1, 20480 }
  0x57   : > { %s8393_s13 = scalar_lea.hbm %s9931_s1, %s7367_s12  ;;  %s234_s0 = sshll.u32 %s227_s17, 4  ;;  %s8395_s0 = int_to_ptr.vmem [resolvable:$true] %s234_s0 }
  0x58   : > { %s8100_s8 = scalar_lea.hbm %s8393_s13, 10240  ;;  %p8106_p6 = scmp.lt.u32.totalorder %s8393_s13, %s9931_s1 }
  0x59   : > { %p8101_p5 = scmp.ne.s32.totalorder %s8393_s13, %s8100_s8  ;;  %p8107_p8 = scmp.lt.u32.totalorder %s8105_s14, %s8100_s8 }
  0x5a   : > { %p8109_p13 = scmp.lt.u32.totalorder %s8100_s8, %s8393_s13 }
  0x5b   : > { %p8103_p1 = pnand %p8101_p5, %p8072_p0  ;;  %p8108_p10 = por %p8107_p8, %p8106_p6 }
  0x5d   : > { %p8104_p4 = pneg %p8103_p1  ;;  %p8110_p3 = por %p8109_p13, %p8108_p10 }
  0x5f   : > { %p8111_p7 = pnand %p8110_p3, %p8104_p4 }
  0x61   : > { %8114 = shalt.err (!%p8111_p7)
}
  0x62   : > { %s8115_s23 = scalar_lea.vmem %s8395_s0, 10240  ;;  %s8212_s27 = smov [#allocation5]  }
  0x63   : > { %p8116_p9 = scmp.ne.s32.totalorder %s8395_s0, %s8115_s23  ;;  %s8120_s29 = sshll.u32 %s8212_s27, 4  ;;  %s8121_s29 = int_to_ptr.vmem [resolvable:$false] %s8120_s29 }
  0x64   : > { %s8122_s12 = scalar_lea.vmem %s8121_s29, 20480  ;;  %p8123_p1 = scmp.lt.s32.totalorder %s8395_s0, %s8121_s29 }
  0x65   : > { %p8118_p2 = pnand %p8116_p9, %p8072_p0  ;;  %p8124_p6 = scmp.lt.s32.totalorder %s8122_s12, %s8115_s23 }
  0x67   : > { %p8119_p5 = pneg %p8118_p2  ;;  %p8125_p8 = por %p8124_p6, %p8123_p1 }
  0x69   : > { %p8126_p10 = pnand %p8125_p8, %p8119_p5 }
  0x6b   : > { %8129 = shalt.err (!%p8126_p10)
}
  0x6c   : > { %s8213_s8 = smov 320   ;;  %s8214_s11 = smov 20  }
  0x6d   : > { %7390 = dma.hbm_to_vmem [thread:$0]  (!%p8353_p11), %s8393_s13, 10240, %s8395_s0, %s8397_s4, %s8213_s8, %s8213_s8, %s8214_s11  }
  0x6e   : > { %p9973_p0 = scmp.ne.s32.totalorder %s9965_s26, 0 }
  0x70   : > { %246 = sbr.rel (%p9973_p0) target bundleno = 1345 (0x541), region = 40 }
  0x77   : > { %s8426_s28 = sand.u32 1, %s8196_s19   ;;  %p9974_p4 = scmp.ne.s32.totalorder %s9963_s24, 0 }
  0x78   : > { %s7368_s17 = smul.u32 1792, %s8426_s28  ;;  %s249_s10 = scalar_lea.sflag [#allocation3], %s8426_s28 }
  0x7a   : > { %s8430_s7 = scalar_lea.vmem [#allocation2], %s7368_s17 }
  0x7b   : > { %8175 = dma.done.wait (%p9974_p4), %s249_s10, 28672  }
  0x7c   : > { %8177 = vsyncadd (%p9974_p4), %s249_s10, 4294938624  ;;  %s257_s0 = sand.u32 1, %s8269_s22   ;;  %s7369_s4 = smul.u32 640, %s8426_s28 }
  0x7d   : > { %s258_s26 = scalar_lea.sflag [#allocation6], %s257_s0 }
  0x7e   : > { %s8438_s6 = scalar_lea.vmem [#allocation5], %s7369_s4 }
  0x7f   : > { %8179 = dma.done.wait (%p9974_p4), %s258_s26, 10240  }
  0x80   : > { %8181 = vsyncadd (%p9974_p4), %s258_s26, 4294957056  ;;  %p9975_p11 = scmp.eq.s32.totalorder %s8269_s22, 0 }
  0x82   : > { %8183 = dma.done.wait (%p9975_p11), [#allocation6], 256   ;;  %p9976_p13 = pmov %p9975_p11 }
  0x83   : > { %v7440_v0 = vld [vmem:[%s9933_s3 + $0x40] sm:$0xff]   ;;  %v7442_v2 = vld [vmem:[%s9933_s3 + $0x48] sm:$0xff]   ;;  %v7444_v4 = vld [vmem:[%s9933_s3 + $0x50] sm:$0xff]   ;;  %vm5092_vm0 = vcmask 261120   ;;  %s6165_s29 = sshll.u32 %s8269_s22, 13  ;;  %s5543_s22 = scalar_lea.sflag [#allocation4], %s8426_s28 }
  0x84   : > { %8185 = vsyncadd (%p9976_p13), [#allocation6], 4294967040  ;;  %v7441_v1 = vld [vmem:[%s9933_s3] sm:$0xff]   ;;  %6166 = vmatprep.subr.bf16.mxu0 %v7440_v0  ;;  %7348 = vmatprep.subr.bf16.mxu1 %v7440_v0  ;;  %v7443_v3 = vld [vmem:[%s9933_s3 + $0x8] sm:$0xff]   ;;  %s9881_s17 = scalar_lea.hbm %s9935_s5, %s6165_s29  ;;  %s8215_s0 = smov [#allocation8]  }
  0x85   : > { %6167 = vmatpush3.bf16.msra.mxu0 %v7441_v1  ;;  %7356 = vmatpush3.bf16.msra.mxu1 %v7441_v1  ;;  %v7445_v5 = vld [vmem:[%s9933_s3 + $0x10] sm:$0xff]   ;;  %v7446_v6 = vld [vmem:[%s9933_s3 + $0x58] sm:$0xff]   ;;  %v7448_v8 = vld [vmem:[%s9933_s3 + $0x60] sm:$0xff]   ;;  %s8134_s4 = sshll.u32 %s8215_s0, 4  ;;  %s8135_s4 = int_to_ptr.vmem [resolvable:$false] %s8134_s4 }
  0x86   : > { %6168 = vmatprep.subr.bf16.mxu0 %v7442_v2  ;;  %7349 = vmatprep.subr.bf16.mxu1 %v7442_v2  ;;  %v7447_v7 = vld [vmem:[%s9933_s3 + $0x18] sm:$0xff]   ;;  %v7449_v9 = vld [vmem:[%s9933_s3 + $0x20] sm:$0xff]   ;;  %v7450_v10 = vld [vmem:[%s9933_s3 + $0x68] sm:$0xff]   ;;  %s8136_s26 = scalar_lea.vmem %s8135_s4, 16384 }
  0x87   : > { %v7458_v11 = vld [vmem:[%s8438_s6 + $0x4] ss:$20 sps:$4 sm:$0xff]   ;;  %v7451_v13 = vld [vmem:[%s9933_s3 + $0x28] sm:$0xff]   ;;  %v7452_v14 = vld [vmem:[%s9933_s3 + $0x70] sm:$0xff]  }
  0x88   : > { %v7461_v12 = vld [vmem:[%s8438_s6 + $0x1e4] ss:$20 sps:$4 sm:$0xff]   ;;  %1610 = vmatprep.mubr.bf16.mxu0 %v7458_v11  ;;  %v7453_v15 = vld [vmem:[%s9933_s3 + $0x30] sm:$0xff]   ;;  %v7464_v22 = vld [vmem:[%s9933_s3 + $0xc8] sm:$0xff]  }
  0x89   : > { %6169 = vmatpush3.bf16.msra.mxu0 %v7443_v3  ;;  %7357 = vmatpush3.bf16.msra.mxu1 %v7443_v3  ;;  %v7454_v16 = vld [vmem:[%s9933_s3 + $0x78] sm:$0xff]   ;;  %v7462_v18 = vld [vmem:[%s9933_s3 + $0xc0] sm:$0xff]   ;;  %v7465_v25 = vld [vmem:[%s9933_s3 + $0x88] sm:$0xff]  }
  0x8a   : > { %6170 = vmatprep.subr.bf16.mxu0 %v7444_v4  ;;  %7350 = vmatprep.subr.bf16.mxu1 %v7444_v4  ;;  %v7455_v17 = vld [vmem:[%s9933_s3 + $0x38] sm:$0xff]   ;;  %v7456_v19 = vld [vmem:[%s8438_s6] ss:$20 sps:$4 sm:$0xff]   ;;  %v7480_v34 = vld [vmem:[%s8438_s6 + $0x50] ss:$20 sps:$4 sm:$0xff]  }
  0x8b   : > { %1706 = vmatprep.mubr.bf16.mxu1 %v7461_v12  ;;  %v7459_v20 = vld [vmem:[%s8438_s6 + $0x1e0] ss:$20 sps:$4 sm:$0xff]   ;;  %v7470_v26 = vld [vmem:[%s8438_s6 + $0x28] ss:$20 sps:$4 sm:$0xff]   ;;  %v7481_v35 = vld [vmem:[%s8438_s6 + $0x230] ss:$20 sps:$4 sm:$0xff]  }
  0x8c   : > { %v7463_v21 = vld [vmem:[%s9933_s3 + $0x80] sm:$0xff]   ;;  %v7472_v27 = vld [vmem:[%s9933_s3 + $0xd0] sm:$0xff]   ;;  %v7471_v28 = vld [vmem:[%s8438_s6 + $0x208] ss:$20 sps:$4 sm:$0xff]  }
  0x8d   : > { %6171 = vmatpush3.bf16.msra.mxu0 %v7445_v5  ;;  %7358 = vmatpush3.bf16.msra.mxu1 %v7445_v5  ;;  %v7466_v23 = vld [vmem:[%s8438_s6 + $0x2c] ss:$20 sps:$4 sm:$0xff]   ;;  %v7473_v29 = vld [vmem:[%s9933_s3 + $0x90] sm:$0xff]   ;;  %v7474_v30 = vld [vmem:[%s9933_s3 + $0xd8] sm:$0xff]  }
  0x8e   : > { %6172 = vmatprep.subr.bf16.mxu0 %v7446_v6  ;;  %7351 = vmatprep.subr.bf16.mxu1 %v7446_v6  ;;  %v7468_v24 = vld [vmem:[%s8438_s6 + $0x20c] ss:$20 sps:$4 sm:$0xff]   ;;  %v7476_v31 = vld [vmem:[%s8438_s6 + $0x54] ss:$20 sps:$4 sm:$0xff]   ;;  %v7475_v33 = vld [vmem:[%s9933_s3 + $0x98] sm:$0xff]  }
  0x8f   : > { %v7478_v32 = vld [vmem:[%s8438_s6 + $0x234] ss:$20 sps:$4 sm:$0xff]   ;;  %v7482_v36 = vld [vmem:[%s9933_s3 + $0xe0] sm:$0xff]   ;;  %v7486_v39 = vld [vmem:[%s8438_s6 + $0x7c] ss:$20 sps:$4 sm:$0xff]  }
  0x90   : > { %v7483_v37 = vld [vmem:[%s9933_s3 + $0xa0] sm:$0xff]   ;;  %v7484_v38 = vld [vmem:[%s9933_s3 + $0xe8] sm:$0xff]   ;;  %v7488_v40 = vld [vmem:[%s8438_s6 + $0x25c] ss:$20 sps:$4 sm:$0xff]  }
  0x91   : > { %6173 = vmatpush3.bf16.msra.mxu0 %v7447_v7  ;;  %7359 = vmatpush3.bf16.msra.mxu1 %v7447_v7  ;;  %v7485_v41 = vld [vmem:[%s9933_s3 + $0xa8] sm:$0xff]   ;;  %v7492_v43 = vld [vmem:[%s9933_s3 + $0xf0] sm:$0xff]   ;;  %v7496_v46 = vld [vmem:[%s8438_s6 + $0xa4] ss:$20 sps:$4 sm:$0xff]  }
  0x92   : > { %6174 = vmatprep.subr.bf16.mxu0 %v7448_v8  ;;  %7352 = vmatprep.subr.bf16.mxu1 %v7448_v8  ;;  %v7490_v42 = vld [vmem:[%s8438_s6 + $0x78] ss:$20 sps:$4 sm:$0xff]   ;;  %v7493_v45 = vld [vmem:[%s9933_s3 + $0xb0] sm:$0xff]   ;;  %v7502_v50 = vld [vmem:[%s9932_s2 + $0x40] sm:$0xff]  }
  0x93   : > { %v7491_v44 = vld [vmem:[%s8438_s6 + $0x258] ss:$20 sps:$4 sm:$0xff]   ;;  %v7498_v51 = vld [vmem:[%s8438_s6 + $0x8] ss:$20 sps:$4 sm:$0xff]   ;;  %v7501_v52 = vld [vmem:[%s8438_s6 + $0xa0] ss:$20 sps:$4 sm:$0xff]  }
  0x94   : > { %v7494_v47 = vld [vmem:[%s9933_s3 + $0xf8] sm:$0xff]   ;;  %v7500_v48 = vld [vmem:[%s8438_s6 + $0xc] ss:$20 sps:$4 sm:$0xff]   ;;  %v7506_v56 = vld [vmem:[%s8438_s6 + $0x34] ss:$20 sps:$4 sm:$0xff]  }
  0x95   : > { %6175 = vmatpush3.bf16.msra.mxu0 %v7449_v9  ;;  %7360 = vmatpush3.bf16.msra.mxu1 %v7449_v9  ;;  %v7495_v49 = vld [vmem:[%s9933_s3 + $0xb8] sm:$0xff]   ;;  %v7530_v53 = vld [vmem:[%s9933_s3 + $0x100] sm:$0xff]   ;;  %v7533_v57 = vld [vmem:[%s9933_s3 + $0x108] sm:$0xff]  }
  0x96   : > { %6176 = vmatprep.subr.bf16.mxu0 %v7450_v10  ;;  %7353 = vmatprep.subr.bf16.mxu1 %v7450_v10  ;;  %v7503_v54 = vld [vmem:[%s9932_s2] sm:$0xff]   ;;  %v7516_v58 = vld [vmem:[%s9932_s2 + $0x48] sm:$0xff]   ;;  %v7540_v60 = vld [vmem:[%s9933_s3 + $0x110] sm:$0xff]  }
  0x97   : > { %v7504_v55 = vld [vmem:[%s8438_s6 + $0xcc] ss:$20 sps:$4 sm:$0xff]   ;;  %v7508_v61 = vld [vmem:[%s8438_s6 + $0xc8] ss:$20 sps:$4 sm:$0xff]   ;;  %v7531_v62 = vld [vmem:[%s9932_s2 + $0x50] sm:$0xff]  }
  0x98   : > { %v7517_v59 = vld [vmem:[%s9932_s2 + $0x8] sm:$0xff]   ;;  %v7509_v63 = vld [vmem:[%s8438_s6 + $0x30] ss:$20 sps:$4 sm:$0xff]   ;;  %v7541_v3 = vld [vmem:[%s9933_s3 + $0x118] sm:$0xff]  }
  0x99   : > { %6177 = vmatpush3.bf16.msra.mxu0 %v7451_v13  ;;  %7361 = vmatpush3.bf16.msra.mxu1 %v7451_v13  ;;  %v7510_v0 = vld [vmem:[%s8438_s6 + $0xf4] ss:$20 sps:$4 sm:$0xff]   ;;  %v7512_v1 = vld [vmem:[%s8438_s6 + $0x5c] ss:$20 sps:$4 sm:$0xff]   ;;  %v7548_v5 = vld [vmem:[%s9933_s3 + $0x120] sm:$0xff]  }
  0x9a   : > { %6178 = vmatprep.subr.bf16.mxu0 %v7452_v14  ;;  %7354 = vmatprep.subr.bf16.mxu1 %v7452_v14  ;;  %v7532_v2 = vld [vmem:[%s9932_s2 + $0x10] sm:$0xff]   ;;  %v7549_v4 = vld [vmem:[%s9932_s2 + $0x58] sm:$0xff]   ;;  %v7551_v11 = vld [vmem:[%s9933_s3 + $0x128] sm:$0xff]  }
  0x9b   : > { %v7550_v6 = vld [vmem:[%s9932_s2 + $0x18] sm:$0xff]   ;;  %v7514_v7 = vld [vmem:[%s8438_s6 + $0xf0] ss:$20 sps:$4 sm:$0xff]  }
  0x9c   : > { %v7515_v8 = vld [vmem:[%s8438_s6 + $0x58] ss:$20 sps:$4 sm:$0xff]   ;;  %v7518_v9 = vld [vmem:[%s8438_s6 + $0x11c] ss:$20 sps:$4 sm:$0xff]   ;;  %v7565_v14 = vld [vmem:[%s9932_s2 + $0x60] sm:$0xff]  }
  0x9d   : > { %6179 = vmatpush3.bf16.msra.mxu0 %v7453_v15  ;;  %7362 = vmatpush3.bf16.msra.mxu1 %v7453_v15  ;;  %v7520_v10 = vld [vmem:[%s8438_s6 + $0x84] ss:$20 sps:$4 sm:$0xff]   ;;  %v7558_v12 = vld [vmem:[%s9933_s3 + $0x130] sm:$0xff]  }
  0x9e   : > { %6180 = vmatprep.subr.bf16.mxu0 %v7454_v16  ;;  %7355 = vmatprep.subr.bf16.mxu1 %v7454_v16  ;;  %v7522_v13 = vld [vmem:[%s8438_s6 + $0x118] ss:$20 sps:$4 sm:$0xff]   ;;  %v7566_v15 = vld [vmem:[%s9932_s2 + $0x20] sm:$0xff]  }
  0x9f   : > { %v7523_v16 = vld [vmem:[%s8438_s6 + $0x80] ss:$20 sps:$4 sm:$0xff]  }
  0xa1   : > { %6181 = vmatpush3.bf16.msra.mxu0 %v7455_v17  ;;  %7363 = vmatpush3.bf16.msra.mxu1 %v7455_v17  ;;  %v7524_v17 = vld [vmem:[%s8438_s6 + $0x144] ss:$20 sps:$4 sm:$0xff]  }
  0xa2   : > { %6278 = vmatprep.subr.bf16.mxu1 %v7462_v18  ;;  %7232 = vmatprep.subr.bf16.mxu0 %v7530_v53  ;;  %v7526_v18 = vld [vmem:[%s8438_s6 + $0xac] ss:$20 sps:$4 sm:$0xff]  }
  0xa4   : > { %1611 = vmatmul.mubr.bf16.vlgmr.msra.gmra.mrb[0].mxu0 %v7456_v19  ;;  %1707 = vmatmul.mubr.bf16.vlgmr.msra.gmra.mrb[0].mxu1 %v7459_v20  ;;  %v7559_v19 = vld [vmem:[%s9933_s3 + $0x138] sm:$0xff]   ;;  %v7528_v20 = vld [vmem:[%s8438_s6 + $0x140] ss:$20 sps:$4 sm:$0xff]  }
  0xa5   : > { %6279 = vmatpush3.bf16.msra.mxu1 %v7463_v21  ;;  %1618 = vmatprep.mubr.bf16.mxu0 %v7466_v23  ;;  %v7529_v21 = vld [vmem:[%s8438_s6 + $0xa8] ss:$20 sps:$4 sm:$0xff]  }
  0xa6   : > { %6280 = vmatprep.subr.bf16.mxu1 %v7464_v22  ;;  %1714 = vmatprep.mubr.bf16.mxu1 %v7468_v24  ;;  %v7577_v22 = vld [vmem:[%s9932_s2 + $0x68] sm:$0xff]  }
  0xa7   : > { %7233 = vmatpush3.bf16.msra.mxu0 %v7530_v53  ;;  %v7578_v23 = vld [vmem:[%s9932_s2 + $0x28] sm:$0xff]   ;;  %v7600_v53 = vld [vmem:[%s9932_s2 + $0xd0] sm:$0xff]  }
  0xa8   : > { %7234 = vmatprep.subr.bf16.mxu0 %v7533_v57  ;;  %v7534_v24 = vld [vmem:[%s8438_s6 + $0x16c] ss:$20 sps:$4 sm:$0xff]  }
  0xa9   : > { %6281 = vmatpush3.bf16.msra.mxu1 %v7465_v25  ;;  %v7536_v25 = vld [vmem:[%s8438_s6 + $0xd4] ss:$20 sps:$4 sm:$0xff]  }
  0xaa   : > { %6282 = vmatprep.subr.bf16.mxu1 %v7472_v27  ;;  %v7539_v27 = vld [vmem:[%s8438_s6 + $0xd0] ss:$20 sps:$4 sm:$0xff]  }
  0xab   : > { %7235 = vmatpush3.bf16.msra.mxu0 %v7533_v57  ;;  %v7602_v57 = vld [vmem:[%s9932_s2 + $0xd8] sm:$0xff]  }
  0xac   : > { %1619 = vmatmul.mubr.bf16.gmra.mrb[4].mxu0 %v7470_v26  ;;  %1715 = vmatmul.mubr.bf16.gmra.mrb[4].mxu1 %v7471_v28  ;;  %v7538_v26 = vld [vmem:[%s8438_s6 + $0x168] ss:$20 sps:$4 sm:$0xff]  }
  0xad   : > { %6283 = vmatpush3.bf16.msra.mxu1 %v7473_v29  ;;  %1626 = vmatprep.mubr.bf16.mxu0 %v7476_v31  ;;  %v7542_v28 = vld [vmem:[%s8438_s6 + $0x194] ss:$20 sps:$4 sm:$0xff]   ;;  %v7544_v29 = vld [vmem:[%s8438_s6 + $0xfc] ss:$20 sps:$4 sm:$0xff]  }
  0xae   : > { %6284 = vmatprep.subr.bf16.mxu1 %v7474_v30  ;;  %1722 = vmatprep.mubr.bf16.mxu1 %v7478_v32  ;;  %v7589_v30 = vld [vmem:[%s9932_s2 + $0x70] sm:$0xff]   ;;  %v7591_v32 = vld [vmem:[%s9932_s2 + $0xc0] sm:$0xff]  }
  0xaf   : > { %7236 = vmatprep.subr.bf16.mxu0 %v7540_v60  ;;  %v7590_v31 = vld [vmem:[%s9932_s2 + $0x30] sm:$0xff]  }
  0xb0   : > { %7237 = vmatpush3.bf16.msra.mxu0 %v7540_v60  ;;  %v7575_v60 = vld [vmem:[%s8438_s6 + $0x198] ss:$20 sps:$4 sm:$0xff]  }
  0xb1   : > { %6285 = vmatpush3.bf16.msra.mxu1 %v7475_v33  ;;  %7238 = vmatprep.subr.bf16.mxu0 %v7541_v3  ;;  %v7546_v33 = vld [vmem:[%s8438_s6 + $0x190] ss:$20 sps:$4 sm:$0xff]  }
  0xb2   : > { %6286 = vmatprep.subr.bf16.mxu1 %v7482_v36  ;;  %v7554_v36 = vld [vmem:[%s8438_s6 + $0x124] ss:$20 sps:$4 sm:$0xff]  }
  0xb4   : > { %1627 = vmatmul.mubr.bf16.gmra.mrb[8].mxu0 %v7480_v34  ;;  %1723 = vmatmul.mubr.bf16.gmra.mrb[8].mxu1 %v7481_v35  ;;  %v7547_v34 = vld [vmem:[%s8438_s6 + $0xf8] ss:$20 sps:$4 sm:$0xff]   ;;  %v7552_v35 = vld [vmem:[%s8438_s6 + $0x1bc] ss:$20 sps:$4 sm:$0xff]  }
  0xb5   : > { %6287 = vmatpush3.bf16.msra.mxu1 %v7483_v37  ;;  %1634 = vmatprep.mubr.bf16.mxu0 %v7486_v39  ;;  %v7556_v37 = vld [vmem:[%s8438_s6 + $0x1b8] ss:$20 sps:$4 sm:$0xff]  }
  0xb6   : > { %6288 = vmatprep.subr.bf16.mxu1 %v7484_v38  ;;  %1730 = vmatprep.mubr.bf16.mxu1 %v7488_v40  ;;  %v7557_v38 = vld [vmem:[%s8438_s6 + $0x120] ss:$20 sps:$4 sm:$0xff]   ;;  %v7562_v40 = vld [vmem:[%s8438_s6 + $0x10] ss:$20 sps:$4 sm:$0xff]  }
  0xb7   : > { %7239 = vmatpush3.bf16.msra.mxu0 %v7541_v3  ;;  %v7560_v39 = vld [vmem:[%s8438_s6 + $0x14c] ss:$20 sps:$4 sm:$0xff]  }
  0xb8   : > { %7240 = vmatprep.subr.bf16.mxu0 %v7548_v5  ;;  %v7617_v3 = vld [vmem:[%s9932_s2 + $0xa8] sm:$0xff]  }
  0xb9   : > { %6289 = vmatpush3.bf16.msra.mxu1 %v7485_v41  ;;  %v7609_v41 = vld [vmem:[%s9932_s2 + $0x78] sm:$0xff]  }
  0xba   : > { %6290 = vmatprep.subr.bf16.mxu1 %v7492_v43  ;;  %v7563_v43 = vld [vmem:[%s8438_s6 + $0x148] ss:$20 sps:$4 sm:$0xff]  }
  0xbb   : > { %7241 = vmatpush3.bf16.msra.mxu0 %v7548_v5  ;;  %v7620_v5 = vld [vmem:[%s9932_s2 + $0xf0] sm:$0xff]  }
  0xbc   : > { %1635 = vmatmul.mubr.bf16.gmra.mrb[12].mxu0 %v7490_v42  ;;  %1731 = vmatmul.mubr.bf16.gmra.mrb[12].mxu1 %v7491_v44  ;;  %v7610_v42 = vld [vmem:[%s9932_s2 + $0x38] sm:$0xff]  }
  0xbd   : > { %6291 = vmatpush3.bf16.msra.mxu1 %v7493_v45  ;;  %1642 = vmatprep.mubr.bf16.mxu0 %v7496_v46  ;;  %v7564_v44 = vld [vmem:[%s8438_s6 + $0x38] ss:$20 sps:$4 sm:$0xff]   ;;  %v7567_v45 = vld [vmem:[%s8438_s6 + $0x174] ss:$20 sps:$4 sm:$0xff]  }
  0xbe   : > { %6292 = vmatprep.subr.bf16.mxu1 %v7494_v47  ;;  %1771 = vmatprep.mubr.bf16.mxu1 %v7500_v48  ;;  %v7569_v46 = vld [vmem:[%s8438_s6 + $0x60] ss:$20 sps:$4 sm:$0xff]   ;;  %v7593_v48 = vld [vmem:[%s9932_s2 + $0xc8] sm:$0xff]  }
  0xbf   : > { %7242 = vmatprep.subr.bf16.mxu0 %v7551_v11  ;;  %v7592_v47 = vld [vmem:[%s9932_s2 + $0x80] sm:$0xff]  }
  0xc0   : > { %7243 = vmatpush3.bf16.msra.mxu0 %v7551_v11  ;;  %v7587_v11 = vld [vmem:[%s8438_s6 + $0x1e8] ss:$20 sps:$4 sm:$0xff]  }
  0xc1   : > { %6293 = vmatpush3.bf16.msra.mxu1 %v7495_v49  ;;  %7244 = vmatprep.subr.bf16.mxu0 %v7558_v12  ;;  %v7597_v49 = vld [vmem:[%s9932_s2 + $0x88] sm:$0xff]  }
  0xc2   : > { %6414 = vmatprep.subr.bf16.mxu1 %v7502_v50  ;;  %v7570_v50 = vld [vmem:[%s8438_s6 + $0x170] ss:$20 sps:$4 sm:$0xff]  }
  0xc4   : > { %1643 = vmatmul.mubr.bf16.gmra.mrb[16].mxu0 %v7501_v52  ;;  %1772 = vmatmul.mubr.bf16.vlgmr.msra.gmra.mrb[16].mxu1 %v7498_v51  ;;  %v7571_v51 = vld [vmem:[%s8438_s6 + $0x88] ss:$20 sps:$4 sm:$0xff]   ;;  %v7627_v52 = vld [vmem:[%s9932_s2 + $0x140] sm:$0xff]  }
  0xc5   : > { %6415 = vmatpush3.bf16.msra.mxu1 %v7503_v54  ;;  %1650 = vmatprep.mubr.bf16.mxu0 %v7504_v55  ;;  %v7572_v54 = vld [vmem:[%s8438_s6 + $0x19c] ss:$20 sps:$4 sm:$0xff]  }
  0xc6   : > { %1779 = vmatprep.mubr.bf16.mxu1 %v7506_v56  ;;  %6416 = vmatprep.subr.bf16.mxu1 %v7516_v58  ;;  %v7574_v55 = vld [vmem:[%s8438_s6 + $0xb0] ss:$20 sps:$4 sm:$0xff]   ;;  %v7606_v58 = vld [vmem:[%s9932_s2 + $0x98] sm:$0xff]  }
  0xc7   : > { %7245 = vmatpush3.bf16.msra.mxu0 %v7558_v12  ;;  %v7601_v56 = vld [vmem:[%s9932_s2 + $0x90] sm:$0xff]   ;;  %v7588_v12 = vld [vmem:[%s8438_s6 + $0x178] ss:$20 sps:$4 sm:$0xff]  }
  0xc8   : > { %7246 = vmatprep.subr.bf16.mxu0 %v7559_v19 }
  0xc9   : > { %6417 = vmatpush3.bf16.msra.mxu1 %v7517_v59  ;;  %v7611_v59 = vld [vmem:[%s9932_s2 + $0xe0] sm:$0xff]  }
  0xca   : > { %6418 = vmatprep.subr.bf16.mxu1 %v7531_v62  ;;  %v7579_v62 = vld [vmem:[%s8438_s6 + $0x1c4] ss:$20 sps:$4 sm:$0xff]  }
  0xcb   : > { %7247 = vmatpush3.bf16.msra.mxu0 %v7559_v19  ;;  %v7607_v19 = vld [vmem:[%s8438_s6 + $0x238] ss:$20 sps:$4 sm:$0xff]  }
  0xcc   : > { %1651 = vmatmul.mubr.bf16.gmra.mrb[20].mxu0 %v7508_v61  ;;  %1780 = vmatmul.mubr.bf16.gmra.mrb[20].mxu1 %v7509_v63  ;;  %v7576_v61 = vld [vmem:[%s8438_s6 + $0xd8] ss:$20 sps:$4 sm:$0xff]   ;;  %v7581_v63 = vld [vmem:[%s8438_s6 + $0x100] ss:$20 sps:$4 sm:$0xff]  }
  0xcd   : > { %1658 = vmatprep.mubr.bf16.mxu0 %v7510_v0  ;;  %1787 = vmatprep.mubr.bf16.mxu1 %v7512_v1  ;;  %v7612_v0 = vld [vmem:[%s9932_s2 + $0xa0] sm:$0xff]   ;;  %v7613_v1 = vld [vmem:[%s9932_s2 + $0xe8] sm:$0xff]  }
  0xce   : > { %6419 = vmatpush3.bf16.msra.mxu1 %v7532_v2  ;;  %6526 = vmatprep.subr.bf16.mxu0 %v7591_v32  ;;  %v7582_v2 = vld [vmem:[%s8438_s6 + $0x1c0] ss:$20 sps:$4 sm:$0xff]  }
  0xcf   : > { %6420 = vmatprep.subr.bf16.mxu1 %v7549_v4  ;;  %v7583_v4 = vld [vmem:[%s8438_s6 + $0x128] ss:$20 sps:$4 sm:$0xff]  }
  0xd0   : > { %v7635_v32 = vld [vmem:[%s8430_s7 + $0x7c] ss:$56 sps:$4 sm:$0xff]  }
  0xd2   : > { %6421 = vmatpush3.bf16.msra.mxu1 %v7550_v6  ;;  %v7584_v6 = vld [vmem:[%s8438_s6 + $0x1ec] ss:$20 sps:$4 sm:$0xff]  }
  0xd3   : > { %6422 = vmatprep.subr.bf16.mxu1 %v7565_v14  ;;  %v7596_v14 = vld [vmem:[%s8438_s6 + $0x1a0] ss:$20 sps:$4 sm:$0xff]  }
  0xd4   : > { %1659 = vmatmul.mubr.bf16.gmra.mrb[24].mxu0 %v7514_v7  ;;  %1788 = vmatmul.mubr.bf16.gmra.mrb[24].mxu1 %v7515_v8  ;;  %v7586_v7 = vld [vmem:[%s8438_s6 + $0x150] ss:$20 sps:$4 sm:$0xff]  }
  0xd5   : > { %1666 = vmatprep.mubr.bf16.mxu0 %v7518_v9  ;;  %1795 = vmatprep.mubr.bf16.mxu1 %v7520_v10  ;;  %v7621_v8 = vld [vmem:[%s9932_s2 + $0xb0] sm:$0xff]   ;;  %v7622_v9 = vld [vmem:[%s9932_s2 + $0xf8] sm:$0xff]  }
  0xd6   : > { %6423 = vmatpush3.bf16.msra.mxu1 %v7566_v15  ;;  %v7626_v10 = vld [vmem:[%s9932_s2 + $0xb8] sm:$0xff]   ;;  %v7598_v15 = vld [vmem:[%s8438_s6 + $0x210] ss:$20 sps:$4 sm:$0xff]  }
  0xd7   : > { %6424 = vmatprep.subr.bf16.mxu1 %v7577_v22  ;;  %v7616_v22 = vld [vmem:[%s8438_s6 + $0x240] ss:$20 sps:$4 sm:$0xff]  }
  0xda   : > { %6425 = vmatpush3.bf16.msra.mxu1 %v7578_v23  ;;  %v7618_v23 = vld [vmem:[%s8438_s6 + $0x260] ss:$20 sps:$4 sm:$0xff]  }
  0xdb   : > { %6426 = vmatprep.subr.bf16.mxu1 %v7589_v30  ;;  %v7631_v30 = vld [vmem:[%s9932_s2 + $0x100] sm:$0xff]  }
  0xdc   : > { %1667 = vmatmul.mubr.bf16.gmra.mrb[28].mxu0 %v7522_v13  ;;  %1796 = vmatmul.mubr.bf16.gmra.mrb[28].mxu1 %v7523_v16  ;;  %v7594_v13 = vld [vmem:[%s8438_s6 + $0x214] ss:$20 sps:$4 sm:$0xff]  }
  0xdd   : > { %1674 = vmatprep.mubr.bf16.mxu0 %v7524_v17  ;;  %1803 = vmatprep.mubr.bf16.mxu1 %v7526_v18  ;;  %v7599_v16 = vld [vmem:[%s8438_s6 + $0x1c8] ss:$20 sps:$4 sm:$0xff]   ;;  %v7605_v18 = vld [vmem:[%s8438_s6 + $0x1f0] ss:$20 sps:$4 sm:$0xff]  }
  0xde   : > { %6427 = vmatpush3.bf16.msra.mxu1 %v7590_v31  ;;  %v7603_v17 = vld [vmem:[%s8438_s6 + $0x23c] ss:$20 sps:$4 sm:$0xff]   ;;  %v7632_v31 = vld [vmem:[%s8430_s7 + $0x74] ss:$56 sps:$4 sm:$0xff]  }
  0xdf   : > { %6428 = vmatprep.subr.bf16.mxu1 %v7609_v41  ;;  %v7721_v41 = vld [vmem:[%s9932_s2 + $0x188] sm:$0xff]  }
  0xe2   : > { %6429 = vmatpush3.bf16.msra.mxu1 %v7610_v42  ;;  %v7642_v42 = vld [vmem:[%s8430_s7 + $0xec] ss:$56 sps:$4 sm:$0xff]  }
  0xe3   : > { %6638 = vmatprep.subr.bf16.mxu1 %v7627_v52  ;;  %v7683_v52 = vld [vmem:[%s9932_s2 + $0x160] sm:$0xff]  }
  0xe4   : > { %1675 = vmatmul.mubr.bf16.gmra.mrb[32].mxu0 %v7528_v20  ;;  %1804 = vmatmul.mubr.bf16.gmra.mrb[32].mxu1 %v7529_v21  ;;  %v7608_v20 = vld [vmem:[%s8438_s6 + $0x218] ss:$20 sps:$4 sm:$0xff]  }
  0xe5   : > { %1682 = vmatprep.mubr.bf16.mxu0 %v7534_v24  ;;  %1811 = vmatprep.mubr.bf16.mxu1 %v7536_v25  ;;  %v7614_v21 = vld [vmem:[%s8438_s6 + $0x264] ss:$20 sps:$4 sm:$0xff]   ;;  %v7619_v25 = vld [vmem:[%s8438_s6 + $0x268] ss:$20 sps:$4 sm:$0xff]  }
  0xe6   : > { %v7716_v24 = vld [vmem:[%s9932_s2 + $0x1c0] sm:$0xff]  }
  0xec   : > { %1683 = vmatmul.mubr.bf16.gmra.mrb[36].mxu0 %v7538_v26  ;;  %1812 = vmatmul.mubr.bf16.gmra.mrb[36].mxu1 %v7539_v27  ;;  %v7625_v26 = vld [vmem:[%s8430_s7 + $0x4] ss:$56 sps:$4 sm:$0xff]  }
  0xed   : > { %1690 = vmatprep.mubr.bf16.mxu0 %v7542_v28  ;;  %1819 = vmatprep.mubr.bf16.mxu1 %v7544_v29  ;;  %v7630_v27 = vld [vmem:[%s8430_s7 + $0xc] ss:$56 sps:$4 sm:$0xff]   ;;  %v7623_v28 = vld [vmem:[%s8430_s7] ss:$56 sps:$4 sm:$0xff]  }
  0xee   : > { %v7628_v29 = vld [vmem:[%s8430_s7 + $0x8] ss:$56 sps:$4 sm:$0xff]  }
  0xf4   : > { %1691 = vmatmul.mubr.bf16.gmra.mrb[40].mxu0 %v7546_v33  ;;  %1820 = vmatmul.mubr.bf16.gmra.mrb[40].mxu1 %v7547_v34  ;;  %v7641_v33 = vld [vmem:[%s9932_s2 + $0x148] sm:$0xff]   ;;  %v7717_v34 = vld [vmem:[%s9932_s2 + $0x180] sm:$0xff]  }
  0xf5   : > { %1698 = vmatprep.mubr.bf16.mxu0 %v7552_v35  ;;  %1827 = vmatprep.mubr.bf16.mxu1 %v7554_v36  ;;  %v7718_v35 = vld [vmem:[%s9932_s2 + $0x1c8] sm:$0xff]  }
  0xf6   : > { %v7644_v36 = vld [vmem:[%s9932_s2 + $0x108] sm:$0xff]  }
  0xfc   : > { %1699 = vmatmul.mubr.bf16.gmra.mrb[44].mxu0 %v7556_v37  ;;  %1828 = vmatmul.mubr.bf16.gmra.mrb[44].mxu1 %v7557_v38  ;;  %v7634_v37 = vld [vmem:[%s8430_s7 + $0x70] ss:$56 sps:$4 sm:$0xff]  }
  0xfd   : > { %1835 = vmatprep.mubr.bf16.mxu1 %v7560_v39  ;;  %7248 = vmatprep.mubr.bf16.mxu0 %v7562_v40  ;;  %v7637_v38 = vld [vmem:[%s8430_s7 + $0x78] ss:$56 sps:$4 sm:$0xff]   ;;  %v7638_v40 = vld [vmem:[%s8430_s7 + $0xe4] ss:$56 sps:$4 sm:$0xff]  }
  0xfe   : > { %v7655_v39 = vld [vmem:[%s9932_s2 + $0x150] sm:$0xff]  }
 0x104   : > { %1836 = vmatmul.mubr.bf16.gmra.mrb[48].mxu1 %v7563_v43  ;;  %7249 = vmatmul.mubr.bf16.vlgmr.msra.gmra.mrb[48].mxu0 %v7564_v44  ;;  %v7658_v43 = vld [vmem:[%s9932_s2 + $0x110] sm:$0xff]   ;;  %v7669_v44 = vld [vmem:[%s9932_s2 + $0x158] sm:$0xff]  }
 0x105   : > { %1843 = vmatprep.mubr.bf16.mxu1 %v7567_v45  ;;  %7252 = vmatprep.mubr.bf16.mxu0 %v7569_v46  ;;  %v7726_v45 = vld [vmem:[%s9932_s2 + $0x1d0] sm:$0xff]  }
 0x106   : > { %6527 = vmatpush3.bf16.msra.mxu0 %v7592_v47  ;;  %v7727_v46 = vld [vmem:[%s9932_s2 + $0x190] sm:$0xff]   ;;  %v7728_v47 = vld [vmem:[%s9932_s2 + $0x1d8] sm:$0xff]  }
 0x107   : > { %6528 = vmatprep.subr.bf16.mxu0 %v7593_v48  ;;  %v7640_v48 = vld [vmem:[%s8430_s7 + $0xe0] ss:$56 sps:$4 sm:$0xff]  }
 0x10a   : > { %6529 = vmatpush3.bf16.msra.mxu0 %v7597_v49  ;;  %v7645_v49 = vld [vmem:[%s8430_s7 + $0xe8] ss:$56 sps:$4 sm:$0xff]  }
 0x10b   : > { %6530 = vmatprep.subr.bf16.mxu0 %v7600_v53  ;;  %v7731_v53 = vld [vmem:[%s9932_s2 + $0x198] sm:$0xff]  }
 0x10c   : > { %1844 = vmatmul.mubr.bf16.gmra.mrb[52].mxu1 %v7570_v50  ;;  %7253 = vmatmul.mubr.bf16.gmra.mrb[52].mxu0 %v7571_v51  ;;  %v7672_v50 = vld [vmem:[%s9932_s2 + $0x118] sm:$0xff]   ;;  %v7646_v51 = vld [vmem:[%s8430_s7 + $0x154] ss:$56 sps:$4 sm:$0xff]  }
 0x10d   : > { %1851 = vmatprep.mubr.bf16.mxu1 %v7572_v54  ;;  %7256 = vmatprep.mubr.bf16.mxu0 %v7574_v55  ;;  %v7649_v54 = vld [vmem:[%s8430_s7 + $0x15c] ss:$56 sps:$4 sm:$0xff]   ;;  %v7686_v55 = vld [vmem:[%s9932_s2 + $0x120] sm:$0xff]  }
 0x10e   : > { %6531 = vmatpush3.bf16.msra.mxu0 %v7601_v56  ;;  %v7697_v56 = vld [vmem:[%s9932_s2 + $0x168] sm:$0xff]  }
 0x10f   : > { %6532 = vmatprep.subr.bf16.mxu0 %v7602_v57  ;;  %v7738_v57 = vld [vmem:[%s9932_s2 + $0x1e0] sm:$0xff]  }
 0x112   : > { %6533 = vmatpush3.bf16.msra.mxu0 %v7606_v58  ;;  %v7739_v58 = vld [vmem:[%s9932_s2 + $0x1a0] sm:$0xff]  }
 0x113   : > { %6534 = vmatprep.subr.bf16.mxu0 %v7611_v59  ;;  %v7740_v59 = vld [vmem:[%s9932_s2 + $0x1e8] sm:$0xff]  }
 0x114   : > { %1852 = vmatmul.mubr.bf16.gmra.mrb[56].mxu1 %v7575_v60  ;;  %7257 = vmatmul.mubr.bf16.gmra.mrb[56].mxu0 %v7576_v61  ;;  %v7648_v60 = vld [vmem:[%s8430_s7 + $0x150] ss:$56 sps:$4 sm:$0xff]  }
 0x115   : > { %1859 = vmatprep.mubr.bf16.mxu1 %v7579_v62  ;;  %7260 = vmatprep.mubr.bf16.mxu0 %v7581_v63  ;;  %v7651_v61 = vld [vmem:[%s8430_s7 + $0x158] ss:$56 sps:$4 sm:$0xff]   ;;  %v7700_v62 = vld [vmem:[%s9932_s2 + $0x128] sm:$0xff]   ;;  %v7652_v63 = vld [vmem:[%s8430_s7 + $0x1c4] ss:$56 sps:$4 sm:$0xff]  }
 0x116   : > { %6535 = vmatpush3.bf16.msra.mxu0 %v7612_v0  ;;  %v7656_v0 = vld [vmem:[%s8430_s7 + $0x1cc] ss:$56 sps:$4 sm:$0xff]  }
 0x117   : > { %6536 = vmatprep.subr.bf16.mxu0 %v7613_v1  ;;  %v7711_v1 = vld [vmem:[%s9932_s2 + $0x170] sm:$0xff]  }
 0x11a   : > { %6537 = vmatpush3.bf16.msra.mxu0 %v7617_v3  ;;  %v7714_v3 = vld [vmem:[%s9932_s2 + $0x130] sm:$0xff]  }
 0x11b   : > { %6538 = vmatprep.subr.bf16.mxu0 %v7620_v5  ;;  %v7748_v5 = vld [vmem:[%s9932_s2 + $0x1f0] sm:$0xff]  }
 0x11c   : > { %1860 = vmatmul.mubr.bf16.gmra.mrb[60].mxu1 %v7582_v2  ;;  %7261 = vmatmul.mubr.bf16.gmra.mrb[60].mxu0 %v7583_v4  ;;  %v7743_v2 = vld [vmem:[%s9932_s2 + $0x1a8] sm:$0xff]   ;;  %v7733_v4 = vld [vmem:[%s9932_s2 + $0x178] sm:$0xff]  }
 0x11d   : > { %1867 = vmatprep.mubr.bf16.mxu1 %v7584_v6  ;;  %7264 = vmatprep.mubr.bf16.mxu0 %v7586_v7  ;;  %v7749_v6 = vld [vmem:[%s9932_s2 + $0x1b0] sm:$0xff]   ;;  %v7736_v7 = vld [vmem:[%s9932_s2 + $0x138] sm:$0xff]  }
 0x11e   : > { %6539 = vmatpush3.bf16.msra.mxu0 %v7621_v8  ;;  %v7750_v8 = vld [vmem:[%s9932_s2 + $0x1f8] sm:$0xff]  }
 0x11f   : > { %6540 = vmatprep.subr.bf16.mxu0 %v7622_v9  ;;  %v7754_v9 = vld [vmem:[%s9932_s2 + $0x1b8] sm:$0xff]  }
 0x122   : > { %6541 = vmatpush3.bf16.msra.mxu0 %v7626_v10  ;;  %v7755_v10 = vld [vmem:[%s9932_s2 + $0x240] sm:$0xff]  }
 0x123   : > { %6750 = vmatprep.subr.bf16.mxu0 %v7716_v24  ;;  %v7679_v24 = vld [vmem:[%s8430_s7 + $0x318] ss:$56 sps:$4 sm:$0xff]  }
 0x124   : > { %1868 = vmatmul.mubr.bf16.gmra.mrb[64].mxu1 %v7587_v11  ;;  %7265 = vmatmul.mubr.bf16.gmra.mrb[64].mxu0 %v7588_v12  ;;  %v7654_v11 = vld [vmem:[%s8430_s7 + $0x1c0] ss:$56 sps:$4 sm:$0xff]  }
 0x125   : > { %1875 = vmatprep.mubr.bf16.mxu1 %v7594_v13  ;;  %7268 = vmatprep.mubr.bf16.mxu0 %v7596_v14  ;;  %v7659_v12 = vld [vmem:[%s8430_s7 + $0x1c8] ss:$56 sps:$4 sm:$0xff]   ;;  %v7660_v13 = vld [vmem:[%s8430_s7 + $0x234] ss:$56 sps:$4 sm:$0xff]  }
 0x126   : > { %v7663_v14 = vld [vmem:[%s8430_s7 + $0x23c] ss:$56 sps:$4 sm:$0xff]  }
 0x12c   : > { %1876 = vmatmul.mubr.bf16.gmra.mrb[68].mxu1 %v7598_v15  ;;  %7269 = vmatmul.mubr.bf16.gmra.mrb[68].mxu0 %v7599_v16  ;;  %v7662_v15 = vld [vmem:[%s8430_s7 + $0x230] ss:$56 sps:$4 sm:$0xff]  }
 0x12d   : > { %1883 = vmatprep.mubr.bf16.mxu1 %v7603_v17  ;;  %7272 = vmatprep.mubr.bf16.mxu0 %v7605_v18  ;;  %v7665_v16 = vld [vmem:[%s8430_s7 + $0x238] ss:$56 sps:$4 sm:$0xff]   ;;  %v7666_v17 = vld [vmem:[%s8430_s7 + $0x2a4] ss:$56 sps:$4 sm:$0xff]  }
 0x12e   : > { %v7670_v18 = vld [vmem:[%s8430_s7 + $0x2ac] ss:$56 sps:$4 sm:$0xff]  }
 0x134   : > { %1884 = vmatmul.mubr.bf16.gmra.mrb[72].mxu1 %v7607_v19  ;;  %7273 = vmatmul.mubr.bf16.gmra.mrb[72].mxu0 %v7608_v20  ;;  %v7668_v19 = vld [vmem:[%s8430_s7 + $0x2a0] ss:$56 sps:$4 sm:$0xff]  }
 0x135   : > { %1891 = vmatprep.mubr.bf16.mxu1 %v7614_v21  ;;  %7276 = vmatprep.mubr.bf16.mxu0 %v7616_v22  ;;  %v7673_v20 = vld [vmem:[%s8430_s7 + $0x2a8] ss:$56 sps:$4 sm:$0xff]   ;;  %v7674_v21 = vld [vmem:[%s8430_s7 + $0x314] ss:$56 sps:$4 sm:$0xff]  }
 0x136   : > { %v7677_v22 = vld [vmem:[%s8430_s7 + $0x31c] ss:$56 sps:$4 sm:$0xff]  }
 0x13c   : > { %1892 = vmatmul.mubr.bf16.gmra.mrb[76].mxu1 %v7618_v23  ;;  %7277 = vmatmul.mubr.bf16.gmra.mrb[76].mxu0 %v7619_v25  ;;  %v7676_v23 = vld [vmem:[%s8430_s7 + $0x310] ss:$56 sps:$4 sm:$0xff]  }
 0x13d   : > { %3885 = vmatprep.mubr.bf16.mxu1 %v7625_v26  ;;  %4046 = vmatprep.mubr.bf16.mxu0 %v7630_v27  ;;  %v7680_v26 = vld [vmem:[%s8430_s7 + $0x384] ss:$56 sps:$4 sm:$0xff]  }
 0x144   : > { %3886 = vmatmul.mubr.bf16.vlgmr.msra.gmra.mrb[80].mxu1 %v7623_v28  ;;  %4047 = vmatmul.mubr.bf16.vlgmr.msra.gmra.mrb[80].mxu0 %v7628_v29 }
 0x145   : > { %6639 = vmatpush3.bf16.msra.mxu1 %v7631_v30  ;;  %3893 = vmatprep.mubr.bf16.mxu1 %v7632_v31 }
 0x146   : > { %4054 = vmatprep.mubr.bf16.mxu0 %v7635_v32  ;;  %6640 = vmatprep.subr.bf16.mxu1 %v7641_v33  ;;  %v7684_v32 = vld [vmem:[%s8430_s7 + $0x38c] ss:$56 sps:$4 sm:$0xff]  }
 0x147   : > { %6751 = vmatpush3.bf16.msra.mxu0 %v7717_v34 }
 0x148   : > { %6752 = vmatprep.subr.bf16.mxu0 %v7718_v35 }
 0x149   : > { %6641 = vmatpush3.bf16.msra.mxu1 %v7644_v36 }
 0x14a   : > { %6642 = vmatprep.subr.bf16.mxu1 %v7655_v39  ;;  %v7682_v39 = vld [vmem:[%s8430_s7 + $0x380] ss:$56 sps:$4 sm:$0xff]  }
 0x14b   : > { %6753 = vmatpush3.bf16.msra.mxu0 %v7721_v41 }
 0x14c   : > { %3894 = vmatmul.mubr.bf16.gmra.mrb[84].mxu1 %v7634_v37  ;;  %4055 = vmatmul.mubr.bf16.gmra.mrb[84].mxu0 %v7637_v38 }
 0x14d   : > { %3901 = vmatprep.mubr.bf16.mxu1 %v7638_v40  ;;  %4062 = vmatprep.mubr.bf16.mxu0 %v7642_v42  ;;  %v7687_v40 = vld [vmem:[%s8430_s7 + $0x388] ss:$56 sps:$4 sm:$0xff]   ;;  %v7688_v42 = vld [vmem:[%s8430_s7 + $0x3f4] ss:$56 sps:$4 sm:$0xff]  }
 0x14e   : > { %6643 = vmatpush3.bf16.msra.mxu1 %v7658_v43  ;;  %6754 = vmatprep.subr.bf16.mxu0 %v7726_v45 }
 0x14f   : > { %6644 = vmatprep.subr.bf16.mxu1 %v7669_v44  ;;  %6755 = vmatpush3.bf16.msra.mxu0 %v7727_v46 }
 0x150   : > { %6756 = vmatprep.subr.bf16.mxu0 %v7728_v47 }
 0x152   : > { %6645 = vmatpush3.bf16.msra.mxu1 %v7672_v50 }
 0x153   : > { %6646 = vmatprep.subr.bf16.mxu1 %v7683_v52  ;;  %6757 = vmatpush3.bf16.msra.mxu0 %v7731_v53 }
 0x154   : > { %3902 = vmatmul.mubr.bf16.gmra.mrb[88].mxu1 %v7640_v48  ;;  %4063 = vmatmul.mubr.bf16.gmra.mrb[88].mxu0 %v7645_v49  ;;  %v7691_v48 = vld [vmem:[%s8430_s7 + $0x3fc] ss:$56 sps:$4 sm:$0xff]  }
 0x155   : > { %3909 = vmatprep.mubr.bf16.mxu1 %v7646_v51  ;;  %4070 = vmatprep.mubr.bf16.mxu0 %v7649_v54 }
 0x156   : > { %6647 = vmatpush3.bf16.msra.mxu1 %v7686_v55  ;;  %6758 = vmatprep.subr.bf16.mxu0 %v7738_v57  ;;  %v7690_v55 = vld [vmem:[%s8430_s7 + $0x3f0] ss:$56 sps:$4 sm:$0xff]  }
 0x157   : > { %6648 = vmatprep.subr.bf16.mxu1 %v7697_v56  ;;  %6759 = vmatpush3.bf16.msra.mxu0 %v7739_v58  ;;  %v7693_v56 = vld [vmem:[%s8430_s7 + $0x3f8] ss:$56 sps:$4 sm:$0xff]   ;;  %v7694_v58 = vld [vmem:[%s8430_s7 + $0x464] ss:$56 sps:$4 sm:$0xff]  }
 0x158   : > { %6760 = vmatprep.subr.bf16.mxu0 %v7740_v59 }
 0x15a   : > { %6649 = vmatpush3.bf16.msra.mxu1 %v7700_v62 }
 0x15b   : > { %6650 = vmatprep.subr.bf16.mxu1 %v7711_v1  ;;  %6761 = vmatpush3.bf16.msra.mxu0 %v7743_v2 }
 0x15c   : > { %3910 = vmatmul.mubr.bf16.gmra.mrb[92].mxu1 %v7648_v60  ;;  %4071 = vmatmul.mubr.bf16.gmra.mrb[92].mxu0 %v7651_v61 }
 0x15d   : > { %3917 = vmatprep.mubr.bf16.mxu1 %v7652_v63  ;;  %4078 = vmatprep.mubr.bf16.mxu0 %v7656_v0  ;;  %v7698_v0 = vld [vmem:[%s8430_s7 + $0x46c] ss:$56 sps:$4 sm:$0xff]  }
 0x15e   : > { %6651 = vmatpush3.bf16.msra.mxu1 %v7714_v3  ;;  %6762 = vmatprep.subr.bf16.mxu0 %v7748_v5 }
 0x15f   : > { %6652 = vmatprep.subr.bf16.mxu1 %v7733_v4  ;;  %6763 = vmatpush3.bf16.msra.mxu0 %v7749_v6 }
 0x160   : > { %6764 = vmatprep.subr.bf16.mxu0 %v7750_v8  ;;  %v7701_v8 = vld [vmem:[%s8430_s7 + $0x468] ss:$56 sps:$4 sm:$0xff]  }
 0x162   : > { %6653 = vmatpush3.bf16.msra.mxu1 %v7736_v7  ;;  %v7696_v7 = vld [vmem:[%s8430_s7 + $0x460] ss:$56 sps:$4 sm:$0xff]  }
 0x163   : > { %6765 = vmatpush3.bf16.msra.mxu0 %v7754_v9  ;;  %6862 = vmatprep.subr.bf16.mxu1 %v7755_v10  ;;  %v7702_v10 = vld [vmem:[%s8430_s7 + $0x4d4] ss:$56 sps:$4 sm:$0xff]  }
 0x164   : > { %3918 = vmatmul.mubr.bf16.gmra.mrb[96].mxu1 %v7654_v11  ;;  %4079 = vmatmul.mubr.bf16.gmra.mrb[96].mxu0 %v7659_v12 }
 0x165   : > { %3925 = vmatprep.mubr.bf16.mxu1 %v7660_v13  ;;  %4086 = vmatprep.mubr.bf16.mxu0 %v7663_v14 }
 0x16c   : > { %3926 = vmatmul.mubr.bf16.gmra.mrb[100].mxu1 %v7662_v15  ;;  %4087 = vmatmul.mubr.bf16.gmra.mrb[100].mxu0 %v7665_v16  ;;  %v7705_v16 = vld [vmem:[%s8430_s7 + $0x4dc] ss:$56 sps:$4 sm:$0xff]  }
 0x16d   : > { %3933 = vmatprep.mubr.bf16.mxu1 %v7666_v17  ;;  %4094 = vmatprep.mubr.bf16.mxu0 %v7670_v18 }
 0x174   : > { %3934 = vmatmul.mubr.bf16.gmra.mrb[104].mxu1 %v7668_v19  ;;  %4095 = vmatmul.mubr.bf16.gmra.mrb[104].mxu0 %v7673_v20 }
 0x175   : > { %3941 = vmatprep.mubr.bf16.mxu1 %v7674_v21  ;;  %4102 = vmatprep.mubr.bf16.mxu0 %v7677_v22 }
 0x177   : > { %v6254_v25 = vpop.f32.mrb[0].mxu1  ;;  %v6182_v27 = vpop.f32.mrb[0].mxu0 }
 0x178   : > { %v6255_v28 = vpop.f32.mrb[1].mxu1  ;;  %v6183_v29 = vpop.f32.mrb[1].mxu0 }
 0x179   : > { %v8876_v30 = vadd.f32 %v6255_v28, %v6254_v25  ;;  %v6257_v31 = vpop.f32.mrb[2].mxu1  ;;  %v8879_v33 = vadd.f32 %v6183_v29, %v6182_v27  ;;  %v6185_v34 = vpop.f32.mrb[2].mxu0 }
 0x17a   : > { %v6258_v35 = vpop.f32.mrb[3].mxu1  ;;  %v6186_v36 = vpop.f32.mrb[3].mxu0 }
 0x17b   : > { %v8881_v37 = vadd.f32 %v6258_v35, %v6257_v31  ;;  %v8883_v38 = vadd.f32 %v6186_v36, %v6185_v34  ;;  %v7712_v34 = vld [vmem:[%s8430_s7 + $0x54c] ss:$56 sps:$4 sm:$0xff]  }
 0x17c   : > { %3942 = vmatmul.mubr.bf16.gmra.mrb[108].mxu1 %v7676_v23  ;;  %4103 = vmatmul.mubr.bf16.gmra.mrb[108].mxu0 %v7679_v24  ;;  %v7704_v23 = vld [vmem:[%s8430_s7 + $0x4d0] ss:$56 sps:$4 sm:$0xff]  }
 0x17d   : > { %3949 = vmatprep.mubr.bf16.mxu1 %v7680_v26  ;;  %4110 = vmatprep.mubr.bf16.mxu0 %v7684_v32  ;;  %v7707_v24 = vld [vmem:[%s8430_s7 + $0x4d8] ss:$56 sps:$4 sm:$0xff]   ;;  %v7708_v26 = vld [vmem:[%s8430_s7 + $0x544] ss:$56 sps:$4 sm:$0xff]  }
 0x17f   : > { %v6260_v41 = vpop.f32.mrb[4].mxu1  ;;  %v6188_v43 = vpop.f32.mrb[4].mxu0 }
 0x180   : > { %v6261_v44 = vpop.f32.mrb[5].mxu1  ;;  %v6189_v45 = vpop.f32.mrb[5].mxu0 }
 0x181   : > { %v8888_v46 = vadd.f32 %v6261_v44, %v6260_v41  ;;  %v6263_v47 = vpop.f32.mrb[6].mxu1  ;;  %v8891_v49 = vadd.f32 %v6189_v45, %v6188_v43  ;;  %v6191_v50 = vpop.f32.mrb[6].mxu0  ;;  %v7710_v45 = vld [vmem:[%s8430_s7 + $0x540] ss:$56 sps:$4 sm:$0xff]  }
 0x182   : > { %v6264_v51 = vpop.f32.mrb[7].mxu1  ;;  %v6192_v52 = vpop.f32.mrb[7].mxu0 }
 0x183   : > { %v8893_v53 = vadd.f32 %v6264_v51, %v6263_v47  ;;  %v8895_v54 = vadd.f32 %v6192_v52, %v6191_v50  ;;  %v7715_v47 = vld [vmem:[%s8430_s7 + $0x548] ss:$56 sps:$4 sm:$0xff]   ;;  %v7719_v50 = vld [vmem:[%s8430_s7 + $0x5b4] ss:$56 sps:$4 sm:$0xff]  }
 0x184   : > { %3950 = vmatmul.mubr.bf16.gmra.mrb[112].mxu1 %v7682_v39  ;;  %4111 = vmatmul.mubr.bf16.gmra.mrb[112].mxu0 %v7687_v40 }
 0x185   : > { %3957 = vmatprep.mubr.bf16.mxu1 %v7688_v42  ;;  %4118 = vmatprep.mubr.bf16.mxu0 %v7691_v48 }
 0x187   : > { %v6266_v57 = vpop.f32.mrb[8].mxu1  ;;  %v6194_v59 = vpop.f32.mrb[8].mxu0 }
 0x188   : > { %v6267_v60 = vpop.f32.mrb[9].mxu1  ;;  %v6195_v61 = vpop.f32.mrb[9].mxu0 }
 0x189   : > { %v8900_v62 = vadd.f32 %v6267_v60, %v6266_v57  ;;  %v6269_v63 = vpop.f32.mrb[10].mxu1  ;;  %v8903_v1 = vadd.f32 %v6195_v61, %v6194_v59  ;;  %v6197_v2 = vpop.f32.mrb[10].mxu0 }
 0x18a   : > { %v6270_v3 = vpop.f32.mrb[11].mxu1  ;;  %v6198_v4 = vpop.f32.mrb[11].mxu0 }
 0x18b   : > { %v8905_v5 = vadd.f32 %v6270_v3, %v6269_v63  ;;  %v8907_v6 = vadd.f32 %v6198_v4, %v6197_v2  ;;  %v7844_v2 = vld [vmem:[%s9932_s2 + $0x2c0] sm:$0xff]   ;;  %v7722_v4 = vld [vmem:[%s8430_s7 + $0x5b0] ss:$56 sps:$4 sm:$0xff]  }
 0x18c   : > { %3958 = vmatmul.mubr.bf16.gmra.mrb[116].mxu1 %v7690_v55  ;;  %4119 = vmatmul.mubr.bf16.gmra.mrb[116].mxu0 %v7693_v56 }
 0x18d   : > { %3965 = vmatprep.mubr.bf16.mxu1 %v7694_v58  ;;  %4126 = vmatprep.mubr.bf16.mxu0 %v7698_v0  ;;  %v7723_v58 = vld [vmem:[%s8430_s7 + $0x5bc] ss:$56 sps:$4 sm:$0xff]  }
 0x18e   : > { %6974 = vmatprep.subr.bf16.mxu0 %v7844_v2 }
 0x18f   : > { %v6272_v9 = vpop.f32.mrb[12].mxu1  ;;  %v6200_v11 = vpop.f32.mrb[12].mxu0 }
 0x190   : > { %v6273_v12 = vpop.f32.mrb[13].mxu1  ;;  %v6201_v13 = vpop.f32.mrb[13].mxu0 }
 0x191   : > { %v8912_v14 = vadd.f32 %v6273_v12, %v6272_v9  ;;  %v6275_v15 = vpop.f32.mrb[14].mxu1  ;;  %v8915_v17 = vadd.f32 %v6201_v13, %v6200_v11  ;;  %v6203_v18 = vpop.f32.mrb[14].mxu0 }
 0x192   : > { %v6276_v19 = vpop.f32.mrb[15].mxu1  ;;  %v6204_v20 = vpop.f32.mrb[15].mxu0 }
 0x193   : > { %v8917_v21 = vadd.f32 %v6276_v19, %v6275_v15  ;;  %v8919_v22 = vadd.f32 %v6204_v20, %v6203_v18  ;;  %v7734_v15 = vld [vmem:[%s8430_s7 + $0x62c] ss:$56 sps:$4 sm:$0xff]  }
 0x194   : > { %3966 = vmatmul.mubr.bf16.gmra.mrb[120].mxu1 %v7696_v7  ;;  %4127 = vmatmul.mubr.bf16.gmra.mrb[120].mxu0 %v7701_v8  ;;  %v7725_v8 = vld [vmem:[%s8430_s7 + $0x5b8] ss:$56 sps:$4 sm:$0xff]  }
 0x195   : > { %3973 = vmatprep.mubr.bf16.mxu1 %v7702_v10  ;;  %4134 = vmatprep.mubr.bf16.mxu0 %v7705_v16 }
 0x197   : > { %v6294_v25 = vpop.f32.mrb[16].mxu1  ;;  %v6206_v27 = vpop.f32.mrb[16].mxu0 }
 0x198   : > { %v6295_v28 = vpop.f32.mrb[17].mxu1  ;;  %v6207_v29 = vpop.f32.mrb[17].mxu0 }
 0x199   : > { %v6296_v31 = vadd.f32 %v6295_v28, %v6294_v25  ;;  %v6297_v32 = vpop.f32.mrb[18].mxu1  ;;  %v8925_v35 = vadd.f32 %v6207_v29, %v6206_v27  ;;  %v6209_v36 = vpop.f32.mrb[18].mxu0  ;;  %v7737_v27 = vld [vmem:[%s8430_s7 + $0x628] ss:$56 sps:$4 sm:$0xff]   ;;  %v7741_v29 = vld [vmem:[%s8430_s7 + $0x694] ss:$56 sps:$4 sm:$0xff]  }
 0x19a   : > { %v6298_v39 = vpop.f32.mrb[19].mxu1  ;;  %v6210_v40 = vpop.f32.mrb[19].mxu0 }
 0x19b   : > { %v6299_v41 = vadd.f32 %v6298_v39, %v6297_v32  ;;  %v8927_v42 = vadd.f32 %v6210_v40, %v6209_v36  ;;  %v8930_v43 = vadd.f32 %v6296_v31, %v8879_v33 }
 0x19c   : > { %3974 = vmatmul.mubr.bf16.gmra.mrb[124].mxu1 %v7704_v23  ;;  %4135 = vmatmul.mubr.bf16.gmra.mrb[124].mxu0 %v7707_v24 }
 0x19d   : > { %3981 = vmatprep.mubr.bf16.mxu1 %v7708_v26  ;;  %4142 = vmatprep.mubr.bf16.mxu0 %v7712_v34  ;;  %v8933_v44 = vadd.f32 %v6299_v41, %v8883_v38  ;;  %v7732_v26 = vld [vmem:[%s8430_s7 + $0x620] ss:$56 sps:$4 sm:$0xff]  }
 0x19f   : > { %v6300_v48 = vpop.f32.mrb[20].mxu1  ;;  %v6212_v51 = vpop.f32.mrb[20].mxu0 }
 0x1a0   : > { %v6301_v52 = vpop.f32.mrb[21].mxu1  ;;  %v6213_v55 = vpop.f32.mrb[21].mxu0 }
 0x1a1   : > { %v6302_v56 = vadd.f32 %v6301_v52, %v6300_v48  ;;  %v6303_v57 = vpop.f32.mrb[22].mxu1  ;;  %v8939_v33 = vadd.f32 %v6213_v55, %v6212_v51  ;;  %v6215_v59 = vpop.f32.mrb[22].mxu0  ;;  %v7744_v52 = vld [vmem:[%s8430_s7 + $0x690] ss:$56 sps:$4 sm:$0xff]  }
 0x1a2   : > { %v6304_v60 = vpop.f32.mrb[23].mxu1  ;;  %v6216_v61 = vpop.f32.mrb[23].mxu0 }
 0x1a3   : > { %v6305_v38 = vadd.f32 %v6304_v60, %v6303_v57  ;;  %v8941_v63 = vadd.f32 %v6216_v61, %v6215_v59  ;;  %v8944_v0 = vadd.f32 %v6302_v56, %v8891_v49  ;;  %v7729_v49 = vld [vmem:[%s8430_s7 + $0x624] ss:$56 sps:$4 sm:$0xff]   ;;  %v7747_v56 = vld [vmem:[%s8430_s7 + $0x698] ss:$56 sps:$4 sm:$0xff]   ;;  %v7753_v59 = vld [vmem:[%s8430_s7 + $0x14] ss:$56 sps:$4 sm:$0xff]  }
 0x1a4   : > { %3982 = vmatmul.mubr.bf16.gmra.mrb[128].mxu1 %v7710_v45  ;;  %4143 = vmatmul.mubr.bf16.gmra.mrb[128].mxu0 %v7715_v47 }
 0x1a5   : > { %3989 = vmatprep.mubr.bf16.mxu1 %v7719_v50  ;;  %4150 = vmatprep.mubr.bf16.mxu0 %v7723_v58  ;;  %v8950_v3 = vadd.f32 %v6305_v38, %v8895_v54 }
 0x1a7   : > { %v6306_v7 = vpop.f32.mrb[24].mxu1  ;;  %v6218_v9 = vpop.f32.mrb[24].mxu0 }
 0x1a8   : > { %v6307_v10 = vpop.f32.mrb[25].mxu1  ;;  %v6219_v11 = vpop.f32.mrb[25].mxu0 }
 0x1a9   : > { %v6308_v12 = vadd.f32 %v6307_v10, %v6306_v7  ;;  %v6309_v13 = vpop.f32.mrb[26].mxu1  ;;  %v8956_v16 = vadd.f32 %v6219_v11, %v6218_v9  ;;  %v6221_v18 = vpop.f32.mrb[26].mxu0  ;;  %v7751_v11 = vld [vmem:[%s8430_s7 + $0x10] ss:$56 sps:$4 sm:$0xff]  }
 0x1aa   : > { %v6310_v19 = vpop.f32.mrb[27].mxu1  ;;  %v6222_v54 = vpop.f32.mrb[27].mxu0 }
 0x1ab   : > { %v6311_v20 = vadd.f32 %v6310_v19, %v6309_v13  ;;  %v8958_v23 = vadd.f32 %v6222_v54, %v6221_v18  ;;  %v8961_v24 = vadd.f32 %v6308_v12, %v8903_v1  ;;  %v7745_v1 = vld [vmem:[%s8430_s7 + $0x69c] ss:$56 sps:$4 sm:$0xff]   ;;  %v7756_v12 = vld [vmem:[%s8430_s7 + $0x18] ss:$56 sps:$4 sm:$0xff]  }
 0x1ac   : > { %3990 = vmatmul.mubr.bf16.gmra.mrb[132].mxu1 %v7722_v4  ;;  %4151 = vmatmul.mubr.bf16.gmra.mrb[132].mxu0 %v7725_v8  ;;  %v7760_v19 = vld [vmem:[%s8430_s7 + $0x84] ss:$56 sps:$4 sm:$0xff]  }
 0x1ad   : > { %3997 = vmatprep.mubr.bf16.mxu1 %v7729_v49  ;;  %4158 = vmatprep.mubr.bf16.mxu0 %v7734_v15  ;;  %v8964_v25 = vadd.f32 %v6311_v20, %v8907_v6 }
 0x1af   : > { %v6312_v28 = vpop.f32.mrb[28].mxu1  ;;  %v6224_v31 = vpop.f32.mrb[28].mxu0 }
 0x1b0   : > { %v6313_v32 = vpop.f32.mrb[29].mxu1  ;;  %v6225_v34 = vpop.f32.mrb[29].mxu0 }
 0x1b1   : > { %v6314_v36 = vadd.f32 %v6313_v32, %v6312_v28  ;;  %v6315_v39 = vpop.f32.mrb[30].mxu1  ;;  %v8970_v40 = vadd.f32 %v6225_v34, %v6224_v31  ;;  %v6227_v41 = vpop.f32.mrb[30].mxu0  ;;  %v7769_v32 = vld [vmem:[%s9932_s2 + $0x248] sm:$0xff]  }
 0x1b2   : > { %v6316_v45 = vpop.f32.mrb[31].mxu1  ;;  %v6228_v47 = vpop.f32.mrb[31].mxu0 }
 0x1b3   : > { %v6317_v6 = vadd.f32 %v6316_v45, %v6315_v39  ;;  %v8972_v48 = vadd.f32 %v6228_v47, %v6227_v41  ;;  %v8975_v50 = vadd.f32 %v6314_v36, %v8915_v17  ;;  %v7758_v17 = vld [vmem:[%s8430_s7 + $0x1c] ss:$56 sps:$4 sm:$0xff]   ;;  %v7772_v39 = vld [vmem:[%s9932_s2 + $0x208] sm:$0xff]   ;;  %v7845_v41 = vld [vmem:[%s9932_s2 + $0x280] sm:$0xff]  }
 0x1b4   : > { %3998 = vmatmul.mubr.bf16.gmra.mrb[136].mxu1 %v7732_v26  ;;  %4159 = vmatmul.mubr.bf16.gmra.mrb[136].mxu0 %v7737_v27  ;;  %v7783_v45 = vld [vmem:[%s9932_s2 + $0x250] sm:$0xff]   ;;  %v7846_v47 = vld [vmem:[%s9932_s2 + $0x2c8] sm:$0xff]  }
 0x1b5   : > { %4005 = vmatprep.mubr.bf16.mxu1 %v7741_v29  ;;  %4166 = vmatprep.mubr.bf16.mxu0 %v7745_v1  ;;  %v8978_v51 = vadd.f32 %v6317_v6, %v8919_v22  ;;  %v7763_v29 = vld [vmem:[%s8430_s7 + $0x8c] ss:$56 sps:$4 sm:$0xff]   ;;  %v7762_v6 = vld [vmem:[%s8430_s7 + $0x80] ss:$56 sps:$4 sm:$0xff]  }
 0x1b7   : > { %v6318_v55 = vpop.f32.mrb[32].mxu1  ;;  %v6230_v57 = vpop.f32.mrb[32].mxu0 }
 0x1b8   : > { %v6319_v58 = vpop.f32.mrb[33].mxu1  ;;  %v6231_v60 = vpop.f32.mrb[33].mxu0 }
 0x1b9   : > { %v6320_v61 = vadd.f32 %v6319_v58, %v6318_v55  ;;  %v6321_v38 = vpop.f32.mrb[34].mxu1  ;;  %v8984_v2 = vadd.f32 %v6231_v60, %v6230_v57  ;;  %v6233_v4 = vpop.f32.mrb[34].mxu0  ;;  %v7766_v57 = vld [vmem:[%s8430_s7 + $0xf4] ss:$56 sps:$4 sm:$0xff]  }
 0x1ba   : > { %v6322_v7 = vpop.f32.mrb[35].mxu1  ;;  %v6234_v8 = vpop.f32.mrb[35].mxu0  ;;  %v7770_v58 = vld [vmem:[%s8430_s7 + $0xfc] ss:$56 sps:$4 sm:$0xff]  }
 0x1bb   : > { %v6323_v22 = vadd.f32 %v6322_v7, %v6321_v38  ;;  %v8986_v9 = vadd.f32 %v6234_v8, %v6233_v4  ;;  %v8989_v10 = vadd.f32 %v6320_v61, %v8925_v35  ;;  %v7759_v35 = vld [vmem:[%s9932_s2 + $0x200] sm:$0xff]   ;;  %v7797_v8 = vld [vmem:[%s9932_s2 + $0x258] sm:$0xff]  }
 0x1bc   : > { %4006 = vmatmul.mubr.bf16.gmra.mrb[140].mxu1 %v7744_v52  ;;  %4167 = vmatmul.mubr.bf16.gmra.mrb[140].mxu0 %v7747_v56  ;;  %v7765_v52 = vld [vmem:[%s8430_s7 + $0x88] ss:$56 sps:$4 sm:$0xff]  }
 0x1bd   : > { %4207 = vmatprep.mubr.bf16.mxu1 %v7753_v59  ;;  %4368 = vmatprep.mubr.bf16.mxu0 %v7758_v17  ;;  %v8992_v49 = vadd.f32 %v6323_v22, %v8927_v42  ;;  %v7849_v59 = vld [vmem:[%s9932_s2 + $0x288] sm:$0xff]  }
 0x1bf   : > { %v6324_v13 = vpop.f32.mrb[36].mxu1  ;;  %v6236_v15 = vpop.f32.mrb[36].mxu0 }
 0x1c0   : > { %v6325_v18 = vpop.f32.mrb[37].mxu1  ;;  %v6237_v54 = vpop.f32.mrb[37].mxu0 }
 0x1c1   : > { %v6326_v20 = vadd.f32 %v6325_v18, %v6324_v13  ;;  %v6327_v26 = vpop.f32.mrb[38].mxu1  ;;  %v9000_v27 = vadd.f32 %v6237_v54, %v6236_v15  ;;  %v6239_v28 = vpop.f32.mrb[38].mxu0  ;;  %v7856_v54 = vld [vmem:[%s9932_s2 + $0x2d8] sm:$0xff]  }
 0x1c2   : > { %v6328_v42 = vpop.f32.mrb[39].mxu1  ;;  %v6240_v31 = vpop.f32.mrb[39].mxu0 }
 0x1c3   : > { %v6329_v34 = vadd.f32 %v6328_v42, %v6327_v26  ;;  %v9006_v36 = vadd.f32 %v6240_v31, %v6239_v28  ;;  %v9012_v1 = vadd.f32 %v6326_v20, %v8939_v33  ;;  %v7811_v28 = vld [vmem:[%s9932_s2 + $0x260] sm:$0xff]   ;;  %v7768_v31 = vld [vmem:[%s8430_s7 + $0xf0] ss:$56 sps:$4 sm:$0xff]  }
 0x1c4   : > { %4208 = vmatmul.mubr.bf16.vlgmr.msra.gmra.mrb[144].mxu1 %v7751_v11  ;;  %4369 = vmatmul.mubr.bf16.vlgmr.msra.gmra.mrb[144].mxu0 %v7756_v12  ;;  %v7854_v12 = vld [vmem:[%s9932_s2 + $0x2d0] sm:$0xff]  }
 0x1c5   : > { %6863 = vmatpush3.bf16.msra.mxu1 %v7759_v35  ;;  %4215 = vmatprep.mubr.bf16.mxu1 %v7760_v19  ;;  %v9024_v33 = vadd.f32 %v6329_v34, %v8941_v63  ;;  %v7786_v63 = vld [vmem:[%s9932_s2 + $0x210] sm:$0xff]  }
 0x1c6   : > { %4376 = vmatprep.mubr.bf16.mxu0 %v7763_v29  ;;  %6864 = vmatprep.subr.bf16.mxu1 %v7769_v32  ;;  %v7855_v19 = vld [vmem:[%s9932_s2 + $0x290] sm:$0xff]  }
 0x1c7   : > { %v6330_v55 = vpop.f32.mrb[40].mxu1  ;;  %v6242_v56 = vpop.f32.mrb[40].mxu0  ;;  %6975 = vmatpush3.bf16.msra.mxu0 %v7845_v41  ;;  %v7773_v32 = vld [vmem:[%s8430_s7 + $0xf8] ss:$56 sps:$4 sm:$0xff]  }
 0x1c8   : > { %v6331_v60 = vpop.f32.mrb[41].mxu1  ;;  %v6243_v61 = vpop.f32.mrb[41].mxu0  ;;  %6976 = vmatprep.subr.bf16.mxu0 %v7846_v47  ;;  %v7774_v47 = vld [vmem:[%s8430_s7 + $0x164] ss:$56 sps:$4 sm:$0xff]  }
 0x1c9   : > { %v6332_v38 = vadd.f32 %v6331_v60, %v6330_v55  ;;  %v6333_v17 = vpop.f32.mrb[42].mxu1  ;;  %v9036_v4 = vadd.f32 %v6243_v61, %v6242_v56  ;;  %v6245_v7 = vpop.f32.mrb[42].mxu0  ;;  %6865 = vmatpush3.bf16.msra.mxu1 %v7772_v39  ;;  %v7814_v56 = vld [vmem:[%s9932_s2 + $0x220] sm:$0xff]   ;;  %v7825_v61 = vld [vmem:[%s9932_s2 + $0x268] sm:$0xff]  }
 0x1ca   : > { %v6334_v22 = vpop.f32.mrb[43].mxu1  ;;  %v6246_v11 = vpop.f32.mrb[43].mxu0  ;;  %6866 = vmatprep.subr.bf16.mxu1 %v7783_v45 }
 0x1cb   : > { %v6335_v13 = vadd.f32 %v6334_v22, %v6333_v17  ;;  %v9044_v15 = vadd.f32 %v6246_v11, %v6245_v7  ;;  %v9047_v18 = vadd.f32 %v6332_v38, %v8956_v16  ;;  %6977 = vmatpush3.bf16.msra.mxu0 %v7849_v59  ;;  %v7800_v16 = vld [vmem:[%s9932_s2 + $0x218] sm:$0xff]   ;;  %v7868_v38 = vld [vmem:[%s9932_s2 + $0x2e8] sm:$0xff]   ;;  %v7839_v22 = vld [vmem:[%s9932_s2 + $0x270] sm:$0xff]  }
 0x1cc   : > { %4216 = vmatmul.mubr.bf16.gmra.mrb[148].mxu1 %v7762_v6  ;;  %4377 = vmatmul.mubr.bf16.gmra.mrb[148].mxu0 %v7765_v52  ;;  %v7777_v6 = vld [vmem:[%s8430_s7 + $0x16c] ss:$56 sps:$4 sm:$0xff]  }
 0x1cd   : > { %4223 = vmatprep.mubr.bf16.mxu1 %v7766_v57  ;;  %4384 = vmatprep.mubr.bf16.mxu0 %v7770_v58  ;;  %v9056_v20 = vadd.f32 %v6335_v13, %v8958_v23  ;;  %v7859_v23 = vld [vmem:[%s9932_s2 + $0x298] sm:$0xff]   ;;  %v7866_v57 = vld [vmem:[%s9932_s2 + $0x2e0] sm:$0xff]   ;;  %v7828_v17 = vld [vmem:[%s9932_s2 + $0x228] sm:$0xff]  }
 0x1ce   : > { %6867 = vmatpush3.bf16.msra.mxu1 %v7786_v63  ;;  %6978 = vmatprep.subr.bf16.mxu0 %v7854_v12  ;;  %v7867_v63 = vld [vmem:[%s9932_s2 + $0x2a0] sm:$0xff]  }
 0x1cf   : > { %v6336_v26 = vpop.f32.mrb[44].mxu1  ;;  %v6248_v35 = vpop.f32.mrb[44].mxu0  ;;  %6868 = vmatprep.subr.bf16.mxu1 %v7797_v8  ;;  %6979 = vmatpush3.bf16.msra.mxu0 %v7855_v19  ;;  %v7776_v19 = vld [vmem:[%s8430_s7 + $0x160] ss:$56 sps:$4 sm:$0xff]  }
 0x1d0   : > { %v6337_v29 = vpop.f32.mrb[45].mxu1  ;;  %v6249_v42 = vpop.f32.mrb[45].mxu0  ;;  %6980 = vmatprep.subr.bf16.mxu0 %v7856_v54  ;;  %v7779_v54 = vld [vmem:[%s8430_s7 + $0x168] ss:$56 sps:$4 sm:$0xff]  }
 0x1d1   : > { %v6338_v34 = vadd.f32 %v6337_v29, %v6336_v26  ;;  %v6339_v39 = vpop.f32.mrb[46].mxu1  ;;  %v9069_v41 = vadd.f32 %v6249_v42, %v6248_v35  ;;  %v6251_v45 = vpop.f32.mrb[46].mxu0  ;;  %v7784_v29 = vld [vmem:[%s8430_s7 + $0x1dc] ss:$56 sps:$4 sm:$0xff]  }
 0x1d2   : > { %v6340_v52 = vpop.f32.mrb[47].mxu1  ;;  %v6252_v55 = vpop.f32.mrb[47].mxu0  ;;  %6869 = vmatpush3.bf16.msra.mxu1 %v7800_v16 }
 0x1d3   : > { %v6341_v58 = vadd.f32 %v6340_v52, %v6339_v39  ;;  %v9079_v59 = vadd.f32 %v6252_v55, %v6251_v45  ;;  %v9082_v60 = vadd.f32 %v6338_v34, %v8970_v40  ;;  %6870 = vmatprep.subr.bf16.mxu1 %v7811_v28  ;;  %6981 = vmatpush3.bf16.msra.mxu0 %v7859_v23  ;;  %v7780_v23 = vld [vmem:[%s8430_s7 + $0x1d4] ss:$56 sps:$4 sm:$0xff]   ;;  %v7864_v55 = vld [vmem:[%s9932_s2 + $0x238] sm:$0xff]  }
 0x1d4   : > { %4224 = vmatmul.mubr.bf16.gmra.mrb[152].mxu1 %v7768_v31  ;;  %4385 = vmatmul.mubr.bf16.gmra.mrb[152].mxu0 %v7773_v32  ;;  %v7876_v34 = vld [vmem:[%s9932_s2 + $0x2f0] sm:$0xff]  }
 0x1d5   : > { %4231 = vmatprep.mubr.bf16.mxu1 %v7774_v47  ;;  %4392 = vmatprep.mubr.bf16.mxu0 %v7777_v6  ;;  %v9094_v40 = vadd.f32 %v6341_v58, %v8972_v48  ;;  %v7871_v48 = vld [vmem:[%s9932_s2 + $0x2a8] sm:$0xff]   ;;  %v7877_v47 = vld [vmem:[%s9932_s2 + $0x2b0] sm:$0xff]   ;;  %v7882_v58 = vld [vmem:[%s9932_s2 + $0x2b8] sm:$0xff]  }
 0x1d6   : > { %6871 = vmatpush3.bf16.msra.mxu1 %v7814_v56  ;;  %6982 = vmatprep.subr.bf16.mxu0 %v7866_v57 }
 0x1d7   : > { %v6342_v7 = vpop.f32.mrb[48].mxu1  ;;  %v7250_v8 = vpop.f32.mrb[48].mxu0  ;;  %6872 = vmatprep.subr.bf16.mxu1 %v7825_v61  ;;  %6983 = vmatpush3.bf16.msra.mxu0 %v7867_v63 }
 0x1d8   : > { %v9106_v11 = vadd.f32 %v7250_v8, %v8944_v0  ;;  %v6343_v12 = vpop.f32.mrb[49].mxu1  ;;  %v1934_v13 = vpop.f32.mrb[49].mxu0  ;;  %6984 = vmatprep.subr.bf16.mxu0 %v7868_v38  ;;  %v7842_v0 = vld [vmem:[%s9932_s2 + $0x230] sm:$0xff]  }
 0x1d9   : > { %v6344_v16 = vadd.f32 %v6343_v12, %v6342_v7  ;;  %v9111_v26 = vadd.f32 %v1934_v13, %v8930_v43  ;;  %v6345_v35 = vpop.f32.mrb[50].mxu1  ;;  %v7251_v28 = vpop.f32.mrb[50].mxu0  ;;  %v7782_v7 = vld [vmem:[%s8430_s7 + $0x1d0] ss:$56 sps:$4 sm:$0xff]  }
 0x1da   : > { %v9116_v42 = vadd.f32 %v7251_v28, %v8950_v3  ;;  %v6346_v31 = vpop.f32.mrb[51].mxu1  ;;  %v1937_v32 = vpop.f32.mrb[51].mxu0  ;;  %6873 = vmatpush3.bf16.msra.mxu1 %v7828_v17  ;;  %v7861_v3 = vld [vmem:[%s9932_s2 + $0x278] sm:$0xff]  }
 0x1db   : > { %v6347_v43 = vadd.f32 %v6346_v31, %v6345_v35  ;;  %v9125_v39 = vadd.f32 %v1937_v32, %v8933_v44  ;;  %v9128_v45 = vadd.f32 %v6344_v16, %v8984_v2  ;;  %6874 = vmatprep.subr.bf16.mxu1 %v7839_v22  ;;  %6985 = vmatpush3.bf16.msra.mxu0 %v7871_v48  ;;  %v7878_v44 = vld [vmem:[%s9932_s2 + $0x2f8] sm:$0xff]   ;;  %v5012_v6 = vmax.f32 %v9111_v26, 0.0 }
 0x1dc   : > { %4232 = vmatmul.mubr.bf16.gmra.mrb[156].mxu1 %v7776_v19  ;;  %4393 = vmatmul.mubr.bf16.gmra.mrb[156].mxu0 %v7779_v54  ;;  %v7787_v8 = vld [vmem:[%s8430_s7 + $0x1d8] ss:$56 sps:$4 sm:$0xff]   ;;  %v7788_v19 = vld [vmem:[%s8430_s7 + $0x244] ss:$56 sps:$4 sm:$0xff]  }
 0x1dd   : > { %v5013_v2 = vmax.f32 %v9125_v39, 0.0  ;;  %4239 = vmatprep.mubr.bf16.mxu1 %v7780_v23  ;;  %4400 = vmatprep.mubr.bf16.mxu0 %v7784_v29  ;;  %v9142_v52 = vadd.f32 %v6347_v43, %v8986_v9  ;;  %v7883_v9 = vld [vmem:[%s9932_s2 + $0x340] sm:$0xff]  }
 0x1de   : > { %6875 = vmatpush3.bf16.msra.mxu1 %v7842_v0  ;;  %6986 = vmatprep.subr.bf16.mxu0 %v7876_v34  ;;  %v7791_v54 = vld [vmem:[%s8430_s7 + $0x24c] ss:$56 sps:$4 sm:$0xff]   ;;  %v7790_v34 = vld [vmem:[%s8430_s7 + $0x240] ss:$56 sps:$4 sm:$0xff]  }
 0x1df   : > { %v6348_v56 = vpop.f32.mrb[52].mxu1  ;;  %v7254_v57 = vpop.f32.mrb[52].mxu0  ;;  %6876 = vmatprep.subr.bf16.mxu1 %v7861_v3  ;;  %6987 = vmatpush3.bf16.msra.mxu0 %v7877_v47  ;;  %v9153_v61 = vpack.c.bf16 %v5013_v2, %v5012_v6  ;;  %v7793_v43 = vld [vmem:[%s8430_s7 + $0x248] ss:$56 sps:$4 sm:$0xff]   ;;  %v7794_v6 = vld [vmem:[%s8430_s7 + $0x2b4] ss:$56 sps:$4 sm:$0xff]  }
 0x1e0   : > { %v9156_v63 = vadd.f32 %v7254_v57, %v8975_v50  ;;  %v6349_v38 = vpop.f32.mrb[53].mxu1  ;;  %v1950_v17 = vpop.f32.mrb[53].mxu0  ;;  %6988 = vmatprep.subr.bf16.mxu0 %v7878_v44  ;;  %v7798_v2 = vld [vmem:[%s8430_s7 + $0x2bc] ss:$56 sps:$4 sm:$0xff]  }
 0x1e1   : > { %v6350_v22 = vadd.f32 %v6349_v38, %v6348_v56  ;;  %v9161_v48 = vadd.f32 %v1950_v17, %v8961_v24  ;;  %v6351_v12 = vpop.f32.mrb[54].mxu1  ;;  %v7255_v13 = vpop.f32.mrb[54].mxu0 }
 0x1e2   : > { %v9166_v16 = vadd.f32 %v7255_v13, %v8978_v51  ;;  %v6352_v35 = vpop.f32.mrb[55].mxu1  ;;  %v1953_v28 = vpop.f32.mrb[55].mxu0  ;;  %6877 = vmatpush3.bf16.msra.mxu1 %v7864_v55 }
 0x1e3   : > { %v6353_v50 = vadd.f32 %v6352_v35, %v6351_v12  ;;  %v9169_v23 = vadd.f32 %v1953_v28, %v8964_v25  ;;  %v1846_v29 = vadd.f32 %v6350_v22, %v9000_v27  ;;  %6989 = vmatpush3.bf16.msra.mxu0 %v7882_v58  ;;  %7086 = vmatprep.subr.bf16.mxu1 %v7883_v9 }
 0x1e4   : > { %4240 = vmatmul.mubr.bf16.gmra.mrb[160].mxu1 %v7782_v7  ;;  %4401 = vmatmul.mubr.bf16.gmra.mrb[160].mxu0 %v7787_v8  ;;  %v7801_v8 = vld [vmem:[%s8430_s7 + $0x2b8] ss:$56 sps:$4 sm:$0xff]  }
 0x1e5   : > { %4247 = vmatprep.mubr.bf16.mxu1 %v7788_v19  ;;  %4408 = vmatprep.mubr.bf16.mxu0 %v7791_v54  ;;  %v1849_v24 = vadd.f32 %v6353_v50, %v9006_v36  ;;  %v7802_v19 = vld [vmem:[%s8430_s7 + $0x324] ss:$56 sps:$4 sm:$0xff]  }
 0x1e6   : > { %v7805_v54 = vld [vmem:[%s8430_s7 + $0x32c] ss:$56 sps:$4 sm:$0xff]  }
 0x1e7   : > { %v6354_v51 = vpop.f32.mrb[56].mxu1  ;;  %v7258_v31 = vpop.f32.mrb[56].mxu0 }
 0x1e8   : > { %v9174_v32 = vadd.f32 %v7258_v31, %v9012_v1  ;;  %v6355_v0 = vpop.f32.mrb[57].mxu1  ;;  %v1966_v25 = vpop.f32.mrb[57].mxu0 }
 0x1e9   : > { %v6356_v27 = vadd.f32 %v6355_v0, %v6354_v51  ;;  %v9179_v3 = vadd.f32 %v1966_v25, %v8989_v10  ;;  %v6357_v47 = vpop.f32.mrb[58].mxu1  ;;  %v7259_v44 = vpop.f32.mrb[58].mxu0 }
 0x1ea   : > { %9977 = vst [vmem:[#allocation14_spill] sm:$0xff] %v9174_v32  ;;  %v9184_v55 = vadd.f32 %v7259_v44, %v9024_v33  ;;  %v6358_v36 = vpop.f32.mrb[59].mxu1  ;;  %v1969_v1 = vpop.f32.mrb[59].mxu0 }
 0x1eb   : > { %v6359_v56 = vadd.f32 %v6358_v36, %v6357_v47  ;;  %v9187_v57 = vadd.f32 %v1969_v1, %v8992_v49  ;;  %v1854_v58 = vadd.f32 %v6356_v27, %v9036_v4  ;;  %v7796_v49 = vld [vmem:[%s8430_s7 + $0x2b0] ss:$56 sps:$4 sm:$0xff]  }
 0x1ec   : > { %9978 = vst [vmem:[#allocation15_spill] sm:$0xff] %v9184_v55  ;;  %4248 = vmatmul.mubr.bf16.gmra.mrb[164].mxu1 %v7790_v34  ;;  %4409 = vmatmul.mubr.bf16.gmra.mrb[164].mxu0 %v7793_v43  ;;  %v7804_v43 = vld [vmem:[%s8430_s7 + $0x320] ss:$56 sps:$4 sm:$0xff]  }
 0x1ed   : > { %4255 = vmatprep.mubr.bf16.mxu1 %v7794_v6  ;;  %4416 = vmatprep.mubr.bf16.mxu0 %v7798_v2  ;;  %v9191_v10 = vadd.f32 %v6359_v56, %v9044_v15  ;;  %v7807_v27 = vld [vmem:[%s8430_s7 + $0x328] ss:$56 sps:$4 sm:$0xff]   ;;  %v7808_v6 = vld [vmem:[%s8430_s7 + $0x394] ss:$56 sps:$4 sm:$0xff]  }
 0x1ee   : > { %v7812_v2 = vld [vmem:[%s8430_s7 + $0x39c] ss:$56 sps:$4 sm:$0xff]  }
 0x1ef   : > { %v6360_v33 = vpop.f32.mrb[60].mxu1  ;;  %v7262_v9 = vpop.f32.mrb[60].mxu0 }
 0x1f0   : > { %v9194_v38 = vadd.f32 %v7262_v9, %v9082_v60  ;;  %v6361_v17 = vpop.f32.mrb[61].mxu1  ;;  %v1982_v7 = vpop.f32.mrb[61].mxu0 }
 0x1f1   : > { %v6362_v22 = vadd.f32 %v6361_v17, %v6360_v33  ;;  %v9199_v4 = vadd.f32 %v1982_v7, %v9047_v18  ;;  %v6363_v12 = vpop.f32.mrb[62].mxu1  ;;  %v7263_v13 = vpop.f32.mrb[62].mxu0 }
 0x1f2   : > { %9979 = vst [vmem:[#allocation16_spill] sm:$0xff] %v9194_v38  ;;  %v9204_v15 = vadd.f32 %v7263_v13, %v9094_v40  ;;  %v6364_v35 = vpop.f32.mrb[63].mxu1  ;;  %v1985_v60 = vpop.f32.mrb[63].mxu0 }
 0x1f3   : > { %9980 = vst [vmem:[#allocation17_spill] sm:$0xff] %v9199_v4  ;;  %v6365_v28 = vadd.f32 %v6364_v35, %v6363_v12  ;;  %v9207_v50 = vadd.f32 %v1985_v60, %v9056_v20  ;;  %v1862_v51 = vadd.f32 %v6362_v22, %v9069_v41  ;;  %v7815_v22 = vld [vmem:[%s8430_s7 + $0x398] ss:$56 sps:$4 sm:$0xff]  }
 0x1f4   : > { %9981 = vst [vmem:[#allocation18_spill] sm:$0xff] %v9204_v15  ;;  %4256 = vmatmul.mubr.bf16.gmra.mrb[168].mxu1 %v7796_v49  ;;  %4417 = vmatmul.mubr.bf16.gmra.mrb[168].mxu0 %v7801_v8  ;;  %v7810_v8 = vld [vmem:[%s8430_s7 + $0x390] ss:$56 sps:$4 sm:$0xff]  }
 0x1f5   : > { %9982 = vst [vmem:[#allocation19_spill] sm:$0xff] %v9207_v50  ;;  %4263 = vmatprep.mubr.bf16.mxu1 %v7802_v19  ;;  %4424 = vmatprep.mubr.bf16.mxu0 %v7805_v54  ;;  %v1865_v18 = vadd.f32 %v6365_v28, %v9079_v59  ;;  %v7816_v19 = vld [vmem:[%s8430_s7 + $0x404] ss:$56 sps:$4 sm:$0xff]  }
 0x1f6   : > { %v7819_v54 = vld [vmem:[%s8430_s7 + $0x40c] ss:$56 sps:$4 sm:$0xff]  }
 0x1f7   : > { %v6366_v40 = vpop.f32.mrb[64].mxu1  ;;  %v7266_v31 = vpop.f32.mrb[64].mxu0 }
 0x1f8   : > { %v9211_v0 = vadd.f32 %v7266_v31, %v1846_v29  ;;  %v6367_v25 = vpop.f32.mrb[65].mxu1  ;;  %v1998_v34 = vpop.f32.mrb[65].mxu0 }
 0x1f9   : > { %v6368_v20 = vadd.f32 %v6367_v25, %v6366_v40  ;;  %v9216_v47 = vadd.f32 %v1998_v34, %v9128_v45  ;;  %v6369_v41 = vpop.f32.mrb[66].mxu1  ;;  %v7267_v44 = vpop.f32.mrb[66].mxu0 }
 0x1fa   : > { %9983 = vst [vmem:[#allocation20_spill] sm:$0xff] %v9211_v0  ;;  %v9220_v36 = vadd.f32 %v7267_v44, %v1849_v24  ;;  %v6370_v59 = vpop.f32.mrb[67].mxu1  ;;  %v2001_v1 = vpop.f32.mrb[67].mxu0 }
 0x1fb   : > { %9984 = vst [vmem:[#allocation21_spill] sm:$0xff] %v9216_v47  ;;  %v6371_v29 = vadd.f32 %v6370_v59, %v6369_v41  ;;  %v9223_v56 = vadd.f32 %v2001_v1, %v9142_v52  ;;  %v1870_v33 = vadd.f32 %v6368_v20, %v8876_v30  ;;  %v7821_v20 = vld [vmem:[%s8430_s7 + $0x408] ss:$56 sps:$4 sm:$0xff]  }
 0x1fc   : > { %9985 = vst [vmem:[#allocation22_spill] sm:$0xff] %v9220_v36  ;;  %4264 = vmatmul.mubr.bf16.gmra.mrb[172].mxu1 %v7804_v43  ;;  %4425 = vmatmul.mubr.bf16.gmra.mrb[172].mxu0 %v7807_v27  ;;  %v7818_v27 = vld [vmem:[%s8430_s7 + $0x400] ss:$56 sps:$4 sm:$0xff]  }
 0x1fd   : > { %9986 = vst [vmem:[#allocation23_spill] sm:$0xff] %v9223_v56  ;;  %4271 = vmatprep.mubr.bf16.mxu1 %v7808_v6  ;;  %4432 = vmatprep.mubr.bf16.mxu0 %v7812_v2  ;;  %v1873_v45 = vadd.f32 %v6371_v29, %v8881_v37  ;;  %v7822_v6 = vld [vmem:[%s8430_s7 + $0x474] ss:$56 sps:$4 sm:$0xff]  }
 0x1fe   : > { %v7826_v2 = vld [vmem:[%s8430_s7 + $0x47c] ss:$56 sps:$4 sm:$0xff]  }
 0x1ff   : > { %v6372_v24 = vpop.f32.mrb[68].mxu1  ;;  %v7270_v9 = vpop.f32.mrb[68].mxu0 }
 0x200   : > { %v9227_v17 = vadd.f32 %v7270_v9, %v1862_v51  ;;  %v6373_v7 = vpop.f32.mrb[69].mxu1  ;;  %v2014_v49 = vpop.f32.mrb[69].mxu0 }
 0x201   : > { %v6374_v52 = vadd.f32 %v6373_v7, %v6372_v24  ;;  %v9231_v12 = vadd.f32 %v2014_v49, %v1854_v58  ;;  %v6375_v30 = vpop.f32.mrb[70].mxu1  ;;  %v7271_v13 = vpop.f32.mrb[70].mxu0 }
 0x202   : > { %9987 = vst [vmem:[#allocation24_spill] sm:$0xff] %v9227_v17  ;;  %v9235_v35 = vadd.f32 %v7271_v13, %v1865_v18  ;;  %v6376_v60 = vpop.f32.mrb[71].mxu1  ;;  %v2017_v37 = vpop.f32.mrb[71].mxu0 }
 0x203   : > { %9988 = vst [vmem:[#allocation25_spill] sm:$0xff] %v9231_v12  ;;  %v6377_v28 = vadd.f32 %v6376_v60, %v6375_v30  ;;  %v9238_v51 = vadd.f32 %v2017_v37, %v9191_v10  ;;  %v1878_v40 = vadd.f32 %v6374_v52, %v8888_v46  ;;  %v7824_v52 = vld [vmem:[%s8430_s7 + $0x470] ss:$56 sps:$4 sm:$0xff]   ;;  %v7833_v60 = vld [vmem:[%s8430_s7 + $0x4ec] ss:$56 sps:$4 sm:$0xff]  }
 0x204   : > { %9989 = vst [vmem:[#allocation26_spill] sm:$0xff] %v9235_v35  ;;  %4272 = vmatmul.mubr.bf16.gmra.mrb[176].mxu1 %v7810_v8  ;;  %4433 = vmatmul.mubr.bf16.gmra.mrb[176].mxu0 %v7815_v22  ;;  %v7829_v30 = vld [vmem:[%s8430_s7 + $0x478] ss:$56 sps:$4 sm:$0xff]  }
 0x205   : > { %9990 = vst [vmem:[#allocation27_spill] sm:$0xff] %v9238_v51  ;;  %v1881_v58 = vadd.f32 %v6377_v28, %v8893_v53  ;;  %4279 = vmatprep.mubr.bf16.mxu1 %v7816_v19  ;;  %4440 = vmatprep.mubr.bf16.mxu0 %v7819_v54 }
 0x207   : > { %v6378_v18 = vpop.f32.mrb[72].mxu1  ;;  %v7274_v31 = vpop.f32.mrb[72].mxu0 }
 0x208   : > { %v9242_v25 = vadd.f32 %v7274_v31, %v1878_v40  ;;  %v6379_v34 = vpop.f32.mrb[73].mxu1  ;;  %v2030_v43 = vpop.f32.mrb[73].mxu0 }
 0x209   : > { %v6380_v10 = vadd.f32 %v6379_v34, %v6378_v18  ;;  %v9246_v41 = vadd.f32 %v2030_v43, %v1870_v33  ;;  %v6381_v46 = vpop.f32.mrb[74].mxu1  ;;  %v7275_v44 = vpop.f32.mrb[74].mxu0 }
 0x20a   : > { %9991 = vst [vmem:[#allocation28_spill] sm:$0xff] %v9242_v25  ;;  %v9250_v59 = vadd.f32 %v7275_v44, %v1881_v58  ;;  %v6382_v53 = vpop.f32.mrb[75].mxu1  ;;  %v2033_v1 = vpop.f32.mrb[75].mxu0 }
 0x20b   : > { %9992 = vst [vmem:[#allocation29_spill] sm:$0xff] %v9246_v41  ;;  %v6383_v29 = vadd.f32 %v6382_v53, %v6381_v46  ;;  %v9252_v24 = vadd.f32 %v2033_v1, %v1873_v45  ;;  %v1886_v9 = vadd.f32 %v6380_v10, %v8900_v62  ;;  %v7830_v62 = vld [vmem:[%s8430_s7 + $0x4e4] ss:$56 sps:$4 sm:$0xff]   ;;  %v7835_v46 = vld [vmem:[%s8430_s7 + $0x4e8] ss:$56 sps:$4 sm:$0xff]  }
 0x20c   : > { %9993 = vst [vmem:[#allocation30_spill] sm:$0xff] %v9250_v59  ;;  %4280 = vmatmul.mubr.bf16.gmra.mrb[180].mxu1 %v7818_v27  ;;  %4441 = vmatmul.mubr.bf16.gmra.mrb[180].mxu0 %v7821_v20  ;;  %v7836_v1 = vld [vmem:[%s8430_s7 + $0x554] ss:$56 sps:$4 sm:$0xff]  }
 0x20d   : > { %9994 = vst [vmem:[#allocation31_spill] sm:$0xff] %v9252_v24  ;;  %v1889_v33 = vadd.f32 %v6383_v29, %v8905_v5  ;;  %4287 = vmatprep.mubr.bf16.mxu1 %v7822_v6  ;;  %4448 = vmatprep.mubr.bf16.mxu0 %v7826_v2  ;;  %v7840_v29 = vld [vmem:[%s8430_s7 + $0x55c] ss:$56 sps:$4 sm:$0xff]  }
 0x20f   : > { %v6384_v7 = vpop.f32.mrb[76].mxu1  ;;  %v7278_v49 = vpop.f32.mrb[76].mxu0 }
 0x210   : > { %v6385_v8 = vpop.f32.mrb[77].mxu1  ;;  %v2046_v22 = vpop.f32.mrb[77].mxu0 }
 0x211   : > { %v6386_v13 = vadd.f32 %v6385_v8, %v6384_v7  ;;  %v9258_v19 = vadd.f32 %v2046_v22, %v1886_v9  ;;  %v6387_v45 = vpop.f32.mrb[78].mxu1  ;;  %v7279_v54 = vpop.f32.mrb[78].mxu0 }
 0x212   : > { %v6388_v37 = vpop.f32.mrb[79].mxu1  ;;  %v2049_v28 = vpop.f32.mrb[79].mxu0 }
 0x213   : > { %9995 = vst [vmem:[#allocation32_spill] sm:$0xff] %v9258_v19  ;;  %v1894_v5 = vadd.f32 %v6386_v13, %v8912_v14  ;;  %v6389_v40 = vadd.f32 %v6388_v37, %v6387_v45  ;;  %v9263_v58 = vadd.f32 %v2049_v28, %v1889_v33  ;;  %v7832_v14 = vld [vmem:[%s8430_s7 + $0x4e0] ss:$56 sps:$4 sm:$0xff]  }
 0x214   : > { %4288 = vmatmul.mubr.bf16.gmra.mrb[184].mxu1 %v7824_v52  ;;  %4449 = vmatmul.mubr.bf16.gmra.mrb[184].mxu0 %v7829_v30 }
 0x215   : > { %9996 = vst [vmem:[#allocation33_spill] sm:$0xff] %v9263_v58  ;;  %v1897_v18 = vadd.f32 %v6389_v40, %v8917_v21  ;;  %4295 = vmatprep.mubr.bf16.mxu1 %v7830_v62  ;;  %4456 = vmatprep.mubr.bf16.mxu0 %v7833_v60  ;;  %v9266_v31 = vadd.f32 %v7278_v49, %v1894_v5  ;;  %v7838_v62 = vld [vmem:[%s8430_s7 + $0x550] ss:$56 sps:$4 sm:$0xff]   ;;  %v7847_v40 = vld [vmem:[%s8430_s7 + $0x5c4] ss:$56 sps:$4 sm:$0xff]  }
 0x217   : > { %9997 = vst [vmem:[#allocation34_spill] sm:$0xff] %v9266_v31  ;;  %v6430_v34 = vpop.f32.mrb[80].mxu1  ;;  %v6542_v43 = vpop.f32.mrb[80].mxu0  ;;  %v9268_v27 = vadd.f32 %v7279_v54, %v1897_v18  ;;  %v7851_v18 = vld [vmem:[%s8430_s7 + $0x5cc] ss:$56 sps:$4 sm:$0xff]  }
 0x218   : > { %v6431_v20 = vpop.f32.mrb[81].mxu1  ;;  %v6543_v10 = vpop.f32.mrb[81].mxu0 }
 0x219   : > { %9998 = vst [vmem:[#allocation35_spill] sm:$0xff] %v9268_v27  ;;  %v6432_v44 = vadd.f32 %v6431_v20, %v6430_v34  ;;  %v6433_v6 = vpop.f32.mrb[82].mxu1  ;;  %v6544_v2 = vadd.f32 %v6543_v10, %v6542_v43  ;;  %v6545_v53 = vpop.f32.mrb[82].mxu0 }
 0x21a   : > { %v6434_v21 = vpop.f32.mrb[83].mxu1  ;;  %v6546_v9 = vpop.f32.mrb[83].mxu0 }
 0x21b   : > { %v3888_v33 = vadd.f32 %v6432_v44, %v9111_v26  ;;  %v6435_v7 = vadd.f32 %v6434_v21, %v6433_v6  ;;  %v6547_v49 = vadd.f32 %v6546_v9, %v6545_v53  ;;  %v7843_v26 = vld [vmem:[%s8430_s7 + $0x558] ss:$56 sps:$4 sm:$0xff]   ;;  %v7853_v21 = vld [vmem:[%s8430_s7 + $0x5c8] ss:$56 sps:$4 sm:$0xff]  }
 0x21c   : > { %4296 = vmatmul.mubr.bf16.gmra.mrb[188].mxu1 %v7832_v14  ;;  %4457 = vmatmul.mubr.bf16.gmra.mrb[188].mxu0 %v7835_v46 }
 0x21d   : > { %v3891_v8 = vadd.f32 %v6435_v7, %v9125_v39  ;;  %v9276_v22 = vadd.f32 %v6544_v2, %v3888_v33  ;;  %4303 = vmatprep.mubr.bf16.mxu1 %v7836_v1  ;;  %4464 = vmatprep.mubr.bf16.mxu0 %v7840_v29  ;;  %v7850_v29 = vld [vmem:[%s8430_s7 + $0x5c0] ss:$56 sps:$4 sm:$0xff]  }
 0x21f   : > { %v9278_v52 = vadd.f32 %v6547_v49, %v3891_v8  ;;  %v6436_v30 = vpop.f32.mrb[84].mxu1  ;;  %v6548_v13 = vpop.f32.mrb[84].mxu0  ;;  %v7857_v8 = vld [vmem:[%s8430_s7 + $0x634] ss:$56 sps:$4 sm:$0xff]  }
 0x220   : > { %v6437_v45 = vpop.f32.mrb[85].mxu1  ;;  %v6549_v54 = vpop.f32.mrb[85].mxu0 }
 0x221   : > { %v6438_v60 = vadd.f32 %v6437_v45, %v6436_v30  ;;  %v6439_v37 = vpop.f32.mrb[86].mxu1  ;;  %v6550_v28 = vadd.f32 %v6549_v54, %v6548_v13  ;;  %v6551_v5 = vpop.f32.mrb[86].mxu0  ;;  %v7862_v30 = vld [vmem:[%s8430_s7 + $0x63c] ss:$56 sps:$4 sm:$0xff]  }
 0x222   : > { %v6440_v39 = vpop.f32.mrb[87].mxu1  ;;  %v6552_v34 = vpop.f32.mrb[87].mxu0 }
 0x223   : > { %v3896_v43 = vadd.f32 %v6438_v60, %v9106_v11  ;;  %v6441_v20 = vadd.f32 %v6440_v39, %v6439_v37  ;;  %v6553_v10 = vadd.f32 %v6552_v34, %v6551_v5  ;;  %v7860_v34 = vld [vmem:[%s8430_s7 + $0x630] ss:$56 sps:$4 sm:$0xff]  }
 0x224   : > { %4304 = vmatmul.mubr.bf16.gmra.mrb[192].mxu1 %v7838_v62  ;;  %4465 = vmatmul.mubr.bf16.gmra.mrb[192].mxu0 %v7843_v26 }
 0x225   : > { %v3899_v14 = vadd.f32 %v6441_v20, %v9116_v42  ;;  %v9286_v46 = vadd.f32 %v6550_v28, %v3896_v43  ;;  %4311 = vmatprep.mubr.bf16.mxu1 %v7847_v40  ;;  %4472 = vmatprep.mubr.bf16.mxu0 %v7851_v18  ;;  %v7865_v43 = vld [vmem:[%s8430_s7 + $0x638] ss:$56 sps:$4 sm:$0xff]  }
 0x227   : > { %v9288_v44 = vadd.f32 %v6553_v10, %v3899_v14  ;;  %v6442_v6 = vpop.f32.mrb[88].mxu1  ;;  %v6554_v2 = vpop.f32.mrb[88].mxu0 }
 0x228   : > { %v6443_v53 = vpop.f32.mrb[89].mxu1  ;;  %v6555_v1 = vpop.f32.mrb[89].mxu0 }
 0x229   : > { %v6444_v9 = vadd.f32 %v6443_v53, %v6442_v6  ;;  %v6445_v33 = vpop.f32.mrb[90].mxu1  ;;  %v6556_v7 = vadd.f32 %v6555_v1, %v6554_v2  ;;  %v6557_v49 = vpop.f32.mrb[90].mxu0  ;;  %v7869_v2 = vld [vmem:[%s8430_s7 + $0x6a4] ss:$56 sps:$4 sm:$0xff]  }
 0x22a   : > { %v6446_v13 = vpop.f32.mrb[91].mxu1  ;;  %v6558_v45 = vpop.f32.mrb[91].mxu0  ;;  %v7873_v53 = vld [vmem:[%s8430_s7 + $0x6ac] ss:$56 sps:$4 sm:$0xff]  }
 0x22b   : > { %v3904_v54 = vadd.f32 %v6444_v9, %v9161_v48  ;;  %v6447_v62 = vadd.f32 %v6446_v13, %v6445_v33  ;;  %v6559_v26 = vadd.f32 %v6558_v45, %v6557_v49 }
 0x22c   : > { %4312 = vmatmul.mubr.bf16.gmra.mrb[196].mxu1 %v7850_v29  ;;  %4473 = vmatmul.mubr.bf16.gmra.mrb[196].mxu0 %v7853_v21 }
 0x22d   : > { %v3907_v60 = vadd.f32 %v6447_v62, %v9169_v23  ;;  %v9296_v37 = vadd.f32 %v6556_v7, %v3904_v54  ;;  %4319 = vmatprep.mubr.bf16.mxu1 %v7857_v8  ;;  %4480 = vmatprep.mubr.bf16.mxu0 %v7862_v30  ;;  %v7872_v62 = vld [vmem:[%s8430_s7 + $0x6a0] ss:$56 sps:$4 sm:$0xff]  }
 0x22f   : > { %v9298_v28 = vadd.f32 %v6559_v26, %v3907_v60  ;;  %v6448_v5 = vpop.f32.mrb[92].mxu1  ;;  %v6560_v40 = vpop.f32.mrb[92].mxu0  ;;  %v7875_v26 = vld [vmem:[%s8430_s7 + $0x6a8] ss:$56 sps:$4 sm:$0xff]  }
 0x230   : > { %v6449_v18 = vpop.f32.mrb[93].mxu1  ;;  %v6561_v39 = vpop.f32.mrb[93].mxu0 }
 0x231   : > { %v6450_v20 = vadd.f32 %v6449_v18, %v6448_v5  ;;  %v6451_v10 = vpop.f32.mrb[94].mxu1  ;;  %v6562_v14 = vadd.f32 %v6561_v39, %v6560_v40  ;;  %v6563_v6 = vpop.f32.mrb[94].mxu0  ;;  %v7881_v39 = vld [vmem:[%s8430_s7 + $0x24] ss:$56 sps:$4 sm:$0xff]  }
 0x232   : > { %v6452_v1 = vpop.f32.mrb[95].mxu1  ;;  %v6564_v29 = vpop.f32.mrb[95].mxu0 }
 0x233   : > { %v3912_v21 = vadd.f32 %v6450_v20, %v9156_v63  ;;  %v6453_v9 = vadd.f32 %v6452_v1, %v6451_v10  ;;  %v6565_v33 = vadd.f32 %v6564_v29, %v6563_v6 }
 0x234   : > { %4320 = vmatmul.mubr.bf16.gmra.mrb[200].mxu1 %v7860_v34  ;;  %4481 = vmatmul.mubr.bf16.gmra.mrb[200].mxu0 %v7865_v43  ;;  %v7886_v34 = vld [vmem:[%s8430_s7 + $0x2c] ss:$56 sps:$4 sm:$0xff]  }
 0x235   : > { %v3915_v7 = vadd.f32 %v6453_v9, %v9166_v16  ;;  %v9306_v49 = vadd.f32 %v6562_v14, %v3912_v21  ;;  %4327 = vmatprep.mubr.bf16.mxu1 %v7869_v2  ;;  %4488 = vmatprep.mubr.bf16.mxu0 %v7873_v53 }
 0x237   : > { %v9308_v8 = vadd.f32 %v6565_v33, %v3915_v7  ;;  %v6454_v30 = vpop.f32.mrb[96].mxu1  ;;  %v6566_v13 = vpop.f32.mrb[96].mxu0  ;;  %v7879_v7 = vld [vmem:[%s8430_s7 + $0x20] ss:$56 sps:$4 sm:$0xff]  }
 0x238   : > { %v6455_v45 = vpop.f32.mrb[97].mxu1  ;;  %v6567_v54 = vpop.f32.mrb[97].mxu0 }
 0x239   : > { %v6456_v60 = vadd.f32 %v6455_v45, %v6454_v30  ;;  %v6457_v5 = vpop.f32.mrb[98].mxu1  ;;  %v6568_v40 = vadd.f32 %v6567_v54, %v6566_v13  ;;  %v6569_v18 = vpop.f32.mrb[98].mxu0  ;;  %v7884_v30 = vld [vmem:[%s8430_s7 + $0x28] ss:$56 sps:$4 sm:$0xff]  }
 0x23a   : > { %v6458_v43 = vpop.f32.mrb[99].mxu1  ;;  %v6570_v20 = vpop.f32.mrb[99].mxu0 }
 0x23b   : > { %v3920_v10 = vadd.f32 %v6456_v60, %v9179_v3  ;;  %v6459_v14 = vadd.f32 %v6458_v43, %v6457_v5  ;;  %v6571_v6 = vadd.f32 %v6570_v20, %v6569_v18  ;;  %v7888_v60 = vld [vmem:[%s8430_s7 + $0x94] ss:$56 sps:$4 sm:$0xff]  }
 0x23c   : > { %4328 = vmatmul.mubr.bf16.gmra.mrb[204].mxu1 %v7872_v62  ;;  %4489 = vmatmul.mubr.bf16.gmra.mrb[204].mxu0 %v7875_v26  ;;  %v7887_v26 = vld [vmem:[%s9932_s2 + $0x300] sm:$0xff]   ;;  %v7891_v18 = vld [vmem:[%s8430_s7 + $0x9c] ss:$56 sps:$4 sm:$0xff]  }
 0x23d   : > { %v3923_v2 = vadd.f32 %v6459_v14, %v9187_v57  ;;  %v9316_v53 = vadd.f32 %v6568_v40, %v3920_v10  ;;  %4529 = vmatprep.mubr.bf16.mxu1 %v7881_v39  ;;  %4690 = vmatprep.mubr.bf16.mxu0 %v7886_v34  ;;  %v7897_v39 = vld [vmem:[%s9932_s2 + $0x348] sm:$0xff]  }
 0x23f   : > { %v9318_v1 = vadd.f32 %v6571_v6, %v3923_v2  ;;  %v6460_v29 = vpop.f32.mrb[100].mxu1  ;;  %v6572_v21 = vpop.f32.mrb[100].mxu0  ;;  %v7900_v6 = vld [vmem:[%s9932_s2 + $0x308] sm:$0xff]   ;;  %v7911_v2 = vld [vmem:[%s9932_s2 + $0x350] sm:$0xff]  }
 0x240   : > { %v6461_v9 = vpop.f32.mrb[101].mxu1  ;;  %v6573_v33 = vpop.f32.mrb[101].mxu0 }
 0x241   : > { %v6462_v13 = vadd.f32 %v6461_v9, %v6460_v29  ;;  %v6463_v45 = vpop.f32.mrb[102].mxu1  ;;  %v6574_v54 = vadd.f32 %v6573_v33, %v6572_v21  ;;  %v6575_v62 = vpop.f32.mrb[102].mxu0 }
 0x242   : > { %v6464_v5 = vpop.f32.mrb[103].mxu1  ;;  %v6576_v40 = vpop.f32.mrb[103].mxu0 }
 0x243   : > { %v3928_v34 = vadd.f32 %v6462_v13, %v9174_v32  ;;  %v6465_v43 = vadd.f32 %v6464_v5, %v6463_v45  ;;  %v6577_v20 = vadd.f32 %v6576_v40, %v6575_v62  ;;  %v7893_v13 = vld [vmem:[%s8430_s7 + $0x98] ss:$56 sps:$4 sm:$0xff]   ;;  %v7898_v5 = vld [vmem:[%s8430_s7 + $0x10c] ss:$56 sps:$4 sm:$0xff]  }
 0x244   : > { %4530 = vmatmul.mubr.bf16.vlgmr.msra.gmra.mrb[208].mxu1 %v7879_v7  ;;  %4691 = vmatmul.mubr.bf16.vlgmr.msra.gmra.mrb[208].mxu0 %v7884_v30  ;;  %v7890_v30 = vld [vmem:[%s8430_s7 + $0x90] ss:$56 sps:$4 sm:$0xff]  }
 0x245   : > { %v3931_v10 = vadd.f32 %v6465_v43, %v9184_v55  ;;  %v9332_v14 = vadd.f32 %v6574_v54, %v3928_v34  ;;  %7087 = vmatpush3.bf16.msra.mxu1 %v7887_v26  ;;  %4537 = vmatprep.mubr.bf16.mxu1 %v7888_v60  ;;  %v7894_v60 = vld [vmem:[%s8430_s7 + $0x104] ss:$56 sps:$4 sm:$0xff]   ;;  %v7918_v32 = vld [vmem:[%s8430_s7 + $0x250] ss:$56 sps:$4 sm:$0xff]  }
 0x246   : > { %4698 = vmatprep.mubr.bf16.mxu0 %v7891_v18  ;;  %7088 = vmatprep.subr.bf16.mxu1 %v7897_v39  ;;  %v7914_v39 = vld [vmem:[%s9932_s2 + $0x310] sm:$0xff]  }
 0x247   : > { %v9340_v29 = vadd.f32 %v6577_v20, %v3931_v10  ;;  %v6466_v21 = vpop.f32.mrb[104].mxu1  ;;  %v6578_v9 = vpop.f32.mrb[104].mxu0  ;;  %v7925_v10 = vld [vmem:[%s9932_s2 + $0x358] sm:$0xff]  }
 0x248   : > { %v6467_v33 = vpop.f32.mrb[105].mxu1  ;;  %v6579_v7 = vpop.f32.mrb[105].mxu0 }
 0x249   : > { %v6468_v45 = vadd.f32 %v6467_v33, %v6466_v21  ;;  %v6469_v54 = vpop.f32.mrb[106].mxu1  ;;  %v6580_v62 = vadd.f32 %v6579_v7, %v6578_v9  ;;  %v6581_v26 = vpop.f32.mrb[106].mxu0  ;;  %7089 = vmatpush3.bf16.msra.mxu1 %v7900_v6 }
 0x24a   : > { %v6470_v40 = vpop.f32.mrb[107].mxu1  ;;  %v6582_v18 = vpop.f32.mrb[107].mxu0  ;;  %7090 = vmatprep.subr.bf16.mxu1 %v7911_v2  ;;  %v7928_v2 = vld [vmem:[%s9932_s2 + $0x318] sm:$0xff]  }
 0x24b   : > { %v3936_v34 = vadd.f32 %v6468_v45, %v9199_v4  ;;  %v6471_v43 = vadd.f32 %v6470_v40, %v6469_v54  ;;  %v6583_v20 = vadd.f32 %v6582_v18, %v6581_v26  ;;  %v7896_v54 = vld [vmem:[%s8430_s7 + $0x100] ss:$56 sps:$4 sm:$0xff]   ;;  %v7902_v18 = vld [vmem:[%s8430_s7 + $0x174] ss:$56 sps:$4 sm:$0xff]  }
 0x24c   : > { %4538 = vmatmul.mubr.bf16.gmra.mrb[212].mxu1 %v7890_v30  ;;  %4699 = vmatmul.mubr.bf16.gmra.mrb[212].mxu0 %v7893_v13  ;;  %v7939_v30 = vld [vmem:[%s9932_s2 + $0x360] sm:$0xff]  }
 0x24d   : > { %v3939_v6 = vadd.f32 %v6471_v43, %v9207_v50  ;;  %v9354_v21 = vadd.f32 %v6580_v62, %v3936_v34  ;;  %4545 = vmatprep.mubr.bf16.mxu1 %v7894_v60  ;;  %4706 = vmatprep.mubr.bf16.mxu0 %v7898_v5  ;;  %v7901_v62 = vld [vmem:[%s8430_s7 + $0x108] ss:$56 sps:$4 sm:$0xff]   ;;  %v7989_v50 = vld [vmem:[%s8430_s7 + $0x6b8] ss:$56 sps:$4 sm:$0xff]  }
 0x24e   : > { %7091 = vmatpush3.bf16.msra.mxu1 %v7914_v39  ;;  %v7905_v39 = vld [vmem:[%s8430_s7 + $0x17c] ss:$56 sps:$4 sm:$0xff]  }
 0x24f   : > { %v9359_v9 = vadd.f32 %v6583_v20, %v3939_v6  ;;  %v6472_v33 = vpop.f32.mrb[108].mxu1  ;;  %v6584_v7 = vpop.f32.mrb[108].mxu0  ;;  %7092 = vmatprep.subr.bf16.mxu1 %v7925_v10  ;;  %v7942_v20 = vld [vmem:[%s9932_s2 + $0x320] sm:$0xff]  }
 0x250   : > { %v6473_v13 = vpop.f32.mrb[109].mxu1  ;;  %v6585_v45 = vpop.f32.mrb[109].mxu0 }
 0x251   : > { %v6474_v26 = vadd.f32 %v6473_v13, %v6472_v33  ;;  %v6475_v60 = vpop.f32.mrb[110].mxu1  ;;  %v6586_v5 = vadd.f32 %v6585_v45, %v6584_v7  ;;  %v6587_v40 = vpop.f32.mrb[110].mxu0  ;;  %v7953_v33 = vld [vmem:[%s9932_s2 + $0x368] sm:$0xff]  }
 0x252   : > { %v6476_v34 = vpop.f32.mrb[111].mxu1  ;;  %v6588_v43 = vpop.f32.mrb[111].mxu0  ;;  %7093 = vmatpush3.bf16.msra.mxu1 %v7928_v2 }
 0x253   : > { %v3944_v10 = vadd.f32 %v6474_v26, %v9194_v38  ;;  %v6477_v6 = vadd.f32 %v6476_v34, %v6475_v60  ;;  %v6589_v4 = vadd.f32 %v6588_v43, %v6587_v40  ;;  %7094 = vmatprep.subr.bf16.mxu1 %v7939_v30  ;;  %v7956_v30 = vld [vmem:[%s9932_s2 + $0x328] sm:$0xff]   ;;  %v7907_v40 = vld [vmem:[%s8430_s7 + $0x178] ss:$56 sps:$4 sm:$0xff]  }
 0x254   : > { %4546 = vmatmul.mubr.bf16.gmra.mrb[216].mxu1 %v7896_v54  ;;  %4707 = vmatmul.mubr.bf16.gmra.mrb[216].mxu0 %v7901_v62  ;;  %v7967_v54 = vld [vmem:[%s9932_s2 + $0x370] sm:$0xff]  }
 0x255   : > { %v3947_v7 = vadd.f32 %v6477_v6, %v9204_v15  ;;  %v9376_v2 = vadd.f32 %v6586_v5, %v3944_v10  ;;  %4553 = vmatprep.mubr.bf16.mxu1 %v7902_v18  ;;  %4714 = vmatprep.mubr.bf16.mxu0 %v7905_v39  ;;  %v7904_v5 = vld [vmem:[%s8430_s7 + $0x170] ss:$56 sps:$4 sm:$0xff]   ;;  %v7912_v10 = vld [vmem:[%s8430_s7 + $0x1ec] ss:$56 sps:$4 sm:$0xff]  }
 0x256   : > { %7095 = vmatpush3.bf16.msra.mxu1 %v7942_v20  ;;  %v7908_v20 = vld [vmem:[%s8430_s7 + $0x1e4] ss:$56 sps:$4 sm:$0xff]  }
 0x257   : > { %v9381_v13 = vadd.f32 %v6589_v4, %v3947_v7  ;;  %v6478_v45 = vpop.f32.mrb[112].mxu1  ;;  %v6590_v26 = vpop.f32.mrb[112].mxu0  ;;  %7096 = vmatprep.subr.bf16.mxu1 %v7953_v33  ;;  %v7971_v33 = vld [vmem:[%s9932_s2 + $0x330] sm:$0xff]  }
 0x258   : > { %v6479_v62 = vpop.f32.mrb[113].mxu1  ;;  %v6591_v60 = vpop.f32.mrb[113].mxu0 }
 0x259   : > { %v6480_v18 = vadd.f32 %v6479_v62, %v6478_v45  ;;  %v6481_v39 = vpop.f32.mrb[114].mxu1  ;;  %v6592_v34 = vadd.f32 %v6591_v60, %v6590_v26  ;;  %v6593_v43 = vpop.f32.mrb[114].mxu0  ;;  %v7981_v45 = vld [vmem:[%s9932_s2 + $0x378] sm:$0xff]  }
 0x25a   : > { %v6482_v6 = vpop.f32.mrb[115].mxu1  ;;  %v6594_v4 = vpop.f32.mrb[115].mxu0  ;;  %7097 = vmatpush3.bf16.msra.mxu1 %v7956_v30 }
 0x25b   : > { %v3952_v7 = vadd.f32 %v6480_v18, %v9216_v47  ;;  %v6483_v38 = vadd.f32 %v6482_v6, %v6481_v39  ;;  %v6595_v15 = vadd.f32 %v6594_v4, %v6593_v43  ;;  %7098 = vmatprep.subr.bf16.mxu1 %v7967_v54  ;;  %v7985_v54 = vld [vmem:[%s9932_s2 + $0x338] sm:$0xff]  }
 0x25c   : > { %4554 = vmatmul.mubr.bf16.gmra.mrb[220].mxu1 %v7904_v5  ;;  %4715 = vmatmul.mubr.bf16.gmra.mrb[220].mxu0 %v7907_v40  ;;  %v7910_v39 = vld [vmem:[%s8430_s7 + $0x1e0] ss:$56 sps:$4 sm:$0xff]   ;;  %v7919_v4 = vld [vmem:[%s8430_s7 + $0x25c] ss:$56 sps:$4 sm:$0xff]  }
 0x25d   : > { %v3955_v26 = vadd.f32 %v6483_v38, %v9223_v56  ;;  %v9398_v30 = vadd.f32 %v6592_v34, %v3952_v7  ;;  %4561 = vmatprep.mubr.bf16.mxu1 %v7908_v20  ;;  %4722 = vmatprep.mubr.bf16.mxu0 %v7912_v10  ;;  %v7915_v38 = vld [vmem:[%s8430_s7 + $0x1e8] ss:$56 sps:$4 sm:$0xff]   ;;  %v7916_v10 = vld [vmem:[%s8430_s7 + $0x254] ss:$56 sps:$4 sm:$0xff]  }
 0x25e   : > { %7099 = vmatpush3.bf16.msra.mxu1 %v7971_v33 }
 0x25f   : > { %v9403_v62 = vadd.f32 %v6595_v15, %v3955_v26  ;;  %v6484_v60 = vpop.f32.mrb[116].mxu1  ;;  %v6596_v18 = vpop.f32.mrb[116].mxu0  ;;  %7100 = vmatprep.subr.bf16.mxu1 %v7981_v45 }
 0x260   : > { %v6485_v5 = vpop.f32.mrb[117].mxu1  ;;  %v6597_v40 = vpop.f32.mrb[117].mxu0 }
 0x261   : > { %v6486_v34 = vadd.f32 %v6485_v5, %v6484_v60  ;;  %v6487_v43 = vpop.f32.mrb[118].mxu1  ;;  %v6598_v20 = vadd.f32 %v6597_v40, %v6596_v18  ;;  %v6599_v6 = vpop.f32.mrb[118].mxu0 }
 0x262   : > { %v6488_v33 = vpop.f32.mrb[119].mxu1  ;;  %v6600_v7 = vpop.f32.mrb[119].mxu0  ;;  %7101 = vmatpush3.bf16.msra.mxu1 %v7985_v54 }
 0x263   : > { %v3960_v15 = vadd.f32 %v6486_v34, %v9211_v0  ;;  %v6489_v26 = vadd.f32 %v6488_v33, %v6487_v43  ;;  %v6601_v47 = vadd.f32 %v6600_v7, %v6599_v6  ;;  %v7921_v34 = vld [vmem:[%s8430_s7 + $0x258] ss:$56 sps:$4 sm:$0xff]   ;;  %v7922_v33 = vld [vmem:[%s8430_s7 + $0x2c4] ss:$56 sps:$4 sm:$0xff]  }
 0x264   : > { %4562 = vmatmul.mubr.bf16.gmra.mrb[224].mxu1 %v7910_v39  ;;  %4723 = vmatmul.mubr.bf16.gmra.mrb[224].mxu0 %v7915_v38  ;;  %v7926_v7 = vld [vmem:[%s8430_s7 + $0x2cc] ss:$56 sps:$4 sm:$0xff]  }
 0x265   : > { %v3963_v45 = vadd.f32 %v6489_v26, %v9220_v36  ;;  %v9411_v60 = vadd.f32 %v6598_v20, %v3960_v15  ;;  %4569 = vmatprep.mubr.bf16.mxu1 %v7916_v10  ;;  %4730 = vmatprep.mubr.bf16.mxu0 %v7919_v4  ;;  %v7924_v36 = vld [vmem:[%s8430_s7 + $0x2c0] ss:$56 sps:$4 sm:$0xff]  }
 0x267   : > { %v9413_v18 = vadd.f32 %v6601_v47, %v3963_v45  ;;  %v6490_v5 = vpop.f32.mrb[120].mxu1  ;;  %v6602_v40 = vpop.f32.mrb[120].mxu0 }
 0x268   : > { %v6491_v54 = vpop.f32.mrb[121].mxu1  ;;  %v6603_v56 = vpop.f32.mrb[121].mxu0 }
 0x269   : > { %v6492_v43 = vadd.f32 %v6491_v54, %v6490_v5  ;;  %v6493_v6 = vpop.f32.mrb[122].mxu1  ;;  %v6604_v39 = vadd.f32 %v6603_v56, %v6602_v40  ;;  %v6605_v38 = vpop.f32.mrb[122].mxu0 }
 0x26a   : > { %v6494_v26 = vpop.f32.mrb[123].mxu1  ;;  %v6606_v20 = vpop.f32.mrb[123].mxu0 }
 0x26b   : > { %v3968_v10 = vadd.f32 %v6492_v43, %v9231_v12  ;;  %v6495_v47 = vadd.f32 %v6494_v26, %v6493_v6  ;;  %v6607_v4 = vadd.f32 %v6606_v20, %v6605_v38  ;;  %v7929_v43 = vld [vmem:[%s8430_s7 + $0x2c8] ss:$56 sps:$4 sm:$0xff]   ;;  %v7930_v26 = vld [vmem:[%s8430_s7 + $0x334] ss:$56 sps:$4 sm:$0xff]  }
 0x26c   : > { %4570 = vmatmul.mubr.bf16.gmra.mrb[228].mxu1 %v7918_v32  ;;  %4731 = vmatmul.mubr.bf16.gmra.mrb[228].mxu0 %v7921_v34  ;;  %v7933_v20 = vld [vmem:[%s8430_s7 + $0x33c] ss:$56 sps:$4 sm:$0xff]  }
 0x26d   : > { %v3971_v15 = vadd.f32 %v6495_v47, %v9238_v51  ;;  %v9421_v45 = vadd.f32 %v6604_v39, %v3968_v10  ;;  %4577 = vmatprep.mubr.bf16.mxu1 %v7922_v33  ;;  %4738 = vmatprep.mubr.bf16.mxu0 %v7926_v7  ;;  %v7932_v51 = vld [vmem:[%s8430_s7 + $0x330] ss:$56 sps:$4 sm:$0xff]  }
 0x26f   : > { %v9423_v56 = vadd.f32 %v6607_v4, %v3971_v15  ;;  %v6496_v5 = vpop.f32.mrb[124].mxu1  ;;  %v6608_v40 = vpop.f32.mrb[124].mxu0 }
 0x270   : > { %v6497_v54 = vpop.f32.mrb[125].mxu1  ;;  %v6609_v0 = vpop.f32.mrb[125].mxu0 }
 0x271   : > { %v6498_v6 = vadd.f32 %v6497_v54, %v6496_v5  ;;  %v6499_v38 = vpop.f32.mrb[126].mxu1  ;;  %v6610_v32 = vadd.f32 %v6609_v0, %v6608_v40  ;;  %v6611_v34 = vpop.f32.mrb[126].mxu0 }
 0x272   : > { %v6500_v47 = vpop.f32.mrb[127].mxu1  ;;  %v6612_v39 = vpop.f32.mrb[127].mxu0 }
 0x273   : > { %v3976_v33 = vadd.f32 %v6498_v6, %v9227_v17  ;;  %v6501_v7 = vadd.f32 %v6500_v47, %v6499_v38  ;;  %v6613_v10 = vadd.f32 %v6612_v39, %v6611_v34  ;;  %v7935_v6 = vld [vmem:[%s8430_s7 + $0x338] ss:$56 sps:$4 sm:$0xff]   ;;  %v7936_v47 = vld [vmem:[%s8430_s7 + $0x3a4] ss:$56 sps:$4 sm:$0xff]  }
 0x274   : > { %4578 = vmatmul.mubr.bf16.gmra.mrb[232].mxu1 %v7924_v36  ;;  %4739 = vmatmul.mubr.bf16.gmra.mrb[232].mxu0 %v7929_v43  ;;  %v7940_v39 = vld [vmem:[%s8430_s7 + $0x3ac] ss:$56 sps:$4 sm:$0xff]  }
 0x275   : > { %v3979_v4 = vadd.f32 %v6501_v7, %v9235_v35  ;;  %v9431_v15 = vadd.f32 %v6610_v32, %v3976_v33  ;;  %4585 = vmatprep.mubr.bf16.mxu1 %v7930_v26  ;;  %4746 = vmatprep.mubr.bf16.mxu0 %v7933_v20  ;;  %v7938_v35 = vld [vmem:[%s8430_s7 + $0x3a0] ss:$56 sps:$4 sm:$0xff]  }
 0x277   : > { %v9433_v0 = vadd.f32 %v6613_v10, %v3979_v4  ;;  %v6502_v5 = vpop.f32.mrb[128].mxu1  ;;  %v6614_v40 = vpop.f32.mrb[128].mxu0 }
 0x278   : > { %v6503_v54 = vpop.f32.mrb[129].mxu1  ;;  %v6615_v12 = vpop.f32.mrb[129].mxu0 }
 0x279   : > { %v6504_v38 = vadd.f32 %v6503_v54, %v6502_v5  ;;  %v6505_v34 = vpop.f32.mrb[130].mxu1  ;;  %v6616_v36 = vadd.f32 %v6615_v12, %v6614_v40  ;;  %v6617_v43 = vpop.f32.mrb[130].mxu0 }
 0x27a   : > { %v6506_v7 = vpop.f32.mrb[131].mxu1  ;;  %v6618_v32 = vpop.f32.mrb[131].mxu0 }
 0x27b   : > { %v3984_v26 = vadd.f32 %v6504_v38, %v9246_v41  ;;  %v6507_v20 = vadd.f32 %v6506_v7, %v6505_v34  ;;  %v6619_v33 = vadd.f32 %v6618_v32, %v6617_v43  ;;  %v7943_v38 = vld [vmem:[%s8430_s7 + $0x3a8] ss:$56 sps:$4 sm:$0xff]   ;;  %v7944_v7 = vld [vmem:[%s8430_s7 + $0x414] ss:$56 sps:$4 sm:$0xff]  }
 0x27c   : > { %4586 = vmatmul.mubr.bf16.gmra.mrb[236].mxu1 %v7932_v51  ;;  %4747 = vmatmul.mubr.bf16.gmra.mrb[236].mxu0 %v7935_v6  ;;  %v7947_v32 = vld [vmem:[%s8430_s7 + $0x41c] ss:$56 sps:$4 sm:$0xff]  }
 0x27d   : > { %v3987_v10 = vadd.f32 %v6507_v20, %v9252_v24  ;;  %v9441_v4 = vadd.f32 %v6616_v36, %v3984_v26  ;;  %4593 = vmatprep.mubr.bf16.mxu1 %v7936_v47  ;;  %4754 = vmatprep.mubr.bf16.mxu0 %v7940_v39  ;;  %v7946_v24 = vld [vmem:[%s8430_s7 + $0x410] ss:$56 sps:$4 sm:$0xff]  }
 0x27f   : > { %v9443_v12 = vadd.f32 %v6619_v33, %v3987_v10  ;;  %v6508_v5 = vpop.f32.mrb[132].mxu1  ;;  %v6620_v40 = vpop.f32.mrb[132].mxu0 }
 0x280   : > { %v6509_v54 = vpop.f32.mrb[133].mxu1  ;;  %v6621_v17 = vpop.f32.mrb[133].mxu0 }
 0x281   : > { %v6510_v34 = vadd.f32 %v6509_v54, %v6508_v5  ;;  %v6511_v43 = vpop.f32.mrb[134].mxu1  ;;  %v6622_v51 = vadd.f32 %v6621_v17, %v6620_v40  ;;  %v6623_v6 = vpop.f32.mrb[134].mxu0 }
 0x282   : > { %v6512_v20 = vpop.f32.mrb[135].mxu1  ;;  %v6624_v36 = vpop.f32.mrb[135].mxu0 }
 0x283   : > { %v3992_v47 = vadd.f32 %v6510_v34, %v9242_v25  ;;  %v6513_v39 = vadd.f32 %v6512_v20, %v6511_v43  ;;  %v6625_v26 = vadd.f32 %v6624_v36, %v6623_v6  ;;  %v7949_v34 = vld [vmem:[%s8430_s7 + $0x418] ss:$56 sps:$4 sm:$0xff]   ;;  %v7950_v20 = vld [vmem:[%s8430_s7 + $0x484] ss:$56 sps:$4 sm:$0xff]  }
 0x284   : > { %4594 = vmatmul.mubr.bf16.gmra.mrb[240].mxu1 %v7938_v35  ;;  %4755 = vmatmul.mubr.bf16.gmra.mrb[240].mxu0 %v7943_v38  ;;  %v7954_v36 = vld [vmem:[%s8430_s7 + $0x48c] ss:$56 sps:$4 sm:$0xff]  }
 0x285   : > { %v3995_v33 = vadd.f32 %v6513_v39, %v9250_v59  ;;  %v9451_v10 = vadd.f32 %v6622_v51, %v3992_v47  ;;  %4601 = vmatprep.mubr.bf16.mxu1 %v7944_v7  ;;  %4762 = vmatprep.mubr.bf16.mxu0 %v7947_v32  ;;  %v7952_v59 = vld [vmem:[%s8430_s7 + $0x480] ss:$56 sps:$4 sm:$0xff]  }
 0x287   : > { %v9453_v17 = vadd.f32 %v6625_v26, %v3995_v33  ;;  %v6514_v5 = vpop.f32.mrb[136].mxu1  ;;  %v6626_v40 = vpop.f32.mrb[136].mxu0 }
 0x288   : > { %v6515_v54 = vpop.f32.mrb[137].mxu1  ;;  %v6627_v41 = vpop.f32.mrb[137].mxu0 }
 0x289   : > { %v6516_v43 = vadd.f32 %v6515_v54, %v6514_v5  ;;  %v6517_v6 = vpop.f32.mrb[138].mxu1  ;;  %v6628_v35 = vadd.f32 %v6627_v41, %v6626_v40  ;;  %v6629_v38 = vpop.f32.mrb[138].mxu0 }
 0x28a   : > { %v6518_v39 = vpop.f32.mrb[139].mxu1  ;;  %v6630_v51 = vpop.f32.mrb[139].mxu0 }
 0x28b   : > { %v4000_v7 = vadd.f32 %v6516_v43, %v9258_v19  ;;  %v6519_v32 = vadd.f32 %v6518_v39, %v6517_v6  ;;  %v6631_v47 = vadd.f32 %v6630_v51, %v6629_v38  ;;  %v7957_v43 = vld [vmem:[%s8430_s7 + $0x488] ss:$56 sps:$4 sm:$0xff]   ;;  %v7958_v39 = vld [vmem:[%s8430_s7 + $0x4f4] ss:$56 sps:$4 sm:$0xff]  }
 0x28c   : > { %4602 = vmatmul.mubr.bf16.gmra.mrb[244].mxu1 %v7946_v24  ;;  %4763 = vmatmul.mubr.bf16.gmra.mrb[244].mxu0 %v7949_v34  ;;  %v7961_v51 = vld [vmem:[%s8430_s7 + $0x4fc] ss:$56 sps:$4 sm:$0xff]  }
 0x28d   : > { %v4003_v26 = vadd.f32 %v6519_v32, %v9263_v58  ;;  %v9461_v33 = vadd.f32 %v6628_v35, %v4000_v7  ;;  %4609 = vmatprep.mubr.bf16.mxu1 %v7950_v20  ;;  %4770 = vmatprep.mubr.bf16.mxu0 %v7954_v36  ;;  %v7960_v58 = vld [vmem:[%s8430_s7 + $0x4f0] ss:$56 sps:$4 sm:$0xff]  }
 0x28f   : > { %v9463_v41 = vadd.f32 %v6631_v47, %v4003_v26  ;;  %v6520_v5 = vpop.f32.mrb[140].mxu1  ;;  %v6632_v40 = vpop.f32.mrb[140].mxu0 }
 0x290   : > { %v6521_v54 = vpop.f32.mrb[141].mxu1  ;;  %v6633_v25 = vpop.f32.mrb[141].mxu0 }
 0x291   : > { %v6522_v6 = vadd.f32 %v6521_v54, %v6520_v5  ;;  %v6523_v38 = vpop.f32.mrb[142].mxu1  ;;  %v6634_v24 = vadd.f32 %v6633_v25, %v6632_v40  ;;  %v6635_v34 = vpop.f32.mrb[142].mxu0 }
 0x292   : > { %v6524_v32 = vpop.f32.mrb[143].mxu1  ;;  %v6636_v35 = vpop.f32.mrb[143].mxu0 }
 0x293   : > { %v4008_v20 = vadd.f32 %v6522_v6, %v9266_v31  ;;  %v6525_v36 = vadd.f32 %v6524_v32, %v6523_v38  ;;  %v6637_v7 = vadd.f32 %v6636_v35, %v6635_v34  ;;  %v7963_v6 = vld [vmem:[%s8430_s7 + $0x4f8] ss:$56 sps:$4 sm:$0xff]   ;;  %v7966_v32 = vld [vmem:[%s8430_s7 + $0x564] ss:$56 sps:$4 sm:$0xff]  }
 0x294   : > { %4610 = vmatmul.mubr.bf16.gmra.mrb[248].mxu1 %v7952_v59  ;;  %4771 = vmatmul.mubr.bf16.gmra.mrb[248].mxu0 %v7957_v43  ;;  %v7970_v35 = vld [vmem:[%s8430_s7 + $0x56c] ss:$56 sps:$4 sm:$0xff]  }
 0x295   : > { %v4011_v47 = vadd.f32 %v6525_v36, %v9268_v27  ;;  %v9471_v26 = vadd.f32 %v6634_v24, %v4008_v20  ;;  %4617 = vmatprep.mubr.bf16.mxu1 %v7958_v39  ;;  %4778 = vmatprep.mubr.bf16.mxu0 %v7961_v51  ;;  %v7964_v27 = vld [vmem:[%s8430_s7 + $0x560] ss:$56 sps:$4 sm:$0xff]  }
 0x297   : > { %v9473_v25 = vadd.f32 %v6637_v7, %v4011_v47  ;;  %v6654_v5 = vpop.f32.mrb[144].mxu1  ;;  %v6766_v40 = vpop.f32.mrb[144].mxu0 }
 0x298   : > { %v6655_v54 = vpop.f32.mrb[145].mxu1  ;;  %v6767_v19 = vpop.f32.mrb[145].mxu0 }
 0x299   : > { %v6656_v38 = vadd.f32 %v6655_v54, %v6654_v5  ;;  %v6657_v34 = vpop.f32.mrb[146].mxu1  ;;  %v6768_v59 = vadd.f32 %v6767_v19, %v6766_v40  ;;  %v6769_v43 = vpop.f32.mrb[146].mxu0 }
 0x29a   : > { %v6658_v36 = vpop.f32.mrb[147].mxu1  ;;  %v6770_v24 = vpop.f32.mrb[147].mxu0 }
 0x29b   : > { %v4210_v39 = vadd.f32 %v6656_v38, %v9276_v22  ;;  %v6659_v51 = vadd.f32 %v6658_v36, %v6657_v34  ;;  %v6771_v20 = vadd.f32 %v6770_v24, %v6769_v43  ;;  %v7968_v22 = vld [vmem:[%s8430_s7 + $0x568] ss:$56 sps:$4 sm:$0xff]   ;;  %v7974_v43 = vld [vmem:[%s8430_s7 + $0x5d4] ss:$56 sps:$4 sm:$0xff]  }
 0x29c   : > { %4618 = vmatmul.mubr.bf16.gmra.mrb[252].mxu1 %v7960_v58  ;;  %4779 = vmatmul.mubr.bf16.gmra.mrb[252].mxu0 %v7963_v6  ;;  %v7977_v36 = vld [vmem:[%s8430_s7 + $0x5dc] ss:$56 sps:$4 sm:$0xff]  }
 0x29d   : > { %v4213_v7 = vadd.f32 %v6659_v51, %v9278_v52  ;;  %v9481_v47 = vadd.f32 %v6768_v59, %v4210_v39  ;;  %4625 = vmatprep.mubr.bf16.mxu1 %v7966_v32  ;;  %4786 = vmatprep.mubr.bf16.mxu0 %v7970_v35 }
 0x29f   : > { %v9483_v19 = vadd.f32 %v6771_v20, %v4213_v7  ;;  %v6660_v5 = vpop.f32.mrb[148].mxu1  ;;  %v6772_v40 = vpop.f32.mrb[148].mxu0 }
 0x2a0   : > { %v6661_v54 = vpop.f32.mrb[149].mxu1  ;;  %v6773_v31 = vpop.f32.mrb[149].mxu0 }
 0x2a1   : > { %v6662_v38 = vadd.f32 %v6661_v54, %v6660_v5  ;;  %v6663_v34 = vpop.f32.mrb[150].mxu1  ;;  %v6774_v58 = vadd.f32 %v6773_v31, %v6772_v40  ;;  %v6775_v6 = vpop.f32.mrb[150].mxu0  ;;  %v7972_v54 = vld [vmem:[%s8430_s7 + $0x5d0] ss:$56 sps:$4 sm:$0xff]  }
 0x2a2   : > { %v6664_v52 = vpop.f32.mrb[151].mxu1  ;;  %v6776_v59 = vpop.f32.mrb[151].mxu0 }
 0x2a3   : > { %v4218_v32 = vadd.f32 %v6662_v38, %v9286_v46  ;;  %v6665_v35 = vadd.f32 %v6664_v52, %v6663_v34  ;;  %v6777_v24 = vadd.f32 %v6776_v59, %v6775_v6  ;;  %v7975_v46 = vld [vmem:[%s8430_s7 + $0x5d8] ss:$56 sps:$4 sm:$0xff]   ;;  %v7980_v6 = vld [vmem:[%s8430_s7 + $0x644] ss:$56 sps:$4 sm:$0xff]  }
 0x2a4   : > { %4626 = vmatmul.mubr.bf16.gmra.mrb[0].mxu1 %v7964_v27  ;;  %4787 = vmatmul.mubr.bf16.gmra.mrb[0].mxu0 %v7968_v22  ;;  %v7984_v52 = vld [vmem:[%s8430_s7 + $0x64c] ss:$56 sps:$4 sm:$0xff]  }
 0x2a5   : > { %v4221_v39 = vadd.f32 %v6665_v35, %v9288_v44  ;;  %v9491_v51 = vadd.f32 %v6774_v58, %v4218_v32  ;;  %4633 = vmatprep.mubr.bf16.mxu1 %v7974_v43  ;;  %4794 = vmatprep.mubr.bf16.mxu0 %v7977_v36 }
 0x2a7   : > { %v9493_v31 = vadd.f32 %v6777_v24, %v4221_v39  ;;  %v6666_v20 = vpop.f32.mrb[152].mxu1  ;;  %v6778_v7 = vpop.f32.mrb[152].mxu0 }
 0x2a8   : > { %v6667_v5 = vpop.f32.mrb[153].mxu1  ;;  %v6779_v40 = vpop.f32.mrb[153].mxu0 }
 0x2a9   : > { %v6668_v38 = vadd.f32 %v6667_v5, %v6666_v20  ;;  %v6669_v34 = vpop.f32.mrb[154].mxu1  ;;  %v6780_v27 = vadd.f32 %v6779_v40, %v6778_v7  ;;  %v6781_v22 = vpop.f32.mrb[154].mxu0  ;;  %v7978_v40 = vld [vmem:[%s8430_s7 + $0x640] ss:$56 sps:$4 sm:$0xff]  }
 0x2aa   : > { %v6670_v44 = vpop.f32.mrb[155].mxu1  ;;  %v6782_v58 = vpop.f32.mrb[155].mxu0 }
 0x2ab   : > { %v4226_v43 = vadd.f32 %v6668_v38, %v9296_v37  ;;  %v6671_v36 = vadd.f32 %v6670_v44, %v6669_v34  ;;  %v6783_v59 = vadd.f32 %v6782_v58, %v6781_v22  ;;  %v7982_v37 = vld [vmem:[%s8430_s7 + $0x648] ss:$56 sps:$4 sm:$0xff]   ;;  %v7988_v22 = vld [vmem:[%s8430_s7 + $0x6b4] ss:$56 sps:$4 sm:$0xff]  }
 0x2ac   : > { %4634 = vmatmul.mubr.bf16.gmra.mrb[4].mxu1 %v7972_v54  ;;  %4795 = vmatmul.mubr.bf16.gmra.mrb[4].mxu0 %v7975_v46  ;;  %v7991_v44 = vld [vmem:[%s8430_s7 + $0x6bc] ss:$56 sps:$4 sm:$0xff]  }
 0x2ad   : > { %v4229_v32 = vadd.f32 %v6671_v36, %v9298_v28  ;;  %v9501_v35 = vadd.f32 %v6780_v27, %v4226_v43  ;;  %4641 = vmatprep.mubr.bf16.mxu1 %v7980_v6  ;;  %4802 = vmatprep.mubr.bf16.mxu0 %v7984_v52 }
 0x2af   : > { %v9503_v24 = vadd.f32 %v6783_v59, %v4229_v32  ;;  %v6672_v39 = vpop.f32.mrb[156].mxu1  ;;  %v6784_v20 = vpop.f32.mrb[156].mxu0 }
 0x2b0   : > { %v6673_v7 = vpop.f32.mrb[157].mxu1  ;;  %v6785_v5 = vpop.f32.mrb[157].mxu0 }
 0x2b1   : > { %v6674_v38 = vadd.f32 %v6673_v7, %v6672_v39  ;;  %v6675_v34 = vpop.f32.mrb[158].mxu1  ;;  %v6786_v54 = vadd.f32 %v6785_v5, %v6784_v20  ;;  %v6787_v46 = vpop.f32.mrb[158].mxu0  ;;  %v7986_v5 = vld [vmem:[%s8430_s7 + $0x6b0] ss:$56 sps:$4 sm:$0xff]  }
 0x2b2   : > { %v6676_v28 = vpop.f32.mrb[159].mxu1  ;;  %v6788_v27 = vpop.f32.mrb[159].mxu0 }
 0x2b3   : > { %v4234_v6 = vadd.f32 %v6674_v38, %v9306_v49  ;;  %v6677_v52 = vadd.f32 %v6676_v28, %v6675_v34  ;;  %v6789_v58 = vadd.f32 %v6788_v27, %v6787_v46 }
 0x2b4   : > { %4642 = vmatmul.mubr.bf16.gmra.mrb[8].mxu1 %v7978_v40  ;;  %4803 = vmatmul.mubr.bf16.gmra.mrb[8].mxu0 %v7982_v37  ;;  %v7994_v37 = vld [vmem:[%s8430_s7 + $0x34] ss:$56 sps:$4 sm:$0xff]  }
 0x2b5   : > { %v4237_v43 = vadd.f32 %v6677_v52, %v9308_v8  ;;  %v9511_v36 = vadd.f32 %v6786_v54, %v4234_v6  ;;  %4649 = vmatprep.mubr.bf16.mxu1 %v7988_v22  ;;  %4810 = vmatprep.mubr.bf16.mxu0 %v7991_v44 }
 0x2b7   : > { %v9513_v59 = vadd.f32 %v6789_v58, %v4237_v43  ;;  %v6678_v32 = vpop.f32.mrb[160].mxu1  ;;  %v6790_v39 = vpop.f32.mrb[160].mxu0 }
 0x2b8   : > { %v6679_v20 = vpop.f32.mrb[161].mxu1  ;;  %v6791_v7 = vpop.f32.mrb[161].mxu0 }
 0x2b9   : > { %v6680_v49 = vadd.f32 %v6679_v20, %v6678_v32  ;;  %v6681_v38 = vpop.f32.mrb[162].mxu1  ;;  %v6792_v34 = vadd.f32 %v6791_v7, %v6790_v39  ;;  %v6793_v40 = vpop.f32.mrb[162].mxu0  ;;  %v7992_v39 = vld [vmem:[%s8430_s7 + $0x30] ss:$56 sps:$4 sm:$0xff]  }
 0x2ba   : > { %v6682_v46 = vpop.f32.mrb[163].mxu1  ;;  %v6794_v8 = vpop.f32.mrb[163].mxu0 }
 0x2bb   : > { %v4242_v54 = vadd.f32 %v6680_v49, %v9316_v53  ;;  %v6683_v22 = vadd.f32 %v6682_v46, %v6681_v38  ;;  %v6795_v44 = vadd.f32 %v6794_v8, %v6793_v40  ;;  %v7997_v38 = vld [vmem:[%s8430_s7 + $0xa4] ss:$56 sps:$4 sm:$0xff]  }
 0x2bc   : > { %4650 = vmatmul.mubr.bf16.gmra.mrb[12].mxu1 %v7986_v5  ;;  %4811 = vmatmul.mubr.bf16.gmra.mrb[12].mxu0 %v7989_v50 }
 0x2bd   : > { %v4245_v28 = vadd.f32 %v6683_v22, %v9318_v1  ;;  %v9520_v27 = vadd.f32 %v6792_v34, %v4242_v54  ;;  %4851 = vmatprep.mubr.bf16.mxu1 %v7994_v37 }
 0x2bf   : > { %v9522_v6 = vadd.f32 %v6795_v44, %v4245_v28  ;;  %v6684_v52 = vpop.f32.mrb[164].mxu1  ;;  %v6796_v58 = vpop.f32.mrb[164].mxu0 }
 0x2c0   : > { %v6685_v43 = vpop.f32.mrb[165].mxu1  ;;  %v6797_v32 = vpop.f32.mrb[165].mxu0 }
 0x2c1   : > { %v6686_v20 = vadd.f32 %v6685_v43, %v6684_v52  ;;  %v6687_v7 = vpop.f32.mrb[166].mxu1  ;;  %v6798_v53 = vadd.f32 %v6797_v32, %v6796_v58  ;;  %v6799_v49 = vpop.f32.mrb[166].mxu0  ;;  %v7995_v52 = vld [vmem:[%s8430_s7 + $0xa0] ss:$56 sps:$4 sm:$0xff]  }
 0x2c2   : > { %v6688_v5 = vpop.f32.mrb[167].mxu1  ;;  %v6800_v50 = vpop.f32.mrb[167].mxu0 }
 0x2c3   : > { %v4250_v1 = vadd.f32 %v6686_v20, %v9332_v14  ;;  %v6689_v34 = vadd.f32 %v6688_v5, %v6687_v7  ;;  %v6801_v40 = vadd.f32 %v6800_v50, %v6799_v49  ;;  %v8000_v20 = vld [vmem:[%s8430_s7 + $0x114] ss:$56 sps:$4 sm:$0xff]  }
 0x2c4   : > { %4852 = vmatmul.mubr.bf16.vlgmr.msra.gmra.mrb[16].mxu1 %v7992_v39 }
 0x2c5   : > { %v4253_v37 = vadd.f32 %v6689_v34, %v9340_v29  ;;  %v9528_v46 = vadd.f32 %v6798_v53, %v4250_v1  ;;  %4859 = vmatprep.mubr.bf16.mxu1 %v7997_v38 }
 0x2c7   : > { %v9530_v8 = vadd.f32 %v6801_v40, %v4253_v37  ;;  %v6690_v54 = vpop.f32.mrb[168].mxu1  ;;  %v6802_v22 = vpop.f32.mrb[168].mxu0 }
 0x2c8   : > { %v6691_v44 = vpop.f32.mrb[169].mxu1  ;;  %v6803_v28 = vpop.f32.mrb[169].mxu0 }
 0x2c9   : > { %v6692_v58 = vadd.f32 %v6691_v44, %v6690_v54  ;;  %v6693_v43 = vpop.f32.mrb[170].mxu1  ;;  %v6804_v32 = vadd.f32 %v6803_v28, %v6802_v22  ;;  %v6805_v14 = vpop.f32.mrb[170].mxu0  ;;  %v7998_v54 = vld [vmem:[%s8430_s7 + $0x110] ss:$56 sps:$4 sm:$0xff]  }
 0x2ca   : > { %v6694_v7 = vpop.f32.mrb[171].mxu1  ;;  %v6806_v39 = vpop.f32.mrb[171].mxu0 }
 0x2cb   : > { %v4258_v29 = vadd.f32 %v6692_v58, %v9354_v21  ;;  %v6695_v53 = vadd.f32 %v6694_v7, %v6693_v43  ;;  %v6807_v49 = vadd.f32 %v6806_v39, %v6805_v14  ;;  %v8003_v58 = vld [vmem:[%s8430_s7 + $0x184] ss:$56 sps:$4 sm:$0xff]  }
 0x2cc   : > { %4860 = vmatmul.mubr.bf16.gmra.mrb[20].mxu1 %v7995_v52 }
 0x2cd   : > { %v4261_v38 = vadd.f32 %v6695_v53, %v9359_v9  ;;  %v9536_v5 = vadd.f32 %v6804_v32, %v4258_v29  ;;  %4867 = vmatprep.mubr.bf16.mxu1 %v8000_v20 }
 0x2cf   : > { %v9538_v50 = vadd.f32 %v6807_v49, %v4261_v38  ;;  %v6696_v1 = vpop.f32.mrb[172].mxu1  ;;  %v6808_v34 = vpop.f32.mrb[172].mxu0 }
 0x2d0   : > { %v6697_v40 = vpop.f32.mrb[173].mxu1  ;;  %v6809_v37 = vpop.f32.mrb[173].mxu0 }
 0x2d1   : > { %v6698_v22 = vadd.f32 %v6697_v40, %v6696_v1  ;;  %v6699_v44 = vpop.f32.mrb[174].mxu1  ;;  %v6810_v28 = vadd.f32 %v6809_v37, %v6808_v34  ;;  %v6811_v21 = vpop.f32.mrb[174].mxu0  ;;  %v8001_v1 = vld [vmem:[%s8430_s7 + $0x180] ss:$56 sps:$4 sm:$0xff]  }
 0x2d2   : > { %v6700_v43 = vpop.f32.mrb[175].mxu1  ;;  %v6812_v52 = vpop.f32.mrb[175].mxu0 }
 0x2d3   : > { %v4266_v9 = vadd.f32 %v6698_v22, %v9376_v2  ;;  %v6701_v32 = vadd.f32 %v6700_v43, %v6699_v44  ;;  %v6813_v14 = vadd.f32 %v6812_v52, %v6811_v21  ;;  %v8006_v22 = vld [vmem:[%s8430_s7 + $0x1f4] ss:$56 sps:$4 sm:$0xff]  }
 0x2d4   : > { %4868 = vmatmul.mubr.bf16.gmra.mrb[24].mxu1 %v7998_v54 }
 0x2d5   : > { %v4269_v20 = vadd.f32 %v6701_v32, %v9381_v13  ;;  %v9544_v7 = vadd.f32 %v6810_v28, %v4266_v9  ;;  %4875 = vmatprep.mubr.bf16.mxu1 %v8003_v58 }
 0x2d7   : > { %v9546_v39 = vadd.f32 %v6813_v14, %v4269_v20  ;;  %v6702_v29 = vpop.f32.mrb[176].mxu1  ;;  %v6814_v53 = vpop.f32.mrb[176].mxu0 }
 0x2d8   : > { %v6703_v49 = vpop.f32.mrb[177].mxu1  ;;  %v6815_v38 = vpop.f32.mrb[177].mxu0 }
 0x2d9   : > { %v6704_v34 = vadd.f32 %v6703_v49, %v6702_v29  ;;  %v6705_v40 = vpop.f32.mrb[178].mxu1  ;;  %v6816_v37 = vadd.f32 %v6815_v38, %v6814_v53  ;;  %v6817_v2 = vpop.f32.mrb[178].mxu0  ;;  %v8004_v29 = vld [vmem:[%s8430_s7 + $0x1f0] ss:$56 sps:$4 sm:$0xff]  }
 0x2da   : > { %v6706_v44 = vpop.f32.mrb[179].mxu1  ;;  %v6818_v54 = vpop.f32.mrb[179].mxu0 }
 0x2db   : > { %v4274_v13 = vadd.f32 %v6704_v34, %v9398_v30  ;;  %v6707_v28 = vadd.f32 %v6706_v44, %v6705_v40  ;;  %v6819_v21 = vadd.f32 %v6818_v54, %v6817_v2  ;;  %v8009_v34 = vld [vmem:[%s8430_s7 + $0x264] ss:$56 sps:$4 sm:$0xff]  }
 0x2dc   : > { %4876 = vmatmul.mubr.bf16.gmra.mrb[28].mxu1 %v8001_v1  ;;  %v8040_v54 = vld [vmem:[#allocation7] sm:$0xff]  }
 0x2dd   : > { %v4277_v58 = vadd.f32 %v6707_v28, %v9403_v62  ;;  %v9552_v43 = vadd.f32 %v6816_v37, %v4274_v13  ;;  %4883 = vmatprep.mubr.bf16.mxu1 %v8006_v22  ;;  %7280 = vmatprep.subr.bf16.mxu0 %v8040_v54 }
 0x2de   : > { %7281 = vmatpush3.bf16.msra.mxu0 %v8040_v54 }
 0x2df   : > { %v9554_v52 = vadd.f32 %v6819_v21, %v4277_v58  ;;  %v6708_v9 = vpop.f32.mrb[180].mxu1  ;;  %v6820_v32 = vpop.f32.mrb[180].mxu0 }
 0x2e0   : > { %v6709_v14 = vpop.f32.mrb[181].mxu1  ;;  %v6821_v20 = vpop.f32.mrb[181].mxu0 }
 0x2e1   : > { %v6710_v53 = vadd.f32 %v6709_v14, %v6708_v9  ;;  %v6711_v49 = vpop.f32.mrb[182].mxu1  ;;  %v6822_v38 = vadd.f32 %v6821_v20, %v6820_v32  ;;  %v6823_v30 = vpop.f32.mrb[182].mxu0  ;;  %v8007_v32 = vld [vmem:[%s8430_s7 + $0x260] ss:$56 sps:$4 sm:$0xff]  }
 0x2e2   : > { %v6712_v40 = vpop.f32.mrb[183].mxu1  ;;  %v6824_v1 = vpop.f32.mrb[183].mxu0 }
 0x2e3   : > { %v4282_v62 = vadd.f32 %v6710_v53, %v9411_v60  ;;  %v6713_v37 = vadd.f32 %v6712_v40, %v6711_v49  ;;  %v6825_v2 = vadd.f32 %v6824_v1, %v6823_v30 }
 0x2e4   : > { %4884 = vmatmul.mubr.bf16.gmra.mrb[32].mxu1 %v8004_v29 }
 0x2e5   : > { %v4285_v22 = vadd.f32 %v6713_v37, %v9413_v18  ;;  %v9560_v44 = vadd.f32 %v6822_v38, %v4282_v62  ;;  %4891 = vmatprep.mubr.bf16.mxu1 %v8009_v34  ;;  %v8012_v18 = vld [vmem:[%s8430_s7 + $0x2d4] ss:$56 sps:$4 sm:$0xff]  }
 0x2e7   : > { %v9562_v13 = vadd.f32 %v6825_v2, %v4285_v22  ;;  %v6714_v28 = vpop.f32.mrb[184].mxu1  ;;  %v6826_v21 = vpop.f32.mrb[184].mxu0 }
 0x2e8   : > { %v6715_v58 = vpop.f32.mrb[185].mxu1  ;;  %v6827_v9 = vpop.f32.mrb[185].mxu0 }
 0x2e9   : > { %v6716_v60 = vadd.f32 %v6715_v58, %v6714_v28  ;;  %v6717_v14 = vpop.f32.mrb[186].mxu1  ;;  %v6828_v20 = vadd.f32 %v6827_v9, %v6826_v21  ;;  %v6829_v29 = vpop.f32.mrb[186].mxu0  ;;  %v8010_v28 = vld [vmem:[%s8430_s7 + $0x2d0] ss:$56 sps:$4 sm:$0xff]  }
 0x2ea   : > { %v6718_v53 = vpop.f32.mrb[187].mxu1  ;;  %v6830_v49 = vpop.f32.mrb[187].mxu0 }
 0x2eb   : > { %v4290_v38 = vadd.f32 %v6716_v60, %v9421_v45  ;;  %v6719_v30 = vadd.f32 %v6718_v53, %v6717_v14  ;;  %v6831_v34 = vadd.f32 %v6830_v49, %v6829_v29  ;;  %v8015_v60 = vld [vmem:[%s8430_s7 + $0x344] ss:$56 sps:$4 sm:$0xff]  }
 0x2ec   : > { %4892 = vmatmul.mubr.bf16.gmra.mrb[36].mxu1 %v8007_v32 }
 0x2ed   : > { %v4293_v40 = vadd.f32 %v6719_v30, %v9423_v56  ;;  %v9568_v1 = vadd.f32 %v6828_v20, %v4290_v38  ;;  %4899 = vmatprep.mubr.bf16.mxu1 %v8012_v18 }
 0x2ef   : > { %v9570_v62 = vadd.f32 %v6831_v34, %v4293_v40  ;;  %v6720_v37 = vpop.f32.mrb[188].mxu1  ;;  %v6832_v2 = vpop.f32.mrb[188].mxu0 }
 0x2f0   : > { %v6721_v22 = vpop.f32.mrb[189].mxu1  ;;  %v6833_v54 = vpop.f32.mrb[189].mxu0 }
 0x2f1   : > { %v6722_v21 = vadd.f32 %v6721_v22, %v6720_v37  ;;  %v6723_v58 = vpop.f32.mrb[190].mxu1  ;;  %v6834_v9 = vadd.f32 %v6833_v54, %v6832_v2  ;;  %v6835_v45 = vpop.f32.mrb[190].mxu0  ;;  %v8013_v37 = vld [vmem:[%s8430_s7 + $0x340] ss:$56 sps:$4 sm:$0xff]  }
 0x2f2   : > { %v6724_v14 = vpop.f32.mrb[191].mxu1  ;;  %v6836_v32 = vpop.f32.mrb[191].mxu0 }
 0x2f3   : > { %v4298_v56 = vadd.f32 %v6722_v21, %v9431_v15  ;;  %v6725_v20 = vadd.f32 %v6724_v14, %v6723_v58  ;;  %v6837_v29 = vadd.f32 %v6836_v32, %v6835_v45  ;;  %v8018_v21 = vld [vmem:[%s8430_s7 + $0x3b4] ss:$56 sps:$4 sm:$0xff]  }
 0x2f4   : > { %4900 = vmatmul.mubr.bf16.gmra.mrb[40].mxu1 %v8010_v28 }
 0x2f5   : > { %v4301_v18 = vadd.f32 %v6725_v20, %v9433_v0  ;;  %v9576_v53 = vadd.f32 %v6834_v9, %v4298_v56  ;;  %4907 = vmatprep.mubr.bf16.mxu1 %v8015_v60 }
 0x2f7   : > { %v9578_v49 = vadd.f32 %v6837_v29, %v4301_v18  ;;  %v6726_v38 = vpop.f32.mrb[192].mxu1  ;;  %v6838_v30 = vpop.f32.mrb[192].mxu0 }
 0x2f8   : > { %v6727_v34 = vpop.f32.mrb[193].mxu1  ;;  %v6839_v40 = vpop.f32.mrb[193].mxu0 }
 0x2f9   : > { %v6728_v2 = vadd.f32 %v6727_v34, %v6726_v38  ;;  %v6729_v22 = vpop.f32.mrb[194].mxu1  ;;  %v6840_v54 = vadd.f32 %v6839_v40, %v6838_v30  ;;  %v6841_v15 = vpop.f32.mrb[194].mxu0  ;;  %v8016_v38 = vld [vmem:[%s8430_s7 + $0x3b0] ss:$56 sps:$4 sm:$0xff]  }
 0x2fa   : > { %v6730_v58 = vpop.f32.mrb[195].mxu1  ;;  %v6842_v28 = vpop.f32.mrb[195].mxu0 }
 0x2fb   : > { %v4306_v0 = vadd.f32 %v6728_v2, %v9441_v4  ;;  %v6731_v9 = vadd.f32 %v6730_v58, %v6729_v22  ;;  %v6843_v45 = vadd.f32 %v6842_v28, %v6841_v15  ;;  %v8021_v2 = vld [vmem:[%s8430_s7 + $0x424] ss:$56 sps:$4 sm:$0xff]  }
 0x2fc   : > { %4908 = vmatmul.mubr.bf16.gmra.mrb[44].mxu1 %v8013_v37 }
 0x2fd   : > { %v4309_v60 = vadd.f32 %v6731_v9, %v9443_v12  ;;  %v9584_v14 = vadd.f32 %v6840_v54, %v4306_v0  ;;  %4915 = vmatprep.mubr.bf16.mxu1 %v8018_v21 }
 0x2ff   : > { %v9586_v32 = vadd.f32 %v6843_v45, %v4309_v60  ;;  %v6732_v56 = vpop.f32.mrb[196].mxu1  ;;  %v6844_v20 = vpop.f32.mrb[196].mxu0 }
 0x300   : > { %v6733_v29 = vpop.f32.mrb[197].mxu1  ;;  %v6845_v18 = vpop.f32.mrb[197].mxu0 }
 0x301   : > { %v6734_v30 = vadd.f32 %v6733_v29, %v6732_v56  ;;  %v6735_v34 = vpop.f32.mrb[198].mxu1  ;;  %v6846_v40 = vadd.f32 %v6845_v18, %v6844_v20  ;;  %v6847_v4 = vpop.f32.mrb[198].mxu0  ;;  %v8019_v56 = vld [vmem:[%s8430_s7 + $0x420] ss:$56 sps:$4 sm:$0xff]  }
 0x302   : > { %v6736_v22 = vpop.f32.mrb[199].mxu1  ;;  %v6848_v37 = vpop.f32.mrb[199].mxu0 }
 0x303   : > { %v4314_v12 = vadd.f32 %v6734_v30, %v9451_v10  ;;  %v6737_v54 = vadd.f32 %v6736_v22, %v6735_v34  ;;  %v6849_v15 = vadd.f32 %v6848_v37, %v6847_v4  ;;  %v8024_v30 = vld [vmem:[%s8430_s7 + $0x494] ss:$56 sps:$4 sm:$0xff]  }
 0x304   : > { %4916 = vmatmul.mubr.bf16.gmra.mrb[48].mxu1 %v8016_v38 }
 0x305   : > { %v4317_v21 = vadd.f32 %v6737_v54, %v9453_v17  ;;  %v9592_v58 = vadd.f32 %v6846_v40, %v4314_v12  ;;  %4923 = vmatprep.mubr.bf16.mxu1 %v8021_v2 }
 0x307   : > { %v9594_v28 = vadd.f32 %v6849_v15, %v4317_v21  ;;  %v6738_v0 = vpop.f32.mrb[200].mxu1  ;;  %v6850_v9 = vpop.f32.mrb[200].mxu0 }
 0x308   : > { %v6739_v45 = vpop.f32.mrb[201].mxu1  ;;  %v6851_v60 = vpop.f32.mrb[201].mxu0 }
 0x309   : > { %v6740_v20 = vadd.f32 %v6739_v45, %v6738_v0  ;;  %v6741_v29 = vpop.f32.mrb[202].mxu1  ;;  %v6852_v18 = vadd.f32 %v6851_v60, %v6850_v9  ;;  %v6853_v10 = vpop.f32.mrb[202].mxu0  ;;  %v8022_v0 = vld [vmem:[%s8430_s7 + $0x490] ss:$56 sps:$4 sm:$0xff]  }
 0x30a   : > { %v6742_v34 = vpop.f32.mrb[203].mxu1  ;;  %v6854_v38 = vpop.f32.mrb[203].mxu0 }
 0x30b   : > { %v4322_v17 = vadd.f32 %v6740_v20, %v9461_v33  ;;  %v6743_v40 = vadd.f32 %v6742_v34, %v6741_v29  ;;  %v6855_v4 = vadd.f32 %v6854_v38, %v6853_v10  ;;  %v8027_v20 = vld [vmem:[%s8430_s7 + $0x504] ss:$56 sps:$4 sm:$0xff]  }
 0x30c   : > { %4924 = vmatmul.mubr.bf16.gmra.mrb[52].mxu1 %v8019_v56 }
 0x30d   : > { %v4325_v2 = vadd.f32 %v6743_v40, %v9463_v41  ;;  %v9600_v22 = vadd.f32 %v6852_v18, %v4322_v17  ;;  %4931 = vmatprep.mubr.bf16.mxu1 %v8024_v30 }
 0x30f   : > { %v9602_v37 = vadd.f32 %v6855_v4, %v4325_v2  ;;  %v6744_v12 = vpop.f32.mrb[204].mxu1  ;;  %v6856_v54 = vpop.f32.mrb[204].mxu0 }
 0x310   : > { %v6745_v15 = vpop.f32.mrb[205].mxu1  ;;  %v6857_v21 = vpop.f32.mrb[205].mxu0 }
 0x311   : > { %v6746_v9 = vadd.f32 %v6745_v15, %v6744_v12  ;;  %v6747_v45 = vpop.f32.mrb[206].mxu1  ;;  %v6858_v60 = vadd.f32 %v6857_v21, %v6856_v54  ;;  %v6859_v33 = vpop.f32.mrb[206].mxu0  ;;  %v8025_v12 = vld [vmem:[%s8430_s7 + $0x500] ss:$56 sps:$4 sm:$0xff]  }
 0x312   : > { %v6748_v29 = vpop.f32.mrb[207].mxu1  ;;  %v6860_v56 = vpop.f32.mrb[207].mxu0 }
 0x313   : > { %v4330_v41 = vadd.f32 %v6746_v9, %v9471_v26  ;;  %v6749_v18 = vadd.f32 %v6748_v29, %v6747_v45  ;;  %v6861_v10 = vadd.f32 %v6860_v56, %v6859_v33  ;;  %v8030_v9 = vld [vmem:[%s8430_s7 + $0x574] ss:$56 sps:$4 sm:$0xff]  }
 0x314   : > { %4932 = vmatmul.mubr.bf16.gmra.mrb[56].mxu1 %v8022_v0 }
 0x315   : > { %v4333_v30 = vadd.f32 %v6749_v18, %v9473_v25  ;;  %v9608_v34 = vadd.f32 %v6858_v60, %v4330_v41  ;;  %4939 = vmatprep.mubr.bf16.mxu1 %v8027_v20 }
 0x317   : > { %v9610_v38 = vadd.f32 %v6861_v10, %v4333_v30  ;;  %v6878_v17 = vpop.f32.mrb[208].mxu1  ;;  %v6990_v40 = vpop.f32.mrb[208].mxu0 }
 0x318   : > { %v6879_v4 = vpop.f32.mrb[209].mxu1  ;;  %v6991_v2 = vpop.f32.mrb[209].mxu0 }
 0x319   : > { %v6880_v54 = vadd.f32 %v6879_v4, %v6878_v17  ;;  %v6881_v15 = vpop.f32.mrb[210].mxu1  ;;  %v6992_v21 = vadd.f32 %v6991_v2, %v6990_v40  ;;  %v6993_v26 = vpop.f32.mrb[210].mxu0  ;;  %v8028_v17 = vld [vmem:[%s8430_s7 + $0x570] ss:$56 sps:$4 sm:$0xff]  }
 0x31a   : > { %v6882_v45 = vpop.f32.mrb[211].mxu1  ;;  %v6994_v0 = vpop.f32.mrb[211].mxu0 }
 0x31b   : > { %v4532_v25 = vadd.f32 %v6880_v54, %v9481_v47  ;;  %v6883_v60 = vadd.f32 %v6882_v45, %v6881_v15  ;;  %v6995_v33 = vadd.f32 %v6994_v0, %v6993_v26  ;;  %v8033_v54 = vld [vmem:[%s8430_s7 + $0x5e4] ss:$56 sps:$4 sm:$0xff]   ;;  %v8041_v0 = vld [vmem:[#allocation7 + $0x8] sm:$0xff]  }
 0x31c   : > { %4940 = vmatmul.mubr.bf16.gmra.mrb[60].mxu1 %v8025_v12  ;;  %7282 = vmatprep.subr.bf16.mxu0 %v8041_v0 }
 0x31d   : > { %v4535_v20 = vadd.f32 %v6883_v60, %v9483_v19  ;;  %v9616_v29 = vadd.f32 %v6992_v21, %v4532_v25  ;;  %4947 = vmatprep.mubr.bf16.mxu1 %v8030_v9  ;;  %7283 = vmatpush3.bf16.msra.mxu0 %v8041_v0 }
 0x31f   : > { %v9618_v56 = vadd.f32 %v6995_v33, %v4535_v20  ;;  %v6884_v41 = vpop.f32.mrb[212].mxu1  ;;  %v6996_v18 = vpop.f32.mrb[212].mxu0 }
 0x320   : > { %v6885_v10 = vpop.f32.mrb[213].mxu1  ;;  %v6997_v30 = vpop.f32.mrb[213].mxu0 }
 0x321   : > { %v6886_v40 = vadd.f32 %v6885_v10, %v6884_v41  ;;  %v6887_v4 = vpop.f32.mrb[214].mxu1  ;;  %v6998_v2 = vadd.f32 %v6997_v30, %v6996_v18  ;;  %v6999_v47 = vpop.f32.mrb[214].mxu0  ;;  %v8031_v18 = vld [vmem:[%s8430_s7 + $0x5e0] ss:$56 sps:$4 sm:$0xff]  }
 0x322   : > { %v6888_v15 = vpop.f32.mrb[215].mxu1  ;;  %v7000_v12 = vpop.f32.mrb[215].mxu0 }
 0x323   : > { %v4540_v19 = vadd.f32 %v6886_v40, %v9491_v51  ;;  %v6889_v21 = vadd.f32 %v6888_v15, %v6887_v4  ;;  %v7001_v26 = vadd.f32 %v7000_v12, %v6999_v47 }
 0x324   : > { %4948 = vmatmul.mubr.bf16.gmra.mrb[64].mxu1 %v8028_v17 }
 0x325   : > { %v4543_v9 = vadd.f32 %v6889_v21, %v9493_v31  ;;  %v9624_v45 = vadd.f32 %v6998_v2, %v4540_v19  ;;  %4955 = vmatprep.mubr.bf16.mxu1 %v8033_v54  ;;  %v8036_v31 = vld [vmem:[%s8430_s7 + $0x654] ss:$56 sps:$4 sm:$0xff]  }
 0x327   : > { %v9626_v25 = vadd.f32 %v7001_v26, %v4543_v9  ;;  %v6890_v60 = vpop.f32.mrb[216].mxu1  ;;  %v7002_v33 = vpop.f32.mrb[216].mxu0 }
 0x328   : > { %v6891_v20 = vpop.f32.mrb[217].mxu1  ;;  %v7003_v41 = vpop.f32.mrb[217].mxu0 }
 0x329   : > { %v6892_v51 = vadd.f32 %v6891_v20, %v6890_v60  ;;  %v6893_v10 = vpop.f32.mrb[218].mxu1  ;;  %v7004_v30 = vadd.f32 %v7003_v41, %v7002_v33  ;;  %v7005_v17 = vpop.f32.mrb[218].mxu0  ;;  %v8034_v60 = vld [vmem:[%s8430_s7 + $0x650] ss:$56 sps:$4 sm:$0xff]  }
 0x32a   : > { %v6894_v40 = vpop.f32.mrb[219].mxu1  ;;  %v7006_v4 = vpop.f32.mrb[219].mxu0 }
 0x32b   : > { %v4548_v2 = vadd.f32 %v6892_v51, %v9501_v35  ;;  %v6895_v47 = vadd.f32 %v6894_v40, %v6893_v10  ;;  %v7007_v54 = vadd.f32 %v7006_v4, %v7005_v17  ;;  %v8039_v51 = vld [vmem:[%s8430_s7 + $0x6c4] ss:$56 sps:$4 sm:$0xff]  }
 0x32c   : > { %4956 = vmatmul.mubr.bf16.gmra.mrb[68].mxu1 %v8031_v18 }
 0x32d   : > { %v4551_v15 = vadd.f32 %v6895_v47, %v9503_v24  ;;  %v9632_v12 = vadd.f32 %v7004_v30, %v4548_v2  ;;  %4963 = vmatprep.mubr.bf16.mxu1 %v8036_v31 }
 0x32f   : > { %v9634_v19 = vadd.f32 %v7007_v54, %v4551_v15  ;;  %v6896_v21 = vpop.f32.mrb[220].mxu1  ;;  %v7008_v26 = vpop.f32.mrb[220].mxu0 }
 0x330   : > { %v6897_v9 = vpop.f32.mrb[221].mxu1  ;;  %v7009_v0 = vpop.f32.mrb[221].mxu0 }
 0x331   : > { %v6898_v33 = vadd.f32 %v6897_v9, %v6896_v21  ;;  %v6899_v20 = vpop.f32.mrb[222].mxu1  ;;  %v7010_v41 = vadd.f32 %v7009_v0, %v7008_v26  ;;  %v7011_v35 = vpop.f32.mrb[222].mxu0  ;;  %v8037_v21 = vld [vmem:[%s8430_s7 + $0x6c0] ss:$56 sps:$4 sm:$0xff]   ;;  %s5669_s7 = sshll.u32 %s8426_s28, 9 }
 0x332   : > { %v6900_v10 = vpop.f32.mrb[223].mxu1  ;;  %v7012_v18 = vpop.f32.mrb[223].mxu0  ;;  %s9813_s6 = scalar_lea.vmem [#allocation8], %s5669_s7 }
 0x333   : > { %v4556_v24 = vadd.f32 %v6898_v33, %v9511_v36  ;;  %v6901_v30 = vadd.f32 %v6900_v10, %v6899_v20  ;;  %v7013_v17 = vadd.f32 %v7012_v18, %v7011_v35  ;;  %s5556_s12 = sshll.u32 %s9813_s6, 4  ;;  %s9883_s12 = int_to_ptr.vmem [resolvable:$true] %s5556_s12 }
 0x334   : > { %4964 = vmatmul.mubr.bf16.gmra.mrb[72].mxu1 %v8034_v60  ;;  %s8130_s10 = scalar_lea.vmem %s9883_s12, 8192  ;;  %p8137_p2 = scmp.lt.s32.totalorder %s9883_s12, %s8135_s4 }
 0x335   : > { %v4559_v31 = vadd.f32 %v6901_v30, %v9513_v59  ;;  %v9640_v40 = vadd.f32 %v7010_v41, %v4556_v24  ;;  %4971 = vmatprep.mubr.bf16.mxu1 %v8039_v51  ;;  %p8131_p3 = scmp.ne.s32.totalorder %s9883_s12, %s8130_s10  ;;  %p8138_p5 = scmp.lt.s32.totalorder %s8136_s26, %s8130_s10 }
 0x337   : > { %v9642_v4 = vadd.f32 %v7013_v17, %v4559_v31  ;;  %v6902_v2 = vpop.f32.mrb[224].mxu1  ;;  %v7014_v47 = vpop.f32.mrb[224].mxu0  ;;  %p8132_p7 = pnand %p8131_p3, %p8339_p12  ;;  %p8139_p1 = por %p8138_p5, %p8137_p2 }
 0x338   : > { %v6903_v54 = vpop.f32.mrb[225].mxu1  ;;  %v7015_v15 = vpop.f32.mrb[225].mxu0 }
 0x339   : > { %v6904_v26 = vadd.f32 %v6903_v54, %v6902_v2  ;;  %v6905_v9 = vpop.f32.mrb[226].mxu1  ;;  %v7016_v0 = vadd.f32 %v7015_v15, %v7014_v47  ;;  %v7017_v55 = vpop.f32.mrb[226].mxu0  ;;  %p8133_p9 = pneg %p8132_p7 }
 0x33a   : > { %v6906_v36 = vpop.f32.mrb[227].mxu1  ;;  %v7018_v33 = vpop.f32.mrb[227].mxu0 }
 0x33b   : > { %v4564_v60 = vadd.f32 %v6904_v26, %v9520_v27  ;;  %v6907_v20 = vadd.f32 %v6906_v36, %v6905_v9  ;;  %v7019_v59 = vadd.f32 %v7018_v33, %v7017_v55  ;;  %p8140_p6 = pnand %p8139_p1, %p8133_p9 }
 0x33c   : > { %4972 = vmatmul.mubr.bf16.gmra.mrb[76].mxu1 %v8037_v21 }
 0x33d   : > { %v4567_v41 = vadd.f32 %v6907_v20, %v9522_v6  ;;  %v9647_v35 = vadd.f32 %v7016_v0, %v4564_v60 }
 0x33f   : > { %v9649_v51 = vadd.f32 %v7019_v59, %v4567_v41  ;;  %v6908_v10 = vpop.f32.mrb[228].mxu1  ;;  %v7020_v18 = vpop.f32.mrb[228].mxu0 }
 0x340   : > { %v6909_v24 = vpop.f32.mrb[229].mxu1  ;;  %v7021_v30 = vpop.f32.mrb[229].mxu0 }
 0x341   : > { %v6910_v17 = vadd.f32 %v6909_v24, %v6908_v10  ;;  %v6911_v31 = vpop.f32.mrb[230].mxu1  ;;  %v7022_v2 = vadd.f32 %v7021_v30, %v7020_v18  ;;  %v7023_v47 = vpop.f32.mrb[230].mxu0 }
 0x342   : > { %v6912_v54 = vpop.f32.mrb[231].mxu1  ;;  %v7024_v15 = vpop.f32.mrb[231].mxu0 }
 0x343   : > { %v4572_v27 = vadd.f32 %v6910_v17, %v9528_v46  ;;  %v6913_v55 = vadd.f32 %v6912_v54, %v6911_v31  ;;  %v7025_v21 = vadd.f32 %v7024_v15, %v7023_v47 }
 0x345   : > { %v4575_v6 = vadd.f32 %v6913_v55, %v9530_v8  ;;  %v9653_v26 = vadd.f32 %v7022_v2, %v4572_v27 }
 0x347   : > { %v9655_v9 = vadd.f32 %v7025_v21, %v4575_v6  ;;  %v6914_v0 = vpop.f32.mrb[232].mxu1  ;;  %v7026_v36 = vpop.f32.mrb[232].mxu0 }
 0x348   : > { %v6915_v33 = vpop.f32.mrb[233].mxu1  ;;  %v7027_v60 = vpop.f32.mrb[233].mxu0 }
 0x349   : > { %v6916_v20 = vadd.f32 %v6915_v33, %v6914_v0  ;;  %v6917_v59 = vpop.f32.mrb[234].mxu1  ;;  %v7028_v41 = vadd.f32 %v7027_v60, %v7026_v36  ;;  %v7029_v10 = vpop.f32.mrb[234].mxu0 }
 0x34a   : > { %v6918_v18 = vpop.f32.mrb[235].mxu1  ;;  %v7030_v24 = vpop.f32.mrb[235].mxu0 }
 0x34b   : > { %v4580_v46 = vadd.f32 %v6916_v20, %v9536_v5  ;;  %v6919_v30 = vadd.f32 %v6918_v18, %v6917_v59  ;;  %v7031_v17 = vadd.f32 %v7030_v24, %v7029_v10 }
 0x34d   : > { %v4583_v8 = vadd.f32 %v6919_v30, %v9538_v50  ;;  %v9659_v31 = vadd.f32 %v7028_v41, %v4580_v46 }
 0x34f   : > { %v9661_v2 = vadd.f32 %v7031_v17, %v4583_v8  ;;  %v6920_v47 = vpop.f32.mrb[236].mxu1  ;;  %v7032_v54 = vpop.f32.mrb[236].mxu0 }
 0x350   : > { %v6921_v15 = vpop.f32.mrb[237].mxu1  ;;  %v7033_v27 = vpop.f32.mrb[237].mxu0 }
 0x351   : > { %v6922_v55 = vadd.f32 %v6921_v15, %v6920_v47  ;;  %v6923_v21 = vpop.f32.mrb[238].mxu1  ;;  %v7034_v6 = vadd.f32 %v7033_v27, %v7032_v54  ;;  %v7035_v0 = vpop.f32.mrb[238].mxu0 }
 0x352   : > { %v6924_v36 = vpop.f32.mrb[239].mxu1  ;;  %v7036_v33 = vpop.f32.mrb[239].mxu0 }
 0x353   : > { %v4588_v5 = vadd.f32 %v6922_v55, %v9544_v7  ;;  %v6925_v60 = vadd.f32 %v6924_v36, %v6923_v21  ;;  %v7037_v20 = vadd.f32 %v7036_v33, %v7035_v0 }
 0x355   : > { %v4591_v50 = vadd.f32 %v6925_v60, %v9546_v39  ;;  %v9665_v59 = vadd.f32 %v7034_v6, %v4588_v5 }
 0x357   : > { %v9667_v41 = vadd.f32 %v7037_v20, %v4591_v50  ;;  %v6926_v10 = vpop.f32.mrb[240].mxu1  ;;  %v7038_v18 = vpop.f32.mrb[240].mxu0 }
 0x358   : > { %v6927_v24 = vpop.f32.mrb[241].mxu1  ;;  %v7039_v46 = vpop.f32.mrb[241].mxu0 }
 0x359   : > { %v6928_v30 = vadd.f32 %v6927_v24, %v6926_v10  ;;  %v6929_v17 = vpop.f32.mrb[242].mxu1  ;;  %v7040_v8 = vadd.f32 %v7039_v46, %v7038_v18  ;;  %v7041_v47 = vpop.f32.mrb[242].mxu0 }
 0x35a   : > { %v6930_v54 = vpop.f32.mrb[243].mxu1  ;;  %v7042_v15 = vpop.f32.mrb[243].mxu0 }
 0x35b   : > { %v4596_v7 = vadd.f32 %v6928_v30, %v9552_v43  ;;  %v6931_v27 = vadd.f32 %v6930_v54, %v6929_v17  ;;  %v7043_v55 = vadd.f32 %v7042_v15, %v7041_v47 }
 0x35d   : > { %v4599_v39 = vadd.f32 %v6931_v27, %v9554_v52  ;;  %v9671_v21 = vadd.f32 %v7040_v8, %v4596_v7 }
 0x35f   : > { %v9673_v6 = vadd.f32 %v7043_v55, %v4599_v39  ;;  %v6932_v0 = vpop.f32.mrb[244].mxu1  ;;  %v7044_v36 = vpop.f32.mrb[244].mxu0 }
 0x360   : > { %v6933_v33 = vpop.f32.mrb[245].mxu1  ;;  %v7045_v5 = vpop.f32.mrb[245].mxu0 }
 0x361   : > { %v6934_v60 = vadd.f32 %v6933_v33, %v6932_v0  ;;  %v6935_v20 = vpop.f32.mrb[246].mxu1  ;;  %v7046_v50 = vadd.f32 %v7045_v5, %v7044_v36  ;;  %v7047_v10 = vpop.f32.mrb[246].mxu0 }
 0x362   : > { %v6936_v18 = vpop.f32.mrb[247].mxu1  ;;  %v7048_v24 = vpop.f32.mrb[247].mxu0 }
 0x363   : > { %v4604_v43 = vadd.f32 %v6934_v60, %v9560_v44  ;;  %v6937_v46 = vadd.f32 %v6936_v18, %v6935_v20  ;;  %v7049_v30 = vadd.f32 %v7048_v24, %v7047_v10 }
 0x365   : > { %v4607_v52 = vadd.f32 %v6937_v46, %v9562_v13  ;;  %v9677_v17 = vadd.f32 %v7046_v50, %v4604_v43 }
 0x367   : > { %v9679_v8 = vadd.f32 %v7049_v30, %v4607_v52  ;;  %v6938_v47 = vpop.f32.mrb[248].mxu1  ;;  %v7050_v54 = vpop.f32.mrb[248].mxu0 }
 0x368   : > { %v6939_v15 = vpop.f32.mrb[249].mxu1  ;;  %v7051_v7 = vpop.f32.mrb[249].mxu0 }
 0x369   : > { %v6940_v27 = vadd.f32 %v6939_v15, %v6938_v47  ;;  %v6941_v55 = vpop.f32.mrb[250].mxu1  ;;  %v7052_v39 = vadd.f32 %v7051_v7, %v7050_v54  ;;  %v7053_v0 = vpop.f32.mrb[250].mxu0 }
 0x36a   : > { %v6942_v36 = vpop.f32.mrb[251].mxu1  ;;  %v7054_v33 = vpop.f32.mrb[251].mxu0 }
 0x36b   : > { %v4612_v44 = vadd.f32 %v6940_v27, %v9568_v1  ;;  %v6943_v5 = vadd.f32 %v6942_v36, %v6941_v55  ;;  %v7055_v60 = vadd.f32 %v7054_v33, %v7053_v0 }
 0x36d   : > { %v4615_v13 = vadd.f32 %v6943_v5, %v9570_v62  ;;  %v9683_v20 = vadd.f32 %v7052_v39, %v4612_v44 }
 0x36f   : > { %v9685_v50 = vadd.f32 %v7055_v60, %v4615_v13  ;;  %v6944_v10 = vpop.f32.mrb[252].mxu1  ;;  %v7056_v18 = vpop.f32.mrb[252].mxu0 }
 0x370   : > { %v6945_v24 = vpop.f32.mrb[253].mxu1  ;;  %v7057_v43 = vpop.f32.mrb[253].mxu0 }
 0x371   : > { %v6946_v46 = vadd.f32 %v6945_v24, %v6944_v10  ;;  %v6947_v30 = vpop.f32.mrb[254].mxu1  ;;  %v7058_v52 = vadd.f32 %v7057_v43, %v7056_v18  ;;  %v7059_v47 = vpop.f32.mrb[254].mxu0 }
 0x372   : > { %v6948_v54 = vpop.f32.mrb[255].mxu1  ;;  %v7060_v15 = vpop.f32.mrb[255].mxu0 }
 0x373   : > { %v4620_v1 = vadd.f32 %v6946_v46, %v9576_v53  ;;  %v6949_v7 = vadd.f32 %v6948_v54, %v6947_v30  ;;  %v7061_v27 = vadd.f32 %v7060_v15, %v7059_v47 }
 0x375   : > { %v4623_v62 = vadd.f32 %v6949_v7, %v9578_v49  ;;  %v9689_v55 = vadd.f32 %v7058_v52, %v4620_v1 }
 0x377   : > { %v9691_v39 = vadd.f32 %v7061_v27, %v4623_v62  ;;  %v6950_v0 = vpop.f32.mrb[0].mxu1  ;;  %v7062_v36 = vpop.f32.mrb[0].mxu0 }
 0x378   : > { %v6951_v33 = vpop.f32.mrb[1].mxu1  ;;  %v7063_v44 = vpop.f32.mrb[1].mxu0 }
 0x379   : > { %v6952_v5 = vadd.f32 %v6951_v33, %v6950_v0  ;;  %v6953_v60 = vpop.f32.mrb[2].mxu1  ;;  %v7064_v13 = vadd.f32 %v7063_v44, %v7062_v36  ;;  %v7065_v10 = vpop.f32.mrb[2].mxu0 }
 0x37a   : > { %v6954_v18 = vpop.f32.mrb[3].mxu1  ;;  %v7066_v24 = vpop.f32.mrb[3].mxu0 }
 0x37b   : > { %v4628_v53 = vadd.f32 %v6952_v5, %v9584_v14  ;;  %v6955_v43 = vadd.f32 %v6954_v18, %v6953_v60  ;;  %v7067_v46 = vadd.f32 %v7066_v24, %v7065_v10 }
 0x37d   : > { %v4631_v49 = vadd.f32 %v6955_v43, %v9586_v32  ;;  %v9695_v30 = vadd.f32 %v7064_v13, %v4628_v53 }
 0x37f   : > { %v9697_v52 = vadd.f32 %v7067_v46, %v4631_v49  ;;  %v6956_v47 = vpop.f32.mrb[4].mxu1  ;;  %v7068_v54 = vpop.f32.mrb[4].mxu0 }
 0x380   : > { %v6957_v15 = vpop.f32.mrb[5].mxu1  ;;  %v7069_v1 = vpop.f32.mrb[5].mxu0 }
 0x381   : > { %v6958_v7 = vadd.f32 %v6957_v15, %v6956_v47  ;;  %v6959_v27 = vpop.f32.mrb[6].mxu1  ;;  %v7070_v62 = vadd.f32 %v7069_v1, %v7068_v54  ;;  %v7071_v0 = vpop.f32.mrb[6].mxu0 }
 0x382   : > { %v6960_v36 = vpop.f32.mrb[7].mxu1  ;;  %v7072_v33 = vpop.f32.mrb[7].mxu0 }
 0x383   : > { %v4636_v14 = vadd.f32 %v6958_v7, %v9592_v58  ;;  %v6961_v44 = vadd.f32 %v6960_v36, %v6959_v27  ;;  %v7073_v5 = vadd.f32 %v7072_v33, %v7071_v0 }
 0x385   : > { %v4639_v32 = vadd.f32 %v6961_v44, %v9594_v28  ;;  %v9701_v60 = vadd.f32 %v7070_v62, %v4636_v14 }
 0x387   : > { %v9703_v13 = vadd.f32 %v7073_v5, %v4639_v32  ;;  %v6962_v10 = vpop.f32.mrb[8].mxu1  ;;  %v7074_v18 = vpop.f32.mrb[8].mxu0 }
 0x388   : > { %v6963_v24 = vpop.f32.mrb[9].mxu1  ;;  %v7075_v53 = vpop.f32.mrb[9].mxu0 }
 0x389   : > { %v6964_v43 = vadd.f32 %v6963_v24, %v6962_v10  ;;  %v6965_v46 = vpop.f32.mrb[10].mxu1  ;;  %v7076_v49 = vadd.f32 %v7075_v53, %v7074_v18  ;;  %v7077_v47 = vpop.f32.mrb[10].mxu0 }
 0x38a   : > { %v6966_v54 = vpop.f32.mrb[11].mxu1  ;;  %v7078_v15 = vpop.f32.mrb[11].mxu0 }
 0x38b   : > { %v4644_v58 = vadd.f32 %v6964_v43, %v9600_v22  ;;  %v6967_v1 = vadd.f32 %v6966_v54, %v6965_v46  ;;  %v7079_v7 = vadd.f32 %v7078_v15, %v7077_v47 }
 0x38d   : > { %v4647_v28 = vadd.f32 %v6967_v1, %v9602_v37  ;;  %v9707_v27 = vadd.f32 %v7076_v49, %v4644_v58 }
 0x38f   : > { %v9709_v62 = vadd.f32 %v7079_v7, %v4647_v28  ;;  %v6968_v0 = vpop.f32.mrb[12].mxu1  ;;  %v7080_v36 = vpop.f32.mrb[12].mxu0 }
 0x390   : > { %v6969_v33 = vpop.f32.mrb[13].mxu1  ;;  %v7081_v14 = vpop.f32.mrb[13].mxu0 }
 0x391   : > { %v6970_v44 = vadd.f32 %v6969_v33, %v6968_v0  ;;  %v6971_v5 = vpop.f32.mrb[14].mxu1  ;;  %v7082_v32 = vadd.f32 %v7081_v14, %v7080_v36  ;;  %v7083_v10 = vpop.f32.mrb[14].mxu0 }
 0x392   : > { %v6972_v18 = vpop.f32.mrb[15].mxu1  ;;  %v7084_v24 = vpop.f32.mrb[15].mxu0 }
 0x393   : > { %v4652_v22 = vadd.f32 %v6970_v44, %v9608_v34  ;;  %v6973_v53 = vadd.f32 %v6972_v18, %v6971_v5  ;;  %v7085_v43 = vadd.f32 %v7084_v24, %v7083_v10 }
 0x395   : > { %v4655_v37 = vadd.f32 %v6973_v53, %v9610_v38  ;;  %v9713_v46 = vadd.f32 %v7082_v32, %v4652_v22 }
 0x397   : > { %v9715_v49 = vadd.f32 %v7085_v43, %v4655_v37  ;;  %v7102_v47 = vpop.f32.mrb[16].mxu1 }
 0x398   : > { %v7103_v54 = vpop.f32.mrb[17].mxu1 }
 0x399   : > { %v7104_v15 = vadd.f32 %v7103_v54, %v7102_v47  ;;  %v7105_v58 = vpop.f32.mrb[18].mxu1 }
 0x39a   : > { %v7106_v1 = vpop.f32.mrb[19].mxu1 }
 0x39b   : > { %v4854_v7 = vadd.f32 %v7104_v15, %v9616_v29  ;;  %v7107_v28 = vadd.f32 %v7106_v1, %v7105_v58 }
 0x39d   : > { %v4857_v0 = vadd.f32 %v7107_v28, %v9618_v56  ;;  %v4980_v36 = vmax.f32 %v4854_v7, 0.0 }
 0x39f   : > { %v4981_v34 = vmax.f32 %v4857_v0, 0.0  ;;  %v7108_v33 = vpop.f32.mrb[20].mxu1 }
 0x3a0   : > { %v7109_v14 = vpop.f32.mrb[21].mxu1 }
 0x3a1   : > { %v5044_v38 = vpack.c.bf16 %v4981_v34, %v4980_v36  ;;  %v7110_v44 = vadd.f32 %v7109_v14, %v7108_v33  ;;  %v7111_v5 = vpop.f32.mrb[22].mxu1 }
 0x3a2   : > { %v7112_v32 = vpop.f32.mrb[23].mxu1 }
 0x3a3   : > { %v4862_v10 = vadd.f32 %v7110_v44, %v9624_v45  ;;  %v7113_v18 = vadd.f32 %v7112_v32, %v7111_v5  ;;  %7284 = vmatprep.mubr.msk.bf16.mxu0 %vm5092_vm0, %v5044_v38 }
 0x3a5   : > { %v4865_v24 = vadd.f32 %v7113_v18, %v9626_v25  ;;  %v4982_v29 = vmax.f32 %v4862_v10, 0.0 }
 0x3a7   : > { %v4983_v22 = vmax.f32 %v4865_v24, 0.0  ;;  %v7114_v53 = vpop.f32.mrb[24].mxu1 }
 0x3a8   : > { %v7115_v56 = vpop.f32.mrb[25].mxu1 }
 0x3a9   : > { %v5045_v43 = vpack.c.bf16 %v4983_v22, %v4982_v29  ;;  %v7116_v37 = vadd.f32 %v7115_v56, %v7114_v53  ;;  %v7117_v47 = vpop.f32.mrb[26].mxu1 }
 0x3aa   : > { %v7118_v54 = vpop.f32.mrb[27].mxu1 }
 0x3ab   : > { %v4870_v15 = vadd.f32 %v7116_v37, %v9632_v12  ;;  %v7119_v58 = vadd.f32 %v7118_v54, %v7117_v47  ;;  %7285 = vmatmul.mubr.msk.bf16.vlgmr.msra.gmra.mrb[16].mxu0 %vm5092_vm0, %v5045_v43 }
 0x3ad   : > { %v4873_v45 = vadd.f32 %v7119_v58, %v9634_v19  ;;  %v4984_v1 = vmax.f32 %v4870_v15, 0.0 }
 0x3af   : > { %v4985_v7 = vmax.f32 %v4873_v45, 0.0  ;;  %v7120_v28 = vpop.f32.mrb[28].mxu1 }
 0x3b0   : > { %v7121_v0 = vpop.f32.mrb[29].mxu1 }
 0x3b1   : > { %v5046_v25 = vpack.c.bf16 %v4985_v7, %v4984_v1  ;;  %v7122_v36 = vadd.f32 %v7121_v0, %v7120_v28  ;;  %v7123_v34 = vpop.f32.mrb[30].mxu1 }
 0x3b2   : > { %v7124_v33 = vpop.f32.mrb[31].mxu1 }
 0x3b3   : > { %v4878_v14 = vadd.f32 %v7122_v36, %v9640_v40  ;;  %v7125_v38 = vadd.f32 %v7124_v33, %v7123_v34  ;;  %7288 = vmatprep.mubr.msk.bf16.mxu0 %vm5092_vm0, %v5046_v25 }
 0x3b5   : > { %v4881_v12 = vadd.f32 %v7125_v38, %v9642_v4  ;;  %v4986_v44 = vmax.f32 %v4878_v14, 0.0 }
 0x3b7   : > { %v4987_v5 = vmax.f32 %v4881_v12, 0.0  ;;  %v7126_v32 = vpop.f32.mrb[32].mxu1 }
 0x3b8   : > { %v7127_v10 = vpop.f32.mrb[33].mxu1 }
 0x3b9   : > { %v5047_v19 = vpack.c.bf16 %v4987_v5, %v4986_v44  ;;  %v7128_v18 = vadd.f32 %v7127_v10, %v7126_v32  ;;  %v7129_v24 = vpop.f32.mrb[34].mxu1 }
 0x3ba   : > { %v7130_v29 = vpop.f32.mrb[35].mxu1 }
 0x3bb   : > { %v4886_v22 = vadd.f32 %v7128_v18, %v9647_v35  ;;  %v7131_v53 = vadd.f32 %v7130_v29, %v7129_v24  ;;  %7289 = vmatmul.mubr.msk.bf16.gmra.mrb[20].mxu0 %vm5092_vm0, %v5047_v19 }
 0x3bd   : > { %v4889_v40 = vadd.f32 %v7131_v53, %v9649_v51  ;;  %v4988_v56 = vmax.f32 %v4886_v22, 0.0 }
 0x3bf   : > { %v4989_v43 = vmax.f32 %v4889_v40, 0.0  ;;  %v7132_v37 = vpop.f32.mrb[36].mxu1 }
 0x3c0   : > { %v7133_v47 = vpop.f32.mrb[37].mxu1 }
 0x3c1   : > { %v5048_v4 = vpack.c.bf16 %v4989_v43, %v4988_v56  ;;  %v7134_v54 = vadd.f32 %v7133_v47, %v7132_v37  ;;  %v7135_v15 = vpop.f32.mrb[38].mxu1 }
 0x3c2   : > { %v7136_v58 = vpop.f32.mrb[39].mxu1 }
 0x3c3   : > { %v4894_v45 = vadd.f32 %v7134_v54, %v9653_v26  ;;  %v7137_v1 = vadd.f32 %v7136_v58, %v7135_v15  ;;  %7292 = vmatprep.mubr.msk.bf16.mxu0 %vm5092_vm0, %v5048_v4 }
 0x3c5   : > { %v4897_v35 = vadd.f32 %v7137_v1, %v9655_v9  ;;  %v4990_v7 = vmax.f32 %v4894_v45, 0.0 }
 0x3c7   : > { %v4991_v28 = vmax.f32 %v4897_v35, 0.0  ;;  %v7138_v0 = vpop.f32.mrb[40].mxu1 }
 0x3c8   : > { %v7139_v25 = vpop.f32.mrb[41].mxu1 }
 0x3c9   : > { %v5049_v51 = vpack.c.bf16 %v4991_v28, %v4990_v7  ;;  %v7140_v36 = vadd.f32 %v7139_v25, %v7138_v0  ;;  %v7141_v34 = vpop.f32.mrb[42].mxu1 }
 0x3ca   : > { %v7142_v33 = vpop.f32.mrb[43].mxu1 }
 0x3cb   : > { %v4902_v14 = vadd.f32 %v7140_v36, %v9659_v31  ;;  %v7143_v38 = vadd.f32 %v7142_v33, %v7141_v34  ;;  %7293 = vmatmul.mubr.msk.bf16.gmra.mrb[24].mxu0 %vm5092_vm0, %v5049_v51 }
 0x3cd   : > { %v4905_v26 = vadd.f32 %v7143_v38, %v9661_v2  ;;  %v4992_v12 = vmax.f32 %v4902_v14, 0.0 }
 0x3cf   : > { %v4993_v44 = vmax.f32 %v4905_v26, 0.0  ;;  %v7144_v5 = vpop.f32.mrb[44].mxu1 }
 0x3d0   : > { %v7145_v32 = vpop.f32.mrb[45].mxu1 }
 0x3d1   : > { %v5050_v9 = vpack.c.bf16 %v4993_v44, %v4992_v12  ;;  %v7146_v10 = vadd.f32 %v7145_v32, %v7144_v5  ;;  %v7147_v19 = vpop.f32.mrb[46].mxu1 }
 0x3d2   : > { %v7148_v18 = vpop.f32.mrb[47].mxu1 }
 0x3d3   : > { %v4910_v24 = vadd.f32 %v7146_v10, %v9665_v59  ;;  %v7149_v29 = vadd.f32 %v7148_v18, %v7147_v19  ;;  %7296 = vmatprep.mubr.msk.bf16.mxu0 %vm5092_vm0, %v5050_v9 }
 0x3d5   : > { %v4913_v31 = vadd.f32 %v7149_v29, %v9667_v41  ;;  %v4994_v22 = vmax.f32 %v4910_v24, 0.0 }
 0x3d7   : > { %v4995_v53 = vmax.f32 %v4913_v31, 0.0  ;;  %v7150_v40 = vpop.f32.mrb[48].mxu1 }
 0x3d8   : > { %v7151_v56 = vpop.f32.mrb[49].mxu1 }
 0x3d9   : > { %v5051_v2 = vpack.c.bf16 %v4995_v53, %v4994_v22  ;;  %v7152_v43 = vadd.f32 %v7151_v56, %v7150_v40  ;;  %v7153_v37 = vpop.f32.mrb[50].mxu1 }
 0x3da   : > { %v7154_v47 = vpop.f32.mrb[51].mxu1 }
 0x3db   : > { %v4918_v4 = vadd.f32 %v7152_v43, %v9671_v21  ;;  %v7155_v54 = vadd.f32 %v7154_v47, %v7153_v37  ;;  %7297 = vmatmul.mubr.msk.bf16.gmra.mrb[28].mxu0 %vm5092_vm0, %v5051_v2 }
 0x3dd   : > { %v4921_v59 = vadd.f32 %v7155_v54, %v9673_v6  ;;  %v4996_v15 = vmax.f32 %v4918_v4, 0.0 }
 0x3df   : > { %v4997_v58 = vmax.f32 %v4921_v59, 0.0  ;;  %v7156_v45 = vpop.f32.mrb[52].mxu1 }
 0x3e0   : > { %v7157_v1 = vpop.f32.mrb[53].mxu1 }
 0x3e1   : > { %v5052_v41 = vpack.c.bf16 %v4997_v58, %v4996_v15  ;;  %v7158_v35 = vadd.f32 %v7157_v1, %v7156_v45  ;;  %v7159_v7 = vpop.f32.mrb[54].mxu1 }
 0x3e2   : > { %v7160_v28 = vpop.f32.mrb[55].mxu1 }
 0x3e3   : > { %v4926_v0 = vadd.f32 %v7158_v35, %v9677_v17  ;;  %v7161_v25 = vadd.f32 %v7160_v28, %v7159_v7  ;;  %7300 = vmatprep.mubr.msk.bf16.mxu0 %vm5092_vm0, %v5052_v41 }
 0x3e5   : > { %v4929_v21 = vadd.f32 %v7161_v25, %v9679_v8  ;;  %v4998_v51 = vmax.f32 %v4926_v0, 0.0 }
 0x3e7   : > { %v4999_v36 = vmax.f32 %v4929_v21, 0.0  ;;  %v7162_v34 = vpop.f32.mrb[56].mxu1 }
 0x3e8   : > { %v7163_v33 = vpop.f32.mrb[57].mxu1 }
 0x3e9   : > { %v5053_v6 = vpack.c.bf16 %v4999_v36, %v4998_v51  ;;  %v7164_v14 = vadd.f32 %v7163_v33, %v7162_v34  ;;  %v7165_v38 = vpop.f32.mrb[58].mxu1 }
 0x3ea   : > { %v7166_v26 = vpop.f32.mrb[59].mxu1 }
 0x3eb   : > { %v4934_v12 = vadd.f32 %v7164_v14, %v9683_v20  ;;  %v7167_v44 = vadd.f32 %v7166_v26, %v7165_v38  ;;  %7301 = vmatmul.mubr.msk.bf16.gmra.mrb[32].mxu0 %vm5092_vm0, %v5053_v6 }
 0x3ed   : > { %v4937_v17 = vadd.f32 %v7167_v44, %v9685_v50  ;;  %v5000_v5 = vmax.f32 %v4934_v12, 0.0 }
 0x3ef   : > { %v5001_v32 = vmax.f32 %v4937_v17, 0.0  ;;  %v7168_v9 = vpop.f32.mrb[60].mxu1 }
 0x3f0   : > { %v7169_v10 = vpop.f32.mrb[61].mxu1 }
 0x3f1   : > { %v5054_v8 = vpack.c.bf16 %v5001_v32, %v5000_v5  ;;  %v7170_v19 = vadd.f32 %v7169_v10, %v7168_v9  ;;  %v7171_v18 = vpop.f32.mrb[62].mxu1 }
 0x3f2   : > { %v7172_v24 = vpop.f32.mrb[63].mxu1 }
 0x3f3   : > { %v4942_v29 = vadd.f32 %v7170_v19, %v9689_v55  ;;  %v7173_v31 = vadd.f32 %v7172_v24, %v7171_v18  ;;  %7304 = vmatprep.mubr.msk.bf16.mxu0 %vm5092_vm0, %v5054_v8  ;;  %v5017_v18 = vmax.f32 %v9169_v23, 0.0  ;;  %v5014_v24 = vmax.f32 %v9106_v11, 0.0  ;;  %v9999_v11 = vld [vmem:[#allocation15_spill] sm:$0xff] }
 0x3f5   : > { %v4945_v20 = vadd.f32 %v7173_v31, %v9691_v39  ;;  %v5002_v22 = vmax.f32 %v4942_v29, 0.0 }
 0x3f7   : > { %v5003_v53 = vmax.f32 %v4945_v20, 0.0  ;;  %v7174_v40 = vpop.f32.mrb[64].mxu1  ;;  %v5021_v20 = vmax.f32 %v9187_v57, 0.0 }
 0x3f8   : > { %v7175_v56 = vpop.f32.mrb[65].mxu1 }
 0x3f9   : > { %v5055_v50 = vpack.c.bf16 %v5003_v53, %v5002_v22  ;;  %v7176_v2 = vadd.f32 %v7175_v56, %v7174_v40  ;;  %v7177_v43 = vpop.f32.mrb[66].mxu1  ;;  %v10000_v53 = vld [vmem:[#allocation19_spill] sm:$0xff]  ;;  %v10001_v56 = vld [vmem:[#allocation14_spill] sm:$0xff] }
 0x3fa   : > { %v7178_v37 = vpop.f32.mrb[67].mxu1  ;;  %v5025_v40 = vmax.f32 %v10000_v53, 0.0 }
 0x3fb   : > { %v4950_v47 = vadd.f32 %v7176_v2, %v9695_v30  ;;  %v7179_v4 = vadd.f32 %v7178_v37, %v7177_v43  ;;  %7305 = vmatmul.mubr.msk.bf16.gmra.mrb[36].mxu0 %vm5092_vm0, %v5055_v50  ;;  %v5022_v50 = vmax.f32 %v10001_v56, 0.0  ;;  %v10002_v2 = vld [vmem:[#allocation17_spill] sm:$0xff]  ;;  %v10004_v37 = vld [vmem:[#allocation23_spill] sm:$0xff] }
 0x3fd   : > { %v4953_v55 = vadd.f32 %v7179_v4, %v9697_v52  ;;  %v5004_v54 = vmax.f32 %v4950_v47, 0.0  ;;  %v5029_v47 = vmax.f32 %v10004_v37, 0.0  ;;  %v10005_v4 = vld [vmem:[#allocation16_spill] sm:$0xff] }
 0x3ff   : > { %v5005_v59 = vmax.f32 %v4953_v55, 0.0  ;;  %v7180_v15 = vpop.f32.mrb[68].mxu1  ;;  %v5026_v55 = vmax.f32 %v10005_v4, 0.0 }
 0x400   : > { %v7181_v58 = vpop.f32.mrb[69].mxu1 }
 0x401   : > { %v5056_v39 = vpack.c.bf16 %v5005_v59, %v5004_v54  ;;  %v7182_v45 = vadd.f32 %v7181_v58, %v7180_v15  ;;  %v7183_v1 = vpop.f32.mrb[70].mxu1  ;;  %v10006_v54 = vld [vmem:[#allocation21_spill] sm:$0xff] }
 0x402   : > { %v7184_v41 = vpop.f32.mrb[71].mxu1  ;;  %v5028_v59 = vmax.f32 %v10006_v54, 0.0 }
 0x403   : > { %v4958_v35 = vadd.f32 %v7182_v45, %v9701_v60  ;;  %v7185_v7 = vadd.f32 %v7184_v41, %v7183_v1  ;;  %7308 = vmatprep.mubr.msk.bf16.mxu0 %vm5092_vm0, %v5056_v39  ;;  %v10007_v39 = vld [vmem:[#allocation22_spill] sm:$0xff]  ;;  %v10008_v1 = vld [vmem:[#allocation27_spill] sm:$0xff] }
 0x404   : > { %v5068_v58 = vpack.c.bf16 %v5029_v47, %v5028_v59  ;;  %v5031_v45 = vmax.f32 %v10007_v39, 0.0  ;;  %v5033_v41 = vmax.f32 %v10008_v1, 0.0 }
 0x405   : > { %v4961_v30 = vadd.f32 %v7185_v7, %v9703_v13  ;;  %v5006_v28 = vmax.f32 %v4958_v35, 0.0  ;;  %v10009_v35 = vld [vmem:[#allocation20_spill] sm:$0xff] }
 0x406   : > { %v5030_v7 = vmax.f32 %v10009_v35, 0.0 }
 0x407   : > { %v5007_v0 = vmax.f32 %v4961_v30, 0.0  ;;  %v7186_v25 = vpop.f32.mrb[72].mxu1  ;;  %v10010_v30 = vld [vmem:[#allocation25_spill] sm:$0xff] }
 0x408   : > { %v7187_v21 = vpop.f32.mrb[73].mxu1 }
 0x409   : > { %v5057_v52 = vpack.c.bf16 %v5007_v0, %v5006_v28  ;;  %v7188_v51 = vadd.f32 %v7187_v21, %v7186_v25  ;;  %v7189_v36 = vpop.f32.mrb[74].mxu1  ;;  %v5032_v28 = vmax.f32 %v10010_v30, 0.0  ;;  %v5069_v0 = vpack.c.bf16 %v5031_v45, %v5030_v7  ;;  %v10011_v21 = vld [vmem:[#allocation26_spill] sm:$0xff] }
 0x40a   : > { %v7190_v34 = vpop.f32.mrb[75].mxu1 }
 0x40b   : > { %v4966_v33 = vadd.f32 %v7188_v51, %v9707_v27  ;;  %v7191_v6 = vadd.f32 %v7190_v34, %v7189_v36  ;;  %7309 = vmatmul.mubr.msk.bf16.gmra.mrb[40].mxu0 %vm5092_vm0, %v5057_v52  ;;  %v5070_v25 = vpack.c.bf16 %v5033_v41, %v5032_v28  ;;  %v5035_v52 = vmax.f32 %v10011_v21, 0.0  ;;  %v10012_v51 = vld [vmem:[#allocation31_spill] sm:$0xff]  ;;  %v10013_v34 = vld [vmem:[#allocation24_spill] sm:$0xff] }
 0x40c   : > { %v5037_v36 = vmax.f32 %v10012_v51, 0.0 }
 0x40d   : > { %v4969_v60 = vadd.f32 %v7191_v6, %v9709_v62  ;;  %v5008_v14 = vmax.f32 %v4966_v33, 0.0  ;;  %v5015_v62 = vmax.f32 %v9116_v42, 0.0  ;;  %v5020_v42 = vmax.f32 %v9179_v3, 0.0  ;;  %v10014_v6 = vld [vmem:[#allocation29_spill] sm:$0xff] }
 0x40e   : > { %v5034_v33 = vmax.f32 %v10013_v34, 0.0 }
 0x40f   : > { %v5009_v38 = vmax.f32 %v4969_v60, 0.0  ;;  %v7192_v26 = vpop.f32.mrb[76].mxu1  ;;  %v5061_v29 = vpack.c.bf16 %v5015_v62, %v5014_v24  ;;  %v5064_v23 = vpack.c.bf16 %v5021_v20, %v5020_v42  ;;  %v5036_v60 = vmax.f32 %v10014_v6, 0.0  ;;  %v10020_v62 = vld [vmem:[#allocation34_spill] sm:$0xff] }
 0x410   : > { %v7193_v12 = vpop.f32.mrb[77].mxu1 }
 0x411   : > { %v5058_v13 = vpack.c.bf16 %v5009_v38, %v5008_v14  ;;  %v7194_v44 = vadd.f32 %v7193_v12, %v7192_v26  ;;  %v7195_v17 = vpop.f32.mrb[78].mxu1  ;;  %v5071_v14 = vpack.c.bf16 %v5035_v52, %v5034_v33  ;;  %v5072_v38 = vpack.c.bf16 %v5037_v36, %v5036_v60  ;;  %v10015_v26 = vld [vmem:[#allocation30_spill] sm:$0xff] }
 0x412   : > { %v7196_v5 = vpop.f32.mrb[79].mxu1  ;;  %v5039_v12 = vmax.f32 %v10015_v26, 0.0 }
 0x413   : > { %v4974_v32 = vadd.f32 %v7194_v44, %v9713_v46  ;;  %v7197_v9 = vadd.f32 %v7196_v5, %v7195_v17  ;;  %7312 = vmatprep.mubr.msk.bf16.mxu0 %vm5092_vm0, %v5058_v13  ;;  %v5016_v46 = vmax.f32 %v9161_v48, 0.0  ;;  %v5023_v48 = vmax.f32 %v9999_v11, 0.0  ;;  %v10016_v13 = vld [vmem:[#allocation33_spill] sm:$0xff]  ;;  %v10017_v17 = vld [vmem:[#allocation28_spill] sm:$0xff] }
 0x414   : > { %v5041_v44 = vmax.f32 %v10016_v13, 0.0  ;;  %v5038_v5 = vmax.f32 %v10017_v17, 0.0 }
 0x415   : > { %v4977_v27 = vadd.f32 %v7197_v9, %v9715_v49  ;;  %v5010_v10 = vmax.f32 %v4974_v32, 0.0  ;;  %v5062_v31 = vpack.c.bf16 %v5017_v18, %v5016_v46  ;;  %v5019_v49 = vmax.f32 %v9166_v16, 0.0  ;;  %v10018_v32 = vld [vmem:[#allocation32_spill] sm:$0xff] }
 0x416   : > { %v5024_v16 = vmax.f32 %v10002_v2, 0.0  ;;  %v5065_v43 = vpack.c.bf16 %v5023_v48, %v5022_v50  ;;  %v5040_v9 = vmax.f32 %v10018_v32, 0.0  ;;  %v5042_v18 = vmax.f32 %v10020_v62, 0.0 }
 0x417   : > { %v5011_v8 = vmax.f32 %v4977_v27, 0.0  ;;  %v5073_v27 = vpack.c.bf16 %v5039_v12, %v5038_v5 }
 0x418   : > { %v5066_v57 = vpack.c.bf16 %v5025_v40, %v5024_v16 }
 0x419   : > { %v5059_v19 = vpack.c.bf16 %v5011_v8, %v5010_v10  ;;  %v5074_v10 = vpack.c.bf16 %v5041_v44, %v5040_v9  ;;  %v10019_v8 = vld [vmem:[#allocation35_spill] sm:$0xff] }
 0x41b   : > { %7313 = vmatmul.mubr.msk.bf16.gmra.mrb[44].mxu0 %vm5092_vm0, %v5059_v19  ;;  %v5043_v19 = vmax.f32 %v10019_v8, 0.0 }
 0x41c   : > { %7316 = vmatprep.mubr.msk.bf16.mxu0 %vm5092_vm0, %v9153_v61  ;;  %v5018_v61 = vmax.f32 %v9156_v63, 0.0  ;;  %v10003_v63 = vld [vmem:[#allocation18_spill] sm:$0xff] }
 0x41d   : > { %v5027_v3 = vmax.f32 %v10003_v63, 0.0  ;;  %v5075_v24 = vpack.c.bf16 %v5043_v19, %v5042_v18 }
 0x41e   : > { %v5063_v22 = vpack.c.bf16 %v5019_v49, %v5018_v61 }
 0x41f   : > { %v5067_v15 = vpack.c.bf16 %v5027_v3, %v5026_v55 }
 0x423   : > { %7317 = vmatmul.mubr.msk.bf16.gmra.mrb[48].mxu0 %vm5092_vm0, %v5061_v29 }
 0x424   : > { %7320 = vmatprep.mubr.msk.bf16.mxu0 %vm5092_vm0, %v5062_v31 }
 0x42b   : > { %7321 = vmatmul.mubr.msk.bf16.gmra.mrb[52].mxu0 %vm5092_vm0, %v5063_v22 }
 0x42c   : > { %7324 = vmatprep.mubr.msk.bf16.mxu0 %vm5092_vm0, %v5064_v23 }
 0x433   : > { %7325 = vmatmul.mubr.msk.bf16.gmra.mrb[56].mxu0 %vm5092_vm0, %v5065_v43 }
 0x434   : > { %7328 = vmatprep.mubr.msk.bf16.mxu0 %vm5092_vm0, %v5066_v57 }
 0x43b   : > { %7329 = vmatmul.mubr.msk.bf16.gmra.mrb[60].mxu0 %vm5092_vm0, %v5067_v15 }
 0x43c   : > { %7332 = vmatprep.mubr.msk.bf16.mxu0 %vm5092_vm0, %v5068_v58 }
 0x443   : > { %7333 = vmatmul.mubr.msk.bf16.gmra.mrb[64].mxu0 %vm5092_vm0, %v5069_v0 }
 0x444   : > { %7336 = vmatprep.mubr.msk.bf16.mxu0 %vm5092_vm0, %v5070_v25 }
 0x44b   : > { %7337 = vmatmul.mubr.msk.bf16.gmra.mrb[68].mxu0 %vm5092_vm0, %v5071_v14 }
 0x44c   : > { %7340 = vmatprep.mubr.msk.bf16.mxu0 %vm5092_vm0, %v5072_v38 }
 0x453   : > { %7341 = vmatmul.mubr.msk.bf16.gmra.mrb[72].mxu0 %vm5092_vm0, %v5073_v27 }
 0x454   : > { %7344 = vmatprep.mubr.msk.bf16.mxu0 %vm5092_vm0, %v5074_v10 }
 0x45b   : > { %7345 = vmatmul.mubr.msk.bf16.gmra.mrb[76].mxu0 %vm5092_vm0, %v5075_v24 }
 0x47e   : > { %v7286_v46 = vpop.f32.mrb[16].mxu0 }
 0x47f   : > { %5480 = vst [vmem:[%s9813_s6 + $0x10] sm:$0xff] %v7286_v46  ;;  %v5223_v29 = vpop.f32.mrb[17].mxu0 }
 0x480   : > { %5478 = vst [vmem:[%s9813_s6] sm:$0xff] %v5223_v29  ;;  %v7287_v31 = vpop.f32.mrb[18].mxu0 }
 0x481   : > { %5481 = vst [vmem:[%s9813_s6 + $0x18] sm:$0xff] %v7287_v31  ;;  %v5226_v49 = vpop.f32.mrb[19].mxu0 }
 0x482   : > { %5479 = vst [vmem:[%s9813_s6 + $0x8] sm:$0xff] %v5226_v49 }
 0x48e   : > { %v7290_v20 = vpop.f32.mrb[20].mxu0 }
 0x48f   : > { %5484 = vst [vmem:[%s9813_s6 + $0x30] sm:$0xff] %v7290_v20  ;;  %v5239_v61 = vpop.f32.mrb[21].mxu0 }
 0x490   : > { %5482 = vst [vmem:[%s9813_s6 + $0x20] sm:$0xff] %v5239_v61  ;;  %v7291_v42 = vpop.f32.mrb[22].mxu0 }
 0x491   : > { %5485 = vst [vmem:[%s9813_s6 + $0x38] sm:$0xff] %v7291_v42  ;;  %v5242_v22 = vpop.f32.mrb[23].mxu0 }
 0x492   : > { %5483 = vst [vmem:[%s9813_s6 + $0x28] sm:$0xff] %v5242_v22 }
 0x49e   : > { %v7294_v23 = vpop.f32.mrb[24].mxu0 }
 0x49f   : > { %5488 = vst [vmem:[%s9813_s6 + $0x50] sm:$0xff] %v7294_v23  ;;  %v5255_v11 = vpop.f32.mrb[25].mxu0 }
 0x4a0   : > { %5486 = vst [vmem:[%s9813_s6 + $0x40] sm:$0xff] %v5255_v11  ;;  %v7295_v48 = vpop.f32.mrb[26].mxu0 }
 0x4a1   : > { %5489 = vst [vmem:[%s9813_s6 + $0x58] sm:$0xff] %v7295_v48  ;;  %v5258_v53 = vpop.f32.mrb[27].mxu0 }
 0x4a2   : > { %5487 = vst [vmem:[%s9813_s6 + $0x48] sm:$0xff] %v5258_v53 }
 0x4ae   : > { %v7298_v40 = vpop.f32.mrb[28].mxu0 }
 0x4af   : > { %5492 = vst [vmem:[%s9813_s6 + $0x70] sm:$0xff] %v7298_v40  ;;  %v5271_v56 = vpop.f32.mrb[29].mxu0 }
 0x4b0   : > { %5490 = vst [vmem:[%s9813_s6 + $0x60] sm:$0xff] %v5271_v56  ;;  %v7299_v50 = vpop.f32.mrb[30].mxu0 }
 0x4b1   : > { %5493 = vst [vmem:[%s9813_s6 + $0x78] sm:$0xff] %v7299_v50  ;;  %v5274_v2 = vpop.f32.mrb[31].mxu0 }
 0x4b2   : > { %5491 = vst [vmem:[%s9813_s6 + $0x68] sm:$0xff] %v5274_v2 }
 0x4be   : > { %v7302_v16 = vpop.f32.mrb[32].mxu0 }
 0x4bf   : > { %5496 = vst [vmem:[%s9813_s6 + $0x90] sm:$0xff] %v7302_v16  ;;  %v5287_v43 = vpop.f32.mrb[33].mxu0 }
 0x4c0   : > { %5494 = vst [vmem:[%s9813_s6 + $0x80] sm:$0xff] %v5287_v43  ;;  %v7303_v57 = vpop.f32.mrb[34].mxu0 }
 0x4c1   : > { %5497 = vst [vmem:[%s9813_s6 + $0x98] sm:$0xff] %v7303_v57  ;;  %v5290_v63 = vpop.f32.mrb[35].mxu0 }
 0x4c2   : > { %5495 = vst [vmem:[%s9813_s6 + $0x88] sm:$0xff] %v5290_v63 }
 0x4ce   : > { %v7306_v3 = vpop.f32.mrb[36].mxu0 }
 0x4cf   : > { %5500 = vst [vmem:[%s9813_s6 + $0xb0] sm:$0xff] %v7306_v3  ;;  %v5303_v37 = vpop.f32.mrb[37].mxu0 }
 0x4d0   : > { %5498 = vst [vmem:[%s9813_s6 + $0xa0] sm:$0xff] %v5303_v37  ;;  %v7307_v47 = vpop.f32.mrb[38].mxu0 }
 0x4d1   : > { %5501 = vst [vmem:[%s9813_s6 + $0xb8] sm:$0xff] %v7307_v47  ;;  %v5306_v4 = vpop.f32.mrb[39].mxu0 }
 0x4d2   : > { %5499 = vst [vmem:[%s9813_s6 + $0xa8] sm:$0xff] %v5306_v4 }
 0x4de   : > { %v7310_v55 = vpop.f32.mrb[40].mxu0 }
 0x4df   : > { %5504 = vst [vmem:[%s9813_s6 + $0xd0] sm:$0xff] %v7310_v55  ;;  %v5319_v54 = vpop.f32.mrb[41].mxu0 }
 0x4e0   : > { %5502 = vst [vmem:[%s9813_s6 + $0xc0] sm:$0xff] %v5319_v54  ;;  %v7311_v59 = vpop.f32.mrb[42].mxu0 }
 0x4e1   : > { %5505 = vst [vmem:[%s9813_s6 + $0xd8] sm:$0xff] %v7311_v59  ;;  %v5322_v15 = vpop.f32.mrb[43].mxu0 }
 0x4e2   : > { %5503 = vst [vmem:[%s9813_s6 + $0xc8] sm:$0xff] %v5322_v15 }
 0x4ee   : > { %v7314_v58 = vpop.f32.mrb[44].mxu0 }
 0x4ef   : > { %5508 = vst [vmem:[%s9813_s6 + $0xf0] sm:$0xff] %v7314_v58  ;;  %v5335_v39 = vpop.f32.mrb[45].mxu0 }
 0x4f0   : > { %5506 = vst [vmem:[%s9813_s6 + $0xe0] sm:$0xff] %v5335_v39  ;;  %v7315_v45 = vpop.f32.mrb[46].mxu0 }
 0x4f1   : > { %5509 = vst [vmem:[%s9813_s6 + $0xf8] sm:$0xff] %v7315_v45  ;;  %v5338_v1 = vpop.f32.mrb[47].mxu0 }
 0x4f2   : > { %5507 = vst [vmem:[%s9813_s6 + $0xe8] sm:$0xff] %v5338_v1 }
 0x4f6   : > { %v7318_v41 = vpop.f32.mrb[48].mxu0 }
 0x4f7   : > { %5512 = vst [vmem:[%s9813_s6 + $0x110] sm:$0xff] %v7318_v41  ;;  %v5351_v35 = vpop.f32.mrb[49].mxu0 }
 0x4f8   : > { %5510 = vst [vmem:[%s9813_s6 + $0x100] sm:$0xff] %v5351_v35  ;;  %v7319_v7 = vpop.f32.mrb[50].mxu0 }
 0x4f9   : > { %5513 = vst [vmem:[%s9813_s6 + $0x118] sm:$0xff] %v7319_v7  ;;  %v5354_v30 = vpop.f32.mrb[51].mxu0 }
 0x4fa   : > { %5511 = vst [vmem:[%s9813_s6 + $0x108] sm:$0xff] %v5354_v30 }
 0x4fe   : > { %v7322_v28 = vpop.f32.mrb[52].mxu0 }
 0x4ff   : > { %5516 = vst [vmem:[%s9813_s6 + $0x130] sm:$0xff] %v7322_v28  ;;  %v5367_v0 = vpop.f32.mrb[53].mxu0 }
 0x500   : > { %5514 = vst [vmem:[%s9813_s6 + $0x120] sm:$0xff] %v5367_v0  ;;  %v7323_v25 = vpop.f32.mrb[54].mxu0 }
 0x501   : > { %5517 = vst [vmem:[%s9813_s6 + $0x138] sm:$0xff] %v7323_v25  ;;  %v5370_v21 = vpop.f32.mrb[55].mxu0 }
 0x502   : > { %5515 = vst [vmem:[%s9813_s6 + $0x128] sm:$0xff] %v5370_v21 }
 0x506   : > { %v7326_v52 = vpop.f32.mrb[56].mxu0 }
 0x507   : > { %5520 = vst [vmem:[%s9813_s6 + $0x150] sm:$0xff] %v7326_v52  ;;  %v5383_v51 = vpop.f32.mrb[57].mxu0 }
 0x508   : > { %5518 = vst [vmem:[%s9813_s6 + $0x140] sm:$0xff] %v5383_v51  ;;  %v7327_v36 = vpop.f32.mrb[58].mxu0 }
 0x509   : > { %5521 = vst [vmem:[%s9813_s6 + $0x158] sm:$0xff] %v7327_v36  ;;  %v5386_v34 = vpop.f32.mrb[59].mxu0 }
 0x50a   : > { %5519 = vst [vmem:[%s9813_s6 + $0x148] sm:$0xff] %v5386_v34 }
 0x50e   : > { %v7330_v33 = vpop.f32.mrb[60].mxu0 }
 0x50f   : > { %5524 = vst [vmem:[%s9813_s6 + $0x170] sm:$0xff] %v7330_v33  ;;  %v5399_v6 = vpop.f32.mrb[61].mxu0 }
 0x510   : > { %5522 = vst [vmem:[%s9813_s6 + $0x160] sm:$0xff] %v5399_v6  ;;  %v7331_v60 = vpop.f32.mrb[62].mxu0 }
 0x511   : > { %5525 = vst [vmem:[%s9813_s6 + $0x178] sm:$0xff] %v7331_v60  ;;  %v5402_v14 = vpop.f32.mrb[63].mxu0 }
 0x512   : > { %5523 = vst [vmem:[%s9813_s6 + $0x168] sm:$0xff] %v5402_v14 }
 0x516   : > { %v7334_v38 = vpop.f32.mrb[64].mxu0 }
 0x517   : > { %5528 = vst [vmem:[%s9813_s6 + $0x190] sm:$0xff] %v7334_v38  ;;  %v5415_v26 = vpop.f32.mrb[65].mxu0 }
 0x518   : > { %5526 = vst [vmem:[%s9813_s6 + $0x180] sm:$0xff] %v5415_v26  ;;  %v7335_v12 = vpop.f32.mrb[66].mxu0 }
 0x519   : > { %5529 = vst [vmem:[%s9813_s6 + $0x198] sm:$0xff] %v7335_v12  ;;  %v5418_v13 = vpop.f32.mrb[67].mxu0 }
 0x51a   : > { %5527 = vst [vmem:[%s9813_s6 + $0x188] sm:$0xff] %v5418_v13 }
 0x51e   : > { %v7338_v44 = vpop.f32.mrb[68].mxu0 }
 0x51f   : > { %5532 = vst [vmem:[%s9813_s6 + $0x1b0] sm:$0xff] %v7338_v44  ;;  %v5431_v17 = vpop.f32.mrb[69].mxu0 }
 0x520   : > { %5530 = vst [vmem:[%s9813_s6 + $0x1a0] sm:$0xff] %v5431_v17  ;;  %v7339_v5 = vpop.f32.mrb[70].mxu0 }
 0x521   : > { %5533 = vst [vmem:[%s9813_s6 + $0x1b8] sm:$0xff] %v7339_v5  ;;  %v5434_v32 = vpop.f32.mrb[71].mxu0 }
 0x522   : > { %5531 = vst [vmem:[%s9813_s6 + $0x1a8] sm:$0xff] %v5434_v32 }
 0x526   : > { %v7342_v9 = vpop.f32.mrb[72].mxu0 }
 0x527   : > { %5536 = vst [vmem:[%s9813_s6 + $0x1d0] sm:$0xff] %v7342_v9  ;;  %v5447_v27 = vpop.f32.mrb[73].mxu0 }
 0x528   : > { %5534 = vst [vmem:[%s9813_s6 + $0x1c0] sm:$0xff] %v5447_v27  ;;  %v7343_v10 = vpop.f32.mrb[74].mxu0 }
 0x529   : > { %5537 = vst [vmem:[%s9813_s6 + $0x1d8] sm:$0xff] %v7343_v10  ;;  %v5450_v8 = vpop.f32.mrb[75].mxu0 }
 0x52a   : > { %5535 = vst [vmem:[%s9813_s6 + $0x1c8] sm:$0xff] %v5450_v8 }
 0x52e   : > { %v7346_v19 = vpop.f32.mrb[76].mxu0 }
 0x52f   : > { %5540 = vst [vmem:[%s9813_s6 + $0x1f0] sm:$0xff] %v7346_v19  ;;  %v5463_v62 = vpop.f32.mrb[77].mxu0 }
 0x530   : > { %5538 = vst [vmem:[%s9813_s6 + $0x1e0] sm:$0xff] %v5463_v62  ;;  %v7347_v18 = vpop.f32.mrb[78].mxu0 }
 0x531   : > { %5541 = vst [vmem:[%s9813_s6 + $0x1f8] sm:$0xff] %v7347_v18  ;;  %v5466_v24 = vpop.f32.mrb[79].mxu0 }
 0x532   : > { %5539 = vst [vmem:[%s9813_s6 + $0x1e8] sm:$0xff] %v5466_v24 }
 0x533   : > { %8143 = shalt.err (!%p8140_p6)
}
 0x534   : > { %s8144_s13 = scalar_lea.hbm %s9881_s17, 8192  ;;  %s8148_s16 = scalar_lea.hbm %s9935_s5, 16384 }
 0x535   : > { %p8145_p8 = scmp.ne.s32.totalorder %s9881_s17, %s8144_s13  ;;  %p8149_p4 = scmp.lt.u32.totalorder %s9881_s17, %s9935_s5 }
 0x536   : > { %p8150_p11 = scmp.lt.u32.totalorder %s8148_s16, %s8144_s13  ;;  %p8152_p3 = scmp.lt.u32.totalorder %s8144_s13, %s9881_s17 }
 0x537   : > { %p8146_p10 = pnand %p8145_p8, %p8339_p12 }
 0x538   : > { %p8151_p13 = por %p8150_p11, %p8149_p4 }
 0x539   : > { %p8147_p0 = pneg %p8146_p10 }
 0x53a   : > { %p8153_p7 = por %p8152_p3, %p8151_p13 }
 0x53c   : > { %p8154_p9 = pnand %p8153_p7, %p8147_p0 }
 0x53e   : > { %8157 = shalt.err (!%p8154_p9)
}
 0x53f   : > { %s8216_s24 = smov 128   ;;  %s8217_s7 = smov 8  }
 0x540   : > { %7378 = dma.vmem_to_hbm [thread:$0]  (%p8339_p12), %s9883_s12, 8192, %s9881_s17, %s5543_s22, %s8216_s24, %s8216_s24, %s8217_s7  }
 0x541 PF: > { %s5571_s6 = sand.u32 1, %s8192_s18   ;;  %p10021_p2 = scmp.ne.s32.totalorder %s9964_s25, 0 }
 0x542   : > { %p10022_p5 = scmp.ge.s32.totalorder %s8204_s21, 2  ;;  %s5572_s29 = scalar_lea.sflag [#allocation4], %s5571_s6 }
 0x544   : > { %p7392_p1 = pnand %p10022_p5, %p10021_p2 }
 0x546   : > { %8187 = dma.done.wait (!%p7392_p1), %s5572_s29, 8192  }
 0x547   : > { %8189 = vsyncadd (!%p7392_p1), %s5572_s29, 4294959104  ;;  %s10023_s8 = sld [smem:[#allocation13_spill]]  ;;  %p21_p6 = scmp.ge.s32.totalorder %s8304_s30, 4  }
 0x548   : > { %s10024_s18 = smov %s8196_s19  ;;  %s10025_s19 = smov %s8200_s20 }
 0x549   : > { %s10027_s21 = smov %s8304_s30  ;;  %23 = sbr.rel (!%p21_p6) target bundleno = 10 (0xa), region = 102 }
 0x54d   : > { %s10026_s20 = smov %s10023_s8 }
 0x550   :  { %5577 = vsyncpa [#allocation3], 1 }
 0x551   :  { %5579 = vsyncpa [#allocation3 + $0x1], 1 }
 0x552   :  { %5580 = vsyncpa [#allocation6], 1 }
 0x553   :  { %5582 = vsyncpa [#allocation6 + $0x1], 1 }
 0x554   :  { %5583 = vsyncpa [#allocation4], 1 }
 0x555   :  { %5585 = vsyncpa [#allocation4 + $0x1], 1 }

</bundles_post_ra>
